<compile_context>
chip_gen: v5e
topology: v5e:2x2
jax: 0.10.0
libtpu: 0.0.40
codegen_flags: <defaults>
</compile_context>

<pallas_src>
import functools

import jax
import jax.numpy as jnp
import numpy as np
from jax import lax
from jax.experimental import pallas as pl
from jax.experimental.pallas import tpu as pltpu

_LANES = 128
_SUBLANES = 8
_ROW_GROUP = _SUBLANES * _LANES            # 1024 rows; multiple of every sublane req.
_TARGET_STEP_BYTES = 4 * 1024 * 1024       # aim >= ~4 MB HBM DMA per grid step
_VMEM_INPUT_BUDGET = 24 * 1024 * 1024      # double-buffered input tiles
_VMEM_LIMIT = 32 * 1024 * 1024             # <= default scoped VMEM on v6e/v7x


def _cdiv(a, b):
    return -(-a // b)


def _round_up(a, b):
    return _cdiv(a, b) * b


def _sublane_multiple(dtype):
    # f32 -> 8, bf16 -> 16, int8/fp8 -> 32 rows per packed sublane tile.
    return max(_SUBLANES, 32 // jnp.dtype(dtype).itemsize)


def _vmem_limit(in_bytes):
    # Raise the scoped-VMEM limit only as far as actually needed.
    return max(_VMEM_LIMIT, int(in_bytes) + (2 << 20))


@functools.lru_cache(maxsize=1)
def _two_tensorcores():
    """True only on dual-TensorCore parts (v7x); conservative on failure."""
    try:
        kind = jax.devices()[0].device_kind.lower()
    except Exception:
        return False
    return ("v7" in kind) or ("tpu7" in kind)


def _split(num_tiles):
    """(num_partials, tiles_per_partial, dimension_semantics)."""
    if _two_tensorcores() and num_tiles >= 2 and num_tiles % 2 == 0:
        return 2, num_tiles // 2, (pltpu.CORE_PARALLEL, pltpu.ARBITRARY)
    return 1, num_tiles, (pltpu.ARBITRARY, pltpu.ARBITRARY)


# ---------------------------------------------------------------------------
# Kernel 1: sum_b logsigmoid(sum_d (pos[b, d] - neg[b, d]))
# ---------------------------------------------------------------------------
def _bpr_kernel(pos_ref, neg_ref, out_ref, acc_ref, *,
                n_rows, block_rows, tiles_per_par, need_mask):
    p = pl.program_id(0)
    t = pl.program_id(1)

    @pl.when(t == 0)
    def _init():
        acc_ref[...] = jnp.zeros_like(acc_ref)

    # Stream native dtype from HBM, compute in f32.
    diff = pos_ref[...].astype(jnp.float32) - neg_ref[...].astype(jnp.float32)
    # Per-row scores -> lane-dense (tb/1024, 8, 128) so the transcendentals
    # below fill whole vregs instead of a 1-lane column.
    s = jnp.sum(diff, axis=-1).reshape(block_rows // _ROW_GROUP,
                                       _SUBLANES, _LANES)
    # numerically stable logsigmoid(x) = min(x, 0) - log1p(exp(-|x|))
    ls = jnp.minimum(s, 0.0) - jnp.log1p(jnp.exp(-jnp.abs(s)))
    if need_mask:
        # Ragged last tile: rows beyond n_rows contain uninitialized VMEM.
        base = (p * tiles_per_par + t) * block_rows
        row = (base
               + lax.broadcasted_iota(jnp.int32, s.shape, 0) * _ROW_GROUP
               + lax.broadcasted_iota(jnp.int32, s.shape, 1) * _LANES
               + lax.broadcasted_iota(jnp.int32, s.shape, 2))
        ls = jnp.where(row < n_rows, ls, 0.0)
    # Deferred reduction: keep an (8, 128) partial, pure VPU adds per step.
    acc_ref[...] += jnp.sum(ls, axis=0)

    @pl.when(t == pl.num_programs(1) - 1)
    def _finish():
        out_ref[...] = jnp.broadcast_to(
            jnp.sum(acc_ref[...]).reshape(1, 1, 1), out_ref.shape)


def _pick_bpr_rows(n_rows, dim, dtype):
    item = jnp.dtype(dtype).itemsize
    dim_pad = _round_up(dim, _LANES)                    # VMEM lane padding
    tb_target = _TARGET_STEP_BYTES // max(1, 2 * dim * item)
    tb_vmem = _VMEM_INPUT_BUDGET // max(1, 2 * 2 * dim_pad * item)
    tb = min(tb_target, tb_vmem, _round_up(n_rows, _ROW_GROUP))
    return max(_ROW_GROUP, (tb // _ROW_GROUP) * _ROW_GROUP)


def _bpr_logsigmoid_sum(pos, neg, block_rows=None):
    """Device-scalar sum over rows of logsigmoid(sum_d(pos - neg))."""
    dim = pos.shape[-1]
    n_rows = int(np.prod(pos.shape[:-1])) if pos.ndim > 1 else 1
    pos2 = pos.reshape(n_rows, dim)                     # free row-major views
    neg2 = neg.reshape(n_rows, dim)

    if block_rows is not None:
        tb = _round_up(int(block_rows), _ROW_GROUP)
    else:
        tb = _pick_bpr_rows(n_rows, dim, pos.dtype)

    num_tiles = _cdiv(n_rows, tb)
    num_par, tiles_per_par, sem = _split(num_tiles)
    need_mask = (num_par * tiles_per_par * tb) != n_rows

    item = jnp.dtype(pos.dtype).itemsize
    in_bytes = 2 * 2 * tb * _round_up(dim, _LANES) * item

    kernel = functools.partial(
        _bpr_kernel, n_rows=n_rows, block_rows=tb,
        tiles_per_par=tiles_per_par, need_mask=need_mask)

    out = pl.pallas_call(
        kernel,
        out_shape=jax.ShapeDtypeStruct((num_par, _SUBLANES, _LANES),
                                       jnp.float32),
        grid_spec=pltpu.PrefetchScalarGridSpec(
            num_scalar_prefetch=0,
            grid=(num_par, tiles_per_par),
            in_specs=[
                pl.BlockSpec((tb, dim), lambda p, t: (p * tiles_per_par + t, 0)),
                pl.BlockSpec((tb, dim), lambda p, t: (p * tiles_per_par + t, 0)),
            ],
            out_specs=pl.BlockSpec((1, _SUBLANES, _LANES),
                                   lambda p, t: (p, 0, 0)),
            scratch_shapes=[pltpu.VMEM((_SUBLANES, _LANES), jnp.float32)],
        ),
        compiler_params=pltpu.CompilerParams(
            dimension_semantics=sem,
            vmem_limit_bytes=_vmem_limit(in_bytes)),
    )(pos2, neg2)
    return jnp.sum(out[:, 0, 0])


# ---------------------------------------------------------------------------
# Kernel 2: sum of squares of one reg var (fed directly, no repacking copies).
# ---------------------------------------------------------------------------
def _sumsq_kernel(v_ref, out_ref, acc_ref, *,
                  n_rows, block_rows, tiles_per_par, need_mask):
    p = pl.program_id(0)
    t = pl.program_id(1)

    @pl.when(t == 0)
    def _init():
        acc_ref[...] = jnp.zeros_like(acc_ref)

    v = v_ref[...].astype(jnp.float32)
    sq = v * v
    if need_mask:
        base = (p * tiles_per_par + t) * block_rows
        row = base + lax.broadcasted_iota(jnp.int32, sq.shape, 0)
        sq = jnp.where(row < n_rows, sq, 0.0)
    cols = sq.shape[-1]
    # Deferred reduction: (8, C) partial via VPU adds over sublane groups.
    acc_ref[...] += jnp.sum(
        sq.reshape(block_rows // _SUBLANES, _SUBLANES, cols), axis=0)

    @pl.when(t == pl.num_programs(1) - 1)
    def _finish():
        out_ref[...] = jnp.broadcast_to(
            jnp.sum(acc_ref[...]).reshape(1, 1, 1), out_ref.shape)


def _as_2d(v):
    """Free (row-major) 2-D view of a reg var."""
    if v.ndim == 0:
        return v.reshape(1, 1)
    if v.ndim == 1:
        n = v.shape[0]
        if n % _LANES == 0:
            return v.reshape(n // _LANES, _LANES)       # lane-dense, free
        return v.reshape(n, 1)                          # small/odd 1-D vars
    return v.reshape(-1, v.shape[-1])


def _pick_reg_rows(rows, cols, dtype):
    item = jnp.dtype(dtype).itemsize
    cols_pad = _round_up(cols, _LANES)
    m = _sublane_multiple(dtype)
    tr_target = _TARGET_STEP_BYTES // max(1, cols * item)
    tr_vmem = _VMEM_INPUT_BUDGET // max(1, 2 * cols_pad * item)
    tr = min(tr_target, tr_vmem, _round_up(rows, m))
    return max(m, (tr // m) * m)


def _sum_of_squares_one(v, block_rows=None):
    mat = _as_2d(v)
    rows, cols = mat.shape
    m = _sublane_multiple(mat.dtype)
    if block_rows is not None:
        tr = max(m, (_round_up(int(block_rows), m)))
    else:
        tr = _pick_reg_rows(rows, cols, mat.dtype)

    num_tiles = _cdiv(rows, tr)
    num_par, tiles_per_par, sem = _split(num_tiles)
    need_mask = (num_par * tiles_per_par * tr) != rows

    item = jnp.dtype(mat.dtype).itemsize
    in_bytes = 2 * tr * _round_up(cols, _LANES) * item

    kernel = functools.partial(
        _sumsq_kernel, n_rows=rows, block_rows=tr,
        tiles_per_par=tiles_per_par, need_mask=need_mask)

    out = pl.pallas_call(
        kernel,
        out_shape=jax.ShapeDtypeStruct((num_par, _SUBLANES, _LANES),
                                       jnp.float32),
        grid_spec=pltpu.PrefetchScalarGridSpec(
            num_scalar_prefetch=0,
            grid=(num_par, tiles_per_par),
            in_specs=[
                pl.BlockSpec((tr, cols),
                             lambda p, t: (p * tiles_per_par + t, 0)),
            ],
            out_specs=pl.BlockSpec((1, _SUBLANES, _LANES),
                                   lambda p, t: (p, 0, 0)),
            scratch_shapes=[pltpu.VMEM((_SUBLANES, cols), jnp.float32)],
        ),
        compiler_params=pltpu.CompilerParams(
            dimension_semantics=sem,
            vmem_limit_bytes=_vmem_limit(in_bytes)),
    )(mat)
    return jnp.sum(out[:, 0, 0])


# ---------------------------------------------------------------------------
# Jitted end-to-end forward (scalar combination stays on device).
# ---------------------------------------------------------------------------
def _bpr_loss_impl(pos_preds, neg_preds, *reg_vars, lamb_reg,
                   bpr_block_rows=None, reg_block_rows=None):
    batch = pos_preds.shape[0]
    n_scores = int(np.prod(pos_preds.shape[:-1])) if pos_preds.ndim > 1 else 1
    ls_sum = _bpr_logsigmoid_sum(pos_preds, neg_preds, bpr_block_rows)
    bpr_loss = -(ls_sum / n_scores)
    if reg_vars:
        reg_sum = jnp.zeros((), jnp.float32)
        for v in reg_vars:
            reg_sum = reg_sum + _sum_of_squares_one(v, reg_block_rows)
        reg_loss = (lamb_reg * 0.5) * reg_sum / batch
    else:
        reg_loss = jnp.zeros((), jnp.float32)
    loss = bpr_loss + reg_loss
    return loss, bpr_loss, reg_loss


class BPRLoss:
    """JAX/Pallas port of the PyTorch BPRLoss module (forward pass)."""

    def __init__(self, lamb_reg, *, bpr_block_rows=None, reg_block_rows=None):
        self.lamb_reg = float(lamb_reg)
        self._fn = jax.jit(functools.partial(
            _bpr_loss_impl,
            lamb_reg=self.lamb_reg,
            bpr_block_rows=bpr_block_rows,
            reg_block_rows=reg_block_rows))

    def __call__(self, pos_preds, neg_preds, *reg_vars):
        loss, bpr_loss, reg_loss = self._fn(pos_preds, neg_preds, *reg_vars)
        # Device scalars, no .item()-style host sync in the hot path.
        return loss, [bpr_loss, reg_loss]


# ---------------------------------------------------------------------------
# Reference + test
# ---------------------------------------------------------------------------
def _reference(pos, neg, reg_vars, lamb_reg):
    pos = pos.astype(jnp.float32)
    neg = neg.astype(jnp.float32)
    x = jnp.sum(pos, axis=-1) - jnp.sum(neg, axis=-1)
    logsig = jnp.minimum(x, 0.0) - jnp.log1p(jnp.exp(-jnp.abs(x)))
    bpr = -jnp.mean(logsig)
    reg = jnp.zeros((), jnp.float32)
    for v in reg_vars:
        reg = reg + lamb_reg * 0.5 * jnp.sum(v.astype(jnp.float32) ** 2)
    reg = reg / pos.shape[0]
    return bpr + reg, bpr, reg


def _check(loss_mod, pos, neg, reg_vars, lamb):
    loss, (bpr_i, reg_i) = loss_mod(pos, neg, *reg_vars)
    loss = jax.block_until_ready(loss)
    ref_loss, ref_bpr, ref_reg = _reference(pos, neg, reg_vars, lamb)
    np.testing.assert_allclose(np.asarray(loss), np.asarray(ref_loss),
                               rtol=1e-4, atol=1e-5)
    np.testing.assert_allclose(np.asarray(bpr_i), np.asarray(ref_bpr),
                               rtol=1e-4, atol=1e-5)
    np.testing.assert_allclose(np.asarray(reg_i), np.asarray(ref_reg),
                               rtol=1e-4, atol=1e-5)


if __name__ == "__main__":
    key = jax.random.PRNGKey(0)
    ks = jax.random.split(key, 12)
    lamb = 1e-3

    # Case 1: canonical small shapes (B=8, D=32, two f32 reg vars).
    pos1 = jax.random.normal(ks[0], (8, 32), dtype=jnp.float32)
    neg1 = jax.random.normal(ks[1], (8, 32), dtype=jnp.float32)
    rv1a = jax.random.normal(ks[2], (16, 32), dtype=jnp.float32)
    rv1b = jax.random.normal(ks[3], (8, 32), dtype=jnp.float32)
    _check(BPRLoss(lamb), pos1, neg1, (rv1a, rv1b), lamb)

    # Case 2: ragged batch (mask on garbage tail rows) + 1-D reg var.
    pos2 = jax.random.normal(ks[4], (19, 32), dtype=jnp.float32)
    neg2 = jax.random.normal(ks[5], (19, 32), dtype=jnp.float32)
    rv2 = jax.random.normal(ks[6], (300,), dtype=jnp.float32)
    _check(BPRLoss(lamb), pos2, neg2, (rv2,), lamb)

    # Case 3: forced small blocks -> multi-tile reduction grids with a ragged
    # last tile (odd tile counts keep everything single-core on every gen).
    pos3 = jax.random.normal(ks[7], (2500, 32), dtype=jnp.float32)
    neg3 = jax.random.normal(ks[8], (2500, 32), dtype=jnp.float32)
    rv3 = jax.random.normal(ks[9], (2500, 40), dtype=jnp.float32)
    _check(BPRLoss(lamb, bpr_block_rows=1024, reg_block_rows=512),
           pos3, neg3, (rv3,), lamb)

    # Case 4: bf16 inputs (dtype-aware sublane rounding, in-kernel upcast).
    pos4 = jax.random.normal(ks[10], (24, 32), jnp.float32).astype(jnp.bfloat16)
    neg4 = jax.random.normal(ks[11], (24, 32), jnp.float32).astype(jnp.bfloat16)
    rv4 = jax.random.normal(ks[2], (100, 48), jnp.float32).astype(jnp.bfloat16)
    _check(BPRLoss(lamb), pos4, neg4, (rv4,), lamb)

    print("KERNEL_OK")
</pallas_src>

<mosaic_0001>
module attributes {stable_mosaic.version = 11 : i64} {
  func.func @_sumsq_kernel(%arg0: i32, %arg1: i32, %arg2: memref<16x32xf32, #tpu.memory_space<vmem>>, %arg3: memref<1x8x128xf32, #tpu.memory_space<vmem>>, %arg4: memref<8x32xf32, #tpu.memory_space<vmem>>) attributes {dimension_semantics = [#tpu.dimension_semantics<arbitrary>, #tpu.dimension_semantics<arbitrary>], iteration_bounds = array<i64: 1, 1>, scalar_prefetch = 0 : i64, scratch_operands = 1 : i64, tpu.core_type = #tpu.core_type<tc>, window_params = [{transform_indices = @transform_0, window_bounds = array<i64: 16, 32>}, {transform_indices = @transform_1, window_bounds = array<i64: 1, 8, 128>}]} {
    %c0_i32 = arith.constant 0 : i32
    %0 = arith.cmpi eq, %arg1, %c0_i32 : i32
    %1 = arith.extui %0 : i1 to i32
    %c0_i32_0 = arith.constant 0 : i32
    %2 = arith.cmpi ne, %1, %c0_i32_0 : i32
    scf.if %2 {
      %cst_8 = arith.constant 0.000000e+00 : f32
      %13 = vector.broadcast %cst_8 : f32 to vector<8x32xf32>
      %c0_9 = arith.constant 0 : index
      %c0_10 = arith.constant 0 : index
      %14 = vector.load %arg4[%c0_9, %c0_10] : memref<8x32xf32, #tpu.memory_space<vmem>>, vector<8x32xf32>
      tpu.vector_store %arg4[%c0_9, %c0_10], %13 {strides = array<i32>} : memref<8x32xf32, #tpu.memory_space<vmem>>, vector<8x32xf32>,
    } else {
    }
    %c0 = arith.constant 0 : index
    %c0_1 = arith.constant 0 : index
    %3 = vector.load %arg2[%c0, %c0_1] : memref<16x32xf32, #tpu.memory_space<vmem>>, vector<16x32xf32>
    %4 = arith.mulf %3, %3 : vector<16x32xf32>
    %c0_2 = arith.constant 0 : index
    %c0_3 = arith.constant 0 : index
    %5 = vector.load %arg4[%c0_2, %c0_3] : memref<8x32xf32, #tpu.memory_space<vmem>>, vector<8x32xf32>
    %6 = vector.shape_cast %4 : vector<16x32xf32> to vector<2x8x32xf32>
    %cst = arith.constant dense<0.000000e+00> : vector<8x32xf32>
    %7 = vector.multi_reduction <add>, %6, %cst [0] : vector<2x8x32xf32> to vector<8x32xf32>
    %8 = arith.addf %5, %7 : vector<8x32xf32>
    %c0_4 = arith.constant 0 : index
    %c0_5 = arith.constant 0 : index
    %9 = vector.load %arg4[%c0_4, %c0_5] : memref<8x32xf32, #tpu.memory_space<vmem>>, vector<8x32xf32>
    tpu.vector_store %arg4[%c0_4, %c0_5], %8 {strides = array<i32>} : memref<8x32xf32, #tpu.memory_space<vmem>>, vector<8x32xf32>,
    %c0_i32_6 = arith.constant 0 : i32
    %10 = arith.cmpi eq, %arg1, %c0_i32_6 : i32
    %11 = arith.extui %10 : i1 to i32
    %c0_i32_7 = arith.constant 0 : i32
    %12 = arith.cmpi ne, %11, %c0_i32_7 : i32
    scf.if %12 {
      %c0_8 = arith.constant 0 : index
      %c0_9 = arith.constant 0 : index
      %13 = vector.load %arg4[%c0_8, %c0_9] : memref<8x32xf32, #tpu.memory_space<vmem>>, vector<8x32xf32>
      %14 = vector.shape_cast %13 : vector<8x32xf32> to vector<1x8x32xf32>
      %cst_10 = arith.constant dense<0.000000e+00> : vector<1xf32>
      %15 = vector.multi_reduction <add>, %14, %cst_10 [1, 2] : vector<1x8x32xf32> to vector<1xf32>
      %16 = vector.shape_cast %15 : vector<1xf32> to vector<1x1x1xf32>
      %17 = vector.extract %16[0, 0, 0] : f32 from vector<1x1x1xf32>
      %18 = vector.broadcast %17 : f32 to vector<1x1x1xf32>
      %19 = vector.shape_cast %18 : vector<1x1x1xf32> to vector<1x1x1xf32>
      %20 = vector.broadcast %19 : vector<1x1x1xf32> to vector<1x8x128xf32>
      %c0_11 = arith.constant 0 : index
      %c0_12 = arith.constant 0 : index
      %c0_13 = arith.constant 0 : index
      %21 = vector.load %arg3[%c0_11, %c0_12, %c0_13] : memref<1x8x128xf32, #tpu.memory_space<vmem>>, vector<1x8x128xf32>
      tpu.vector_store %arg3[%c0_11, %c0_12, %c0_13], %20 {strides = array<i32>} : memref<1x8x128xf32, #tpu.memory_space<vmem>>, vector<1x8x128xf32>,
    } else {
    }
    return
  }
  func.func @transform_0(%arg0: i32, %arg1: i32) -> (i32, i32) {
    %c1_i32 = arith.constant 1 : i32
    %0 = arith.muli %arg0, %c1_i32 : i32
    %1 = arith.addi %0, %arg1 : i32
    %c0_i32 = arith.constant 0 : i32
    %c0_i32_0 = arith.constant 0 : i32
    return %1, %c0_i32 : i32, i32
  }
  func.func @transform_1(%arg0: i32, %arg1: i32) -> (i32, i32, i32) {
    %c0_i32 = arith.constant 0 : i32
    %c0_i32_0 = arith.constant 0 : i32
    %c0_i32_1 = arith.constant 0 : i32
    return %arg0, %c0_i32, %c0_i32_0 : i32, i32, i32
  }
}

module attributes {stable_mosaic.version = 11 : i64} {
  func.func @_bpr_kernel(%arg0: i32, %arg1: i32, %arg2: memref<1024x32xf32, #tpu.memory_space<vmem>>, %arg3: memref<1024x32xf32, #tpu.memory_space<vmem>>, %arg4: memref<1x8x128xf32, #tpu.memory_space<vmem>>, %arg5: memref<8x128xf32, #tpu.memory_space<vmem>>) attributes {dimension_semantics = [#tpu.dimension_semantics<arbitrary>, #tpu.dimension_semantics<arbitrary>], iteration_bounds = array<i64: 1, 1>, scalar_prefetch = 0 : i64, scratch_operands = 1 : i64, tpu.core_type = #tpu.core_type<tc>, window_params = [{transform_indices = @transform_0, window_bounds = array<i64: 1024, 32>}, {transform_indices = @transform_1, window_bounds = array<i64: 1024, 32>}, {transform_indices = @transform_2, window_bounds = array<i64: 1, 8, 128>}]} {
    %c0_i32 = arith.constant 0 : i32
    %0 = arith.cmpi eq, %arg1, %c0_i32 : i32
    %1 = arith.extui %0 : i1 to i32
    %c0_i32_0 = arith.constant 0 : i32
    %2 = arith.cmpi ne, %1, %c0_i32_0 : i32
    scf.if %2 {
      %cst_15 = arith.constant 0.000000e+00 : f32
      %41 = vector.broadcast %cst_15 : f32 to vector<8x128xf32>
      %c0_16 = arith.constant 0 : index
      %c0_17 = arith.constant 0 : index
      %42 = vector.load %arg5[%c0_16, %c0_17] : memref<8x128xf32, #tpu.memory_space<vmem>>, vector<8x128xf32>
      tpu.vector_store %arg5[%c0_16, %c0_17], %41 {strides = array<i32>} : memref<8x128xf32, #tpu.memory_space<vmem>>, vector<8x128xf32>,
    } else {
    }
    %c0 = arith.constant 0 : index
    %c0_1 = arith.constant 0 : index
    %3 = vector.load %arg2[%c0, %c0_1] : memref<1024x32xf32, #tpu.memory_space<vmem>>, vector<1024x32xf32>
    %c0_2 = arith.constant 0 : index
    %c0_3 = arith.constant 0 : index
    %4 = vector.load %arg3[%c0_2, %c0_3] : memref<1024x32xf32, #tpu.memory_space<vmem>>, vector<1024x32xf32>
    %5 = arith.subf %3, %4 : vector<1024x32xf32>
    %cst = arith.constant dense<0.000000e+00> : vector<1024xf32>
    %6 = vector.multi_reduction <add>, %5, %cst [1] : vector<1024x32xf32> to vector<1024xf32>
    %7 = vector.shape_cast %6 : vector<1024xf32> to vector<1x8x128xf32>
    %cst_4 = arith.constant 0.000000e+00 : f32
    %8 = vector.broadcast %cst_4 : f32 to vector<1x8x128xf32>
    %9 = arith.minimumf %7, %8 : vector<1x8x128xf32>
    %10 = math.absf %7 : vector<1x8x128xf32>
    %cst_5 = arith.constant 0.000000e+00 : f32
    %11 = vector.broadcast %cst_5 : f32 to vector<1x8x128xf32>
    %12 = arith.subf %11, %10 : vector<1x8x128xf32>
    %13 = math.exp %12 : vector<1x8x128xf32>
    %14 = math.log1p %13 : vector<1x8x128xf32>
    %15 = arith.subf %9, %14 : vector<1x8x128xf32>
    %c1_i32 = arith.constant 1 : i32
    %16 = arith.muli %arg0, %c1_i32 : i32
    %17 = arith.addi %16, %arg1 : i32
    %c1024_i32 = arith.constant 1024 : i32
    %18 = arith.muli %17, %c1024_i32 : i32
    %19 = tpu.iota {dimensions = array<i32: 0>} : vector<1x8x128xi32>
    %c1024_i32_6 = arith.constant 1024 : i32
    %20 = vector.broadcast %c1024_i32_6 : i32 to vector<1x8x128xi32>
    %21 = arith.muli %19, %20 : vector<1x8x128xi32>
    %22 = vector.broadcast %18 : i32 to vector<1x8x128xi32>
    %23 = arith.addi %22, %21 : vector<1x8x128xi32>
    %24 = tpu.iota {dimensions = array<i32: 1>} : vector<1x8x128xi32>
    %c128_i32 = arith.constant 128 : i32
    %25 = vector.broadcast %c128_i32 : i32 to vector<1x8x128xi32>
    %26 = arith.muli %24, %25 : vector<1x8x128xi32>
    %27 = arith.addi %23, %26 : vector<1x8x128xi32>
    %28 = tpu.iota {dimensions = array<i32: 2>} : vector<1x8x128xi32>
    %29 = arith.addi %27, %28 : vector<1x8x128xi32>
    %c8_i32 = arith.constant 8 : i32
    %30 = vector.broadcast %c8_i32 : i32 to vector<1x8x128xi32>
    %31 = arith.cmpi slt, %29, %30 : vector<1x8x128xi32>
    %cst_7 = arith.constant 0.000000e+00 : f32
    %32 = vector.broadcast %cst_7 : f32 to vector<1x8x128xf32>
    %33 = arith.select %31, %15, %32 : vector<1x8x128xi1>, vector<1x8x128xf32>
    %c0_8 = arith.constant 0 : index
    %c0_9 = arith.constant 0 : index
    %34 = vector.load %arg5[%c0_8, %c0_9] : memref<8x128xf32, #tpu.memory_space<vmem>>, vector<8x128xf32>
    %cst_10 = arith.constant dense<0.000000e+00> : vector<8x128xf32>
    %35 = vector.multi_reduction <add>, %33, %cst_10 [0] : vector<1x8x128xf32> to vector<8x128xf32>
    %36 = arith.addf %34, %35 : vector<8x128xf32>
    %c0_11 = arith.constant 0 : index
    %c0_12 = arith.constant 0 : index
    %37 = vector.load %arg5[%c0_11, %c0_12] : memref<8x128xf32, #tpu.memory_space<vmem>>, vector<8x128xf32>
    tpu.vector_store %arg5[%c0_11, %c0_12], %36 {strides = array<i32>} : memref<8x128xf32, #tpu.memory_space<vmem>>, vector<8x128xf32>,
    %c0_i32_13 = arith.constant 0 : i32
    %38 = arith.cmpi eq, %arg1, %c0_i32_13 : i32
    %39 = arith.extui %38 : i1 to i32
    %c0_i32_14 = arith.constant 0 : i32
    %40 = arith.cmpi ne, %39, %c0_i32_14 : i32
    scf.if %40 {
      %c0_15 = arith.constant 0 : index
      %c0_16 = arith.constant 0 : index
      %41 = vector.load %arg5[%c0_15, %c0_16] : memref<8x128xf32, #tpu.memory_space<vmem>>, vector<8x128xf32>
      %42 = vector.shape_cast %41 : vector<8x128xf32> to vector<1x8x128xf32>
      %cst_17 = arith.constant dense<0.000000e+00> : vector<1xf32>
      %43 = vector.multi_reduction <add>, %42, %cst_17 [1, 2] : vector<1x8x128xf32> to vector<1xf32>
      %44 = vector.shape_cast %43 : vector<1xf32> to vector<1x1x1xf32>
      %45 = vector.extract %44[0, 0, 0] : f32 from vector<1x1x1xf32>
      %46 = vector.broadcast %45 : f32 to vector<1x1x1xf32>
      %47 = vector.shape_cast %46 : vector<1x1x1xf32> to vector<1x1x1xf32>
      %48 = vector.broadcast %47 : vector<1x1x1xf32> to vector<1x8x128xf32>
      %c0_18 = arith.constant 0 : index
      %c0_19 = arith.constant 0 : index
      %c0_20 = arith.constant 0 : index
      %49 = vector.load %arg4[%c0_18, %c0_19, %c0_20] : memref<1x8x128xf32, #tpu.memory_space<vmem>>, vector<1x8x128xf32>
      tpu.vector_store %arg4[%c0_18, %c0_19, %c0_20], %48 {strides = array<i32>} : memref<1x8x128xf32, #tpu.memory_space<vmem>>, vector<1x8x128xf32>,
    } else {
    }
    return
  }
  func.func @transform_0(%arg0: i32, %arg1: i32) -> (i32, i32) {
    %c1_i32 = arith.constant 1 : i32
    %0 = arith.muli %arg0, %c1_i32 : i32
    %1 = arith.addi %0, %arg1 : i32
    %c0_i32 = arith.constant 0 : i32
    %c0_i32_0 = arith.constant 0 : i32
    return %1, %c0_i32 : i32, i32
  }
  func.func @transform_1(%arg0: i32, %arg1: i32) -> (i32, i32) {
    %c1_i32 = arith.constant 1 : i32
    %0 = arith.muli %arg0, %c1_i32 : i32
    %1 = arith.addi %0, %arg1 : i32
    %c0_i32 = arith.constant 0 : i32
    %c0_i32_0 = arith.constant 0 : i32
    return %1, %c0_i32 : i32, i32
  }
  func.func @transform_2(%arg0: i32, %arg1: i32) -> (i32, i32, i32) {
    %c0_i32 = arith.constant 0 : i32
    %c0_i32_0 = arith.constant 0 : i32
    %c0_i32_1 = arith.constant 0 : i32
    return %arg0, %c0_i32, %c0_i32_0 : i32, i32, i32
  }
}

module attributes {stable_mosaic.version = 11 : i64} {
  func.func @_sumsq_kernel(%arg0: i32, %arg1: i32, %arg2: memref<8x32xf32, #tpu.memory_space<vmem>>, %arg3: memref<1x8x128xf32, #tpu.memory_space<vmem>>, %arg4: memref<8x32xf32, #tpu.memory_space<vmem>>) attributes {dimension_semantics = [#tpu.dimension_semantics<arbitrary>, #tpu.dimension_semantics<arbitrary>], iteration_bounds = array<i64: 1, 1>, scalar_prefetch = 0 : i64, scratch_operands = 1 : i64, tpu.core_type = #tpu.core_type<tc>, window_params = [{transform_indices = @transform_0, window_bounds = array<i64: 8, 32>}, {transform_indices = @transform_1, window_bounds = array<i64: 1, 8, 128>}]} {
    %c0_i32 = arith.constant 0 : i32
    %0 = arith.cmpi eq, %arg1, %c0_i32 : i32
    %1 = arith.extui %0 : i1 to i32
    %c0_i32_0 = arith.constant 0 : i32
    %2 = arith.cmpi ne, %1, %c0_i32_0 : i32
    scf.if %2 {
      %cst_8 = arith.constant 0.000000e+00 : f32
      %13 = vector.broadcast %cst_8 : f32 to vector<8x32xf32>
      %c0_9 = arith.constant 0 : index
      %c0_10 = arith.constant 0 : index
      %14 = vector.load %arg4[%c0_9, %c0_10] : memref<8x32xf32, #tpu.memory_space<vmem>>, vector<8x32xf32>
      tpu.vector_store %arg4[%c0_9, %c0_10], %13 {strides = array<i32>} : memref<8x32xf32, #tpu.memory_space<vmem>>, vector<8x32xf32>,
    } else {
    }
    %c0 = arith.constant 0 : index
    %c0_1 = arith.constant 0 : index
    %3 = vector.load %arg2[%c0, %c0_1] : memref<8x32xf32, #tpu.memory_space<vmem>>, vector<8x32xf32>
    %4 = arith.mulf %3, %3 : vector<8x32xf32>
    %c0_2 = arith.constant 0 : index
    %c0_3 = arith.constant 0 : index
    %5 = vector.load %arg4[%c0_2, %c0_3] : memref<8x32xf32, #tpu.memory_space<vmem>>, vector<8x32xf32>
    %6 = vector.shape_cast %4 : vector<8x32xf32> to vector<1x8x32xf32>
    %cst = arith.constant dense<0.000000e+00> : vector<8x32xf32>
    %7 = vector.multi_reduction <add>, %6, %cst [0] : vector<1x8x32xf32> to vector<8x32xf32>
    %8 = arith.addf %5, %7 : vector<8x32xf32>
    %c0_4 = arith.constant 0 : index
    %c0_5 = arith.constant 0 : index
    %9 = vector.load %arg4[%c0_4, %c0_5] : memref<8x32xf32, #tpu.memory_space<vmem>>, vector<8x32xf32>
    tpu.vector_store %arg4[%c0_4, %c0_5], %8 {strides = array<i32>} : memref<8x32xf32, #tpu.memory_space<vmem>>, vector<8x32xf32>,
    %c0_i32_6 = arith.constant 0 : i32
    %10 = arith.cmpi eq, %arg1, %c0_i32_6 : i32
    %11 = arith.extui %10 : i1 to i32
    %c0_i32_7 = arith.constant 0 : i32
    %12 = arith.cmpi ne, %11, %c0_i32_7 : i32
    scf.if %12 {
      %c0_8 = arith.constant 0 : index
      %c0_9 = arith.constant 0 : index
      %13 = vector.load %arg4[%c0_8, %c0_9] : memref<8x32xf32, #tpu.memory_space<vmem>>, vector<8x32xf32>
      %14 = vector.shape_cast %13 : vector<8x32xf32> to vector<1x8x32xf32>
      %cst_10 = arith.constant dense<0.000000e+00> : vector<1xf32>
      %15 = vector.multi_reduction <add>, %14, %cst_10 [1, 2] : vector<1x8x32xf32> to vector<1xf32>
      %16 = vector.shape_cast %15 : vector<1xf32> to vector<1x1x1xf32>
      %17 = vector.extract %16[0, 0, 0] : f32 from vector<1x1x1xf32>
      %18 = vector.broadcast %17 : f32 to vector<1x1x1xf32>
      %19 = vector.shape_cast %18 : vector<1x1x1xf32> to vector<1x1x1xf32>
      %20 = vector.broadcast %19 : vector<1x1x1xf32> to vector<1x8x128xf32>
      %c0_11 = arith.constant 0 : index
      %c0_12 = arith.constant 0 : index
      %c0_13 = arith.constant 0 : index
      %21 = vector.load %arg3[%c0_11, %c0_12, %c0_13] : memref<1x8x128xf32, #tpu.memory_space<vmem>>, vector<1x8x128xf32>
      tpu.vector_store %arg3[%c0_11, %c0_12, %c0_13], %20 {strides = array<i32>} : memref<1x8x128xf32, #tpu.memory_space<vmem>>, vector<1x8x128xf32>,
    } else {
    }
    return
  }
  func.func @transform_0(%arg0: i32, %arg1: i32) -> (i32, i32) {
    %c1_i32 = arith.constant 1 : i32
    %0 = arith.muli %arg0, %c1_i32 : i32
    %1 = arith.addi %0, %arg1 : i32
    %c0_i32 = arith.constant 0 : i32
    %c0_i32_0 = arith.constant 0 : i32
    return %1, %c0_i32 : i32, i32
  }
  func.func @transform_1(%arg0: i32, %arg1: i32) -> (i32, i32, i32) {
    %c0_i32 = arith.constant 0 : i32
    %c0_i32_0 = arith.constant 0 : i32
    %c0_i32_1 = arith.constant 0 : i32
    return %arg0, %c0_i32, %c0_i32_0 : i32, i32, i32
  }
}

</mosaic_0001>

<bundles_post_ra>
// kernel: _bpr_loss_impl.4
= control target key start
LH: loop header
LB: loop body
LE: loop exit
PB: predicated region body
PF: predicated region fallthrough
CT: control target
= control target key end

     0   :  { %6 = vsyncpa [#allocation4], 0  ;;  %s100_s9 = smov [#allocation3]   ;;  %s101_s11 = smov 128   ;;  %s120_s0 = inlined_call_operand.hbm [shape: f32[16,32], index: 0, kind: input, shape index: {}]   ;;  %s121_s1 = inlined_call_operand.vmem [shape: f32[1,8,128], index: 1, kind: output, shape index: {}]  }
   0x1   :  { %s15_s8 = sshll.u32 %s120_s0, 4  ;;  %s17_s10 = sshll.u32 %s100_s9, 4  ;;  %s16_s8 = int_to_ptr.hbm [resolvable:$true] %s15_s8  ;;  %s18_s10 = int_to_ptr.vmem [resolvable:$true] %s17_s10 }
   0x2   :  { %s102_s12 = smov 8  }
   0x3   :  { %23 = dma.hbm_to_vmem [thread:$0]  %s16_s8, 256, %s18_s10, [#allocation4], %s101_s11, %s101_s11, %s102_s12  }
   0x4   :  { %98 = dma.done.wait [#allocation4], 256  }
   0x5   :  { %99 = vsyncadd [#allocation4], 4294967040  ;;  %vm34_vm0 = vcmask 261120   ;;  %v103_v0 = vmov 0.0   ;;  %v36_v1 = vld [vmem:[#allocation3] sm:$0xff]  ;;  %v37_v2 = vld [vmem:[#allocation3 + $0x8] sm:$0xff] }
   0x6   :  { %35 = vst.msk [vmem:[#allocation2] sm:$0xff] %vm34_vm0, %v103_v0  ;;  %v38_v3 = vmul.f32 %v36_v1, %v36_v1  ;;  %v39_v4 = vmul.f32 %v37_v2, %v37_v2 }
   0x8   :  { %v42_v6 = vsel %vm34_vm0, %v38_v3, 0.0  ;;  %v43_v7 = vsel %vm34_vm0, %v39_v4, 0.0 }
   0x9   :  { %v44_v8 = vadd.f32 %v43_v7, %v42_v6 }
   0xd   :  { %v40_v5 = vld [vmem:[#allocation2] sm:$0xff] }
   0xe   :  { %v45_v9 = vadd.f32 %v44_v8, %v40_v5 }
  0x10   :  { %46 = vst.msk [vmem:[#allocation2] sm:$0xff] %vm34_vm0, %v45_v9 }
  0x17   :  { %v50_v10 = vld [vmem:[#allocation2] sm:$0xff] }
  0x18   :  { %v51_v11 = vsel %vm34_vm0, %v50_v10, 0.0 }
  0x19   :  { %52 = vadd.xlane.f32.xlu0 %v51_v11 }
  0x8c   :  { %v53_v12 = vpop.xlane.xlu0 %52 }
  0x8d   :  { %v54_v13 = vrot.slane %v53_v12, 4 }
  0x8f   :  { %v55_v14 = vadd.f32 %v54_v13, %v53_v12 }
  0x91   :  { %v56_v15 = vrot.slane %v55_v14, 2 }
  0x93   :  { %v57_v16 = vadd.f32 %v56_v15, %v55_v14 }
  0x95   :  { %v58_v17 = vrot.slane %v57_v16, 1 }
  0x97   :  { %v59_v18 = vadd.f32 %v58_v17, %v57_v16 }
  0x99   :  { %68 = vpush %v59_v18 }
  0xca   :  { %s69_s0 = spop %68 }
  0xcb   :  { %v61_v19 = vstv %s69_s0 }
  0xcc   :  { %62 = vst [vmem:[%s121_s1] sm:$0xff] %v61_v19 }
  0xcd   :  { %67 = vsyncpa [#allocation4], 1 }

// kernel: _bpr_loss_impl.5
= control target key start
LH: loop header
LB: loop body
LE: loop exit
PB: predicated region body
PF: predicated region fallthrough
CT: control target
= control target key end

     0   :  { %6 = vsyncpa [#allocation4], 0  ;;  %s90_s9 = smov [#allocation3]   ;;  %s108_s0 = inlined_call_operand.hbm [shape: f32[8,32], index: 0, kind: input, shape index: {}]   ;;  %s109_s1 = inlined_call_operand.vmem [shape: f32[1,8,128], index: 1, kind: output, shape index: {}]  }
   0x1   :  { %s15_s8 = sshll.u32 %s108_s0, 4  ;;  %s17_s10 = sshll.u32 %s90_s9, 4  ;;  %s16_s8 = int_to_ptr.hbm [resolvable:$true] %s15_s8  ;;  %s18_s10 = int_to_ptr.vmem [resolvable:$true] %s17_s10 }
   0x2   :  { %20 = dma.hbm_to_vmem [thread:$0]  %s16_s8, 128, %s18_s10, [#allocation4]  }
   0x3   :  { %88 = dma.done.wait [#allocation4], 128  }
   0x4   :  { %89 = vsyncadd [#allocation4], 4294967168  ;;  %vm30_vm0 = vcmask 261120   ;;  %v91_v0 = vmov 0.0   ;;  %v32_v1 = vld [vmem:[#allocation3] sm:$0xff] }
   0x5   :  { %31 = vst.msk [vmem:[#allocation2] sm:$0xff] %vm30_vm0, %v91_v0  ;;  %v33_v2 = vmul.f32 %v32_v1, %v32_v1 }
   0xc   :  { %v34_v3 = vld [vmem:[#allocation2] sm:$0xff] }
   0xd   :  { %v36_v4 = vadd.f32 %v34_v3, %v33_v2 }
   0xf   :  { %38 = vst.msk [vmem:[#allocation2] sm:$0xff] %vm30_vm0, %v36_v4 }
  0x16   :  { %v42_v5 = vld [vmem:[#allocation2] sm:$0xff] }
  0x17   :  { %v43_v6 = vsel %vm30_vm0, %v42_v5, 0.0 }
  0x18   :  { %44 = vadd.xlane.f32.xlu0 %v43_v6 }
  0x8b   :  { %v45_v7 = vpop.xlane.xlu0 %44 }
  0x8c   :  { %v46_v8 = vrot.slane %v45_v7, 4 }
  0x8e   :  { %v47_v9 = vadd.f32 %v46_v8, %v45_v7 }
  0x90   :  { %v48_v10 = vrot.slane %v47_v9, 2 }
  0x92   :  { %v49_v11 = vadd.f32 %v48_v10, %v47_v9 }
  0x94   :  { %v50_v12 = vrot.slane %v49_v11, 1 }
  0x96   :  { %v51_v13 = vadd.f32 %v50_v12, %v49_v11 }
  0x98   :  { %60 = vpush %v51_v13 }
  0xc9   :  { %s61_s0 = spop %60 }
  0xca   :  { %v53_v14 = vstv %s61_s0 }
  0xcb   :  { %54 = vst [vmem:[%s109_s1] sm:$0xff] %v53_v14 }
  0xcc   :  { %59 = vsyncpa [#allocation4], 1 }

// kernel: _bpr_loss_impl.3
= control target key start
LH: loop header
LB: loop body
LE: loop exit
PB: predicated region body
PF: predicated region fallthrough
CT: control target
= control target key end

     0   :  { %7 = vsyncpa [#allocation4], 0  ;;  %s6197_s0 = inlined_call_operand.vmem [shape: f32[8,32], index: 0, kind: input, shape index: {}]   ;;  %s6198_s1 = inlined_call_operand.hbm [shape: f32[8,32], index: 1, kind: input, shape index: {}]   ;;  %s6199_s2 = inlined_call_operand.vmem [shape: f32[1,8,128], index: 2, kind: output, shape index: {}]  }
   0x1   :  { %30 = vsyncadd [#allocation4], 16256  ;;  %s35_s11 = sshll.u32 %s6198_s1, 4  ;;  %s3772_s12 = smov [#allocation3]   ;;  %s36_s11 = int_to_ptr.hbm [resolvable:$true] %s35_s11 }
   0x2   :  { %s37_s13 = sshll.u32 %s3772_s12, 4  ;;  %s3773_s14 = smov 128   ;;  %s38_s13 = int_to_ptr.vmem [resolvable:$true] %s37_s13 }
   0x3   :  { %s3774_s15 = smov 8  }
   0x4   :  { %43 = dma.hbm_to_vmem [thread:$0]  %s36_s11, 128, %s38_s13, [#allocation4], %s3773_s14, %s3773_s14, %s3774_s15  }
   0x5   :  { %3770 = dma.done.wait [#allocation4], 16384  }
   0x6   :  { %3771 = vsyncadd [#allocation4], 4294950912  ;;  %v81_v0 = vld [vmem:[%s6197_s0 + $0x20] sm:$0xff]  ;;  %vm461_vm0 = vcmask 261120   ;;  %v79_v2 = vld [vmem:[%s6197_s0 + $0x10] sm:$0xff]  ;;  %vm6202_vm5 = vcmask 130112  }
   0x7   :  { %v209_v1 = vld [vmem:[#allocation3 + $0x20] sm:$0xff]  ;;  %v207_v4 = vld [vmem:[#allocation3 + $0x10] sm:$0xff]  ;;  %v82_v9 = vld [vmem:[%s6197_s0 + $0x28] sm:$0xff]  ;;  %vm2912_vm6 = vcmask 195712   ;;  %vm2916_vm7 = vcmask 261312   ;;  %vm2920_vm10 = vcmask 326912  }
   0x8   :  { %v337_v3 = vsub.f32 %v81_v0, %v209_v1  ;;  %v77_v5 = vld [vmem:[%s6197_s0] sm:$0xff]  ;;  %v335_v7 = vsub.f32 %v79_v2, %v207_v4  ;;  %v210_v10 = vld [vmem:[#allocation3 + $0x28] sm:$0xff]  ;;  %v80_v11 = vld [vmem:[%s6197_s0 + $0x18] sm:$0xff]  ;;  %vm2924_vm11 = vcmask 392512   ;;  %vm2928_vm14 = vcmask 458112  }
   0x9   :  { %v205_v6 = vld [vmem:[#allocation3] sm:$0xff]  ;;  %v208_v13 = vld [vmem:[#allocation3 + $0x18] sm:$0xff]  ;;  %v78_v14 = vld [vmem:[%s6197_s0 + $0x8] sm:$0xff]  ;;  %v338_v18 = vsub.f32 %v82_v9, %v210_v10  ;;  %vm2932_vm15 = vcmask 523712  }
   0xa   :  { %v333_v8 = vsub.f32 %v77_v5, %v205_v6  ;;  %v474_v12 = vsel %vm461_vm0, %v337_v3, 0.0  ;;  %v206_v15 = vld [vmem:[#allocation3 + $0x8] sm:$0xff]  ;;  %v468_v16 = vsel %vm461_vm0, %v335_v7, 0.0  ;;  %v336_v19 = vsub.f32 %v80_v11, %v208_v13  ;;  %v85_v24 = vld [vmem:[%s6197_s0 + $0x40] sm:$0xff]  ;;  %v84_v26 = vld [vmem:[%s6197_s0 + $0x38] sm:$0xff] }
   0xb   :  { %475 = vadd.xlane.f32.xlu2 %v474_v12  ;;  %469 = vadd.xlane.f32.xlu1 %v468_v16  ;;  %v334_v20 = vsub.f32 %v78_v14, %v206_v15  ;;  %v477_v21 = vsel %vm461_vm0, %v338_v18, 0.0  ;;  %v213_v25 = vld [vmem:[#allocation3 + $0x40] sm:$0xff]  ;;  %v212_v27 = vld [vmem:[#allocation3 + $0x38] sm:$0xff]  ;;  %v83_v28 = vld [vmem:[%s6197_s0 + $0x30] sm:$0xff] }
   0xc   :  { %v462_v17 = vsel %vm461_vm0, %v333_v8, 0.0  ;;  %v471_v22 = vsel %vm461_vm0, %v336_v19, 0.0  ;;  %v211_v29 = vld [vmem:[#allocation3 + $0x30] sm:$0xff]  ;;  %v341_v30 = vsub.f32 %v85_v24, %v213_v25  ;;  %v340_v31 = vsub.f32 %v84_v26, %v212_v27  ;;  %v88_v36 = vld [vmem:[%s6197_s0 + $0x58] sm:$0xff]  ;;  %v86_v40 = vld [vmem:[%s6197_s0 + $0x48] sm:$0xff] }
   0xd   :  { %463 = vadd.xlane.f32.xlu0 %v462_v17  ;;  %v465_v23 = vsel %vm461_vm0, %v334_v20, 0.0  ;;  %v339_v32 = vsub.f32 %v83_v28, %v211_v29  ;;  %v216_v37 = vld [vmem:[#allocation3 + $0x58] sm:$0xff]  ;;  %v87_v38 = vld [vmem:[%s6197_s0 + $0x50] sm:$0xff]  ;;  %v214_v41 = vld [vmem:[#allocation3 + $0x48] sm:$0xff] }
   0xe   :  { %v486_v33 = vsel %vm461_vm0, %v341_v30, 0.0  ;;  %v483_v34 = vsel %vm461_vm0, %v340_v31, 0.0  ;;  %v215_v39 = vld [vmem:[#allocation3 + $0x50] sm:$0xff]  ;;  %v344_v42 = vsub.f32 %v88_v36, %v216_v37  ;;  %v342_v44 = vsub.f32 %v86_v40, %v214_v41  ;;  %v90_v50 = vld [vmem:[%s6197_s0 + $0x68] sm:$0xff]  ;;  %v89_v52 = vld [vmem:[%s6197_s0 + $0x60] sm:$0xff] }
   0xf   :  { %v480_v35 = vsel %vm461_vm0, %v339_v32, 0.0  ;;  %v343_v43 = vsub.f32 %v87_v38, %v215_v39  ;;  %v91_v48 = vld [vmem:[%s6197_s0 + $0x70] sm:$0xff]  ;;  %v218_v51 = vld [vmem:[#allocation3 + $0x68] sm:$0xff]  ;;  %v217_v53 = vld [vmem:[#allocation3 + $0x60] sm:$0xff] }
  0x10   :  { %v495_v45 = vsel %vm461_vm0, %v344_v42, 0.0  ;;  %v489_v47 = vsel %vm461_vm0, %v342_v44, 0.0  ;;  %v219_v49 = vld [vmem:[#allocation3 + $0x70] sm:$0xff]  ;;  %v346_v55 = vsub.f32 %v90_v50, %v218_v51  ;;  %v345_v56 = vsub.f32 %v89_v52, %v217_v53  ;;  %v94_v60 = vld [vmem:[%s6197_s0 + $0x88] sm:$0xff]  ;;  %v93_v62 = vld [vmem:[%s6197_s0 + $0x80] sm:$0xff] }
  0x11   :  { %v492_v46 = vsel %vm461_vm0, %v343_v43, 0.0  ;;  %v347_v54 = vsub.f32 %v91_v48, %v219_v49  ;;  %v222_v61 = vld [vmem:[#allocation3 + $0x88] sm:$0xff]  ;;  %v221_v63 = vld [vmem:[#allocation3 + $0x80] sm:$0xff]  ;;  %v92_v0 = vld [vmem:[%s6197_s0 + $0x78] sm:$0xff] }
  0x12   :  { %v501_v58 = vsel %vm461_vm0, %v346_v55, 0.0  ;;  %v498_v59 = vsel %vm461_vm0, %v345_v56, 0.0  ;;  %v220_v1 = vld [vmem:[#allocation3 + $0x78] sm:$0xff]  ;;  %v350_v2 = vsub.f32 %v94_v60, %v222_v61  ;;  %v349_v3 = vsub.f32 %v93_v62, %v221_v63  ;;  %v97_v8 = vld [vmem:[%s6197_s0 + $0xa0] sm:$0xff]  ;;  %v95_v12 = vld [vmem:[%s6197_s0 + $0x90] sm:$0xff] }
  0x13   :  { %478 = vadd.xlane.f32.xlu2 %v477_v21  ;;  %472 = vadd.xlane.f32.xlu1 %v471_v22  ;;  %v504_v57 = vsel %vm461_vm0, %v347_v54, 0.0  ;;  %v348_v4 = vsub.f32 %v92_v0, %v220_v1  ;;  %v225_v9 = vld [vmem:[#allocation3 + $0xa0] sm:$0xff]  ;;  %v96_v10 = vld [vmem:[%s6197_s0 + $0x98] sm:$0xff]  ;;  %v223_v13 = vld [vmem:[#allocation3 + $0x90] sm:$0xff] }
  0x14   :  { %v513_v5 = vsel %vm461_vm0, %v350_v2, 0.0  ;;  %v510_v6 = vsel %vm461_vm0, %v349_v3, 0.0  ;;  %v224_v11 = vld [vmem:[#allocation3 + $0x98] sm:$0xff]  ;;  %v353_v14 = vsub.f32 %v97_v8, %v225_v9  ;;  %v351_v16 = vsub.f32 %v95_v12, %v223_v13  ;;  %v99_v22 = vld [vmem:[%s6197_s0 + $0xb0] sm:$0xff]  ;;  %v98_v24 = vld [vmem:[%s6197_s0 + $0xa8] sm:$0xff] }
  0x15   :  { %466 = vadd.xlane.f32.xlu0 %v465_v23  ;;  %v507_v7 = vsel %vm461_vm0, %v348_v4, 0.0  ;;  %v352_v15 = vsub.f32 %v96_v10, %v224_v11  ;;  %v100_v20 = vld [vmem:[%s6197_s0 + $0xb8] sm:$0xff]  ;;  %v227_v23 = vld [vmem:[#allocation3 + $0xb0] sm:$0xff]  ;;  %v226_v25 = vld [vmem:[#allocation3 + $0xa8] sm:$0xff] }
  0x16   :  { %v522_v17 = vsel %vm461_vm0, %v353_v14, 0.0  ;;  %v516_v19 = vsel %vm461_vm0, %v351_v16, 0.0  ;;  %v228_v21 = vld [vmem:[#allocation3 + $0xb8] sm:$0xff]  ;;  %v355_v27 = vsub.f32 %v99_v22, %v227_v23  ;;  %v354_v28 = vsub.f32 %v98_v24, %v226_v25  ;;  %v103_v32 = vld [vmem:[%s6197_s0 + $0xd0] sm:$0xff]  ;;  %v101_v36 = vld [vmem:[%s6197_s0 + $0xc0] sm:$0xff] }
  0x17   :  { %v519_v18 = vsel %vm461_vm0, %v352_v15, 0.0  ;;  %v356_v26 = vsub.f32 %v100_v20, %v228_v21  ;;  %v229_v37 = vld [vmem:[#allocation3 + $0xc0] sm:$0xff]  ;;  %v106_v44 = vld [vmem:[%s6197_s0 + $0xe8] sm:$0xff]  ;;  %v104_v48 = vld [vmem:[%s6197_s0 + $0xd8] sm:$0xff] }
  0x18   :  { %v528_v30 = vsel %vm461_vm0, %v355_v27, 0.0  ;;  %v525_v31 = vsel %vm461_vm0, %v354_v28, 0.0  ;;  %v357_v40 = vsub.f32 %v101_v36, %v229_v37  ;;  %v232_v49 = vld [vmem:[#allocation3 + $0xd8] sm:$0xff]  ;;  %v109_v56 = vld [vmem:[%s6197_s0 + $0x100] sm:$0xff]  ;;  %v107_v60 = vld [vmem:[%s6197_s0 + $0xf0] sm:$0xff] }
  0x19   :  { %v531_v29 = vsel %vm461_vm0, %v356_v26, 0.0  ;;  %v360_v52 = vsub.f32 %v104_v48, %v232_v49  ;;  %v235_v61 = vld [vmem:[#allocation3 + $0xf0] sm:$0xff]  ;;  %v112_v4 = vld [vmem:[%s6197_s0 + $0x118] sm:$0xff]  ;;  %v110_v8 = vld [vmem:[%s6197_s0 + $0x108] sm:$0xff] }
  0x1a   :  { %v534_v43 = vsel %vm461_vm0, %v357_v40, 0.0  ;;  %v363_v0 = vsub.f32 %v107_v60, %v235_v61  ;;  %v238_v9 = vld [vmem:[#allocation3 + $0x108] sm:$0xff]  ;;  %v115_v16 = vld [vmem:[%s6197_s0 + $0x130] sm:$0xff]  ;;  %v113_v20 = vld [vmem:[%s6197_s0 + $0x120] sm:$0xff] }
  0x1b   :  { %487 = vadd.xlane.f32.xlu2 %v486_v33  ;;  %484 = vadd.xlane.f32.xlu1 %v483_v34  ;;  %v231_v33 = vld [vmem:[#allocation3 + $0xd0] sm:$0xff]  ;;  %v102_v34 = vld [vmem:[%s6197_s0 + $0xc8] sm:$0xff]  ;;  %v543_v55 = vsel %vm461_vm0, %v360_v52, 0.0  ;;  %v366_v12 = vsub.f32 %v110_v8, %v238_v9  ;;  %v241_v21 = vld [vmem:[#allocation3 + $0x120] sm:$0xff] }
  0x1c   :  { %v359_v38 = vsub.f32 %v103_v32, %v231_v33  ;;  %v552_v3 = vsel %vm461_vm0, %v363_v0, 0.0  ;;  %v369_v24 = vsub.f32 %v113_v20, %v241_v21  ;;  %v118_v28 = vld [vmem:[%s6197_s0 + $0x148] sm:$0xff]  ;;  %v116_v32 = vld [vmem:[%s6197_s0 + $0x138] sm:$0xff]  ;;  %v121_v40 = vld [vmem:[%s6197_s0 + $0x160] sm:$0xff] }
  0x1d   :  { %481 = vadd.xlane.f32.xlu0 %v480_v35  ;;  %v230_v35 = vld [vmem:[#allocation3 + $0xc8] sm:$0xff]  ;;  %v561_v15 = vsel %vm461_vm0, %v366_v12, 0.0  ;;  %v244_v33 = vld [vmem:[#allocation3 + $0x138] sm:$0xff] }
  0x1e   :  { %v358_v39 = vsub.f32 %v102_v34, %v230_v35  ;;  %v540_v41 = vsel %vm461_vm0, %v359_v38, 0.0  ;;  %v570_v27 = vsel %vm461_vm0, %v369_v24, 0.0  ;;  %v372_v36 = vsub.f32 %v116_v32, %v244_v33  ;;  %v126_v9 = vld [vmem:[%s6197_s0 + $0x188] sm:$0xff]  ;;  %v129_v32 = vld [vmem:[%s6197_s0 + $0x1a0] sm:$0xff] }
  0x1f   :  { %v254_v12 = vld [vmem:[#allocation3 + $0x188] sm:$0xff] }
  0x20   :  { %v537_v42 = vsel %vm461_vm0, %v358_v39, 0.0  ;;  %v579_v39 = vsel %vm461_vm0, %v372_v36, 0.0  ;;  %v382_v20 = vsub.f32 %v126_v9, %v254_v12  ;;  %v257_v36 = vld [vmem:[#allocation3 + $0x1a0] sm:$0xff] }
  0x23   :  { %496 = vadd.xlane.f32.xlu2 %v495_v45  ;;  %493 = vadd.xlane.f32.xlu1 %v492_v46  ;;  %v234_v45 = vld [vmem:[#allocation3 + $0xe8] sm:$0xff]  ;;  %v105_v46 = vld [vmem:[%s6197_s0 + $0xe0] sm:$0xff] }
  0x24   :  { %v362_v50 = vsub.f32 %v106_v44, %v234_v45  ;;  %v119_v44 = vld [vmem:[%s6197_s0 + $0x150] sm:$0xff] }
  0x25   :  { %490 = vadd.xlane.f32.xlu0 %v489_v47  ;;  %v233_v47 = vld [vmem:[#allocation3 + $0xe0] sm:$0xff]  ;;  %v247_v45 = vld [vmem:[#allocation3 + $0x150] sm:$0xff] }
  0x26   :  { %v361_v51 = vsub.f32 %v105_v46, %v233_v47  ;;  %v549_v53 = vsel %vm461_vm0, %v362_v50, 0.0  ;;  %v375_v48 = vsub.f32 %v119_v44, %v247_v45  ;;  %v124_v50 = vld [vmem:[%s6197_s0 + $0x178] sm:$0xff] }
  0x28   :  { %v546_v54 = vsel %vm461_vm0, %v361_v51, 0.0  ;;  %v252_v51 = vld [vmem:[#allocation3 + $0x178] sm:$0xff] }
  0x2b   :  { %505 = vadd.xlane.f32.xlu2 %v504_v57  ;;  %502 = vadd.xlane.f32.xlu1 %v501_v58  ;;  %v237_v57 = vld [vmem:[#allocation3 + $0x100] sm:$0xff]  ;;  %v108_v58 = vld [vmem:[%s6197_s0 + $0xf8] sm:$0xff] }
  0x2c   :  { %v365_v62 = vsub.f32 %v109_v56, %v237_v57  ;;  %v122_v56 = vld [vmem:[%s6197_s0 + $0x168] sm:$0xff] }
  0x2d   :  { %499 = vadd.xlane.f32.xlu0 %v498_v59  ;;  %v236_v59 = vld [vmem:[#allocation3 + $0xf8] sm:$0xff]  ;;  %v250_v57 = vld [vmem:[#allocation3 + $0x168] sm:$0xff] }
  0x2e   :  { %v364_v63 = vsub.f32 %v108_v58, %v236_v59  ;;  %v558_v1 = vsel %vm461_vm0, %v365_v62, 0.0  ;;  %v380_v58 = vsub.f32 %v124_v50, %v252_v51  ;;  %v378_v60 = vsub.f32 %v122_v56, %v250_v57 }
  0x30   :  { %v555_v2 = vsel %vm461_vm0, %v364_v63, 0.0  ;;  %v597_v8 = vsel %vm461_vm0, %v378_v60, 0.0 }
  0x33   :  { %514 = vadd.xlane.f32.xlu2 %v513_v5  ;;  %511 = vadd.xlane.f32.xlu1 %v510_v6  ;;  %v240_v5 = vld [vmem:[#allocation3 + $0x118] sm:$0xff]  ;;  %v111_v6 = vld [vmem:[%s6197_s0 + $0x110] sm:$0xff] }
  0x34   :  { %v368_v10 = vsub.f32 %v112_v4, %v240_v5  ;;  %v127_v4 = vld [vmem:[%s6197_s0 + $0x190] sm:$0xff] }
  0x35   :  { %508 = vadd.xlane.f32.xlu0 %v507_v7  ;;  %v239_v7 = vld [vmem:[#allocation3 + $0x110] sm:$0xff] }
  0x36   :  { %v367_v11 = vsub.f32 %v111_v6, %v239_v7  ;;  %v567_v13 = vsel %vm461_vm0, %v368_v10, 0.0  ;;  %v255_v5 = vld [vmem:[#allocation3 + $0x190] sm:$0xff] }
  0x38   :  { %v564_v14 = vsel %vm461_vm0, %v367_v11, 0.0 }
  0x3b   :  { %523 = vadd.xlane.f32.xlu2 %v522_v17  ;;  %520 = vadd.xlane.f32.xlu1 %v519_v18  ;;  %v243_v17 = vld [vmem:[#allocation3 + $0x130] sm:$0xff]  ;;  %v114_v18 = vld [vmem:[%s6197_s0 + $0x128] sm:$0xff] }
  0x3c   :  { %v371_v22 = vsub.f32 %v115_v16, %v243_v17  ;;  %v383_v17 = vsub.f32 %v127_v4, %v255_v5 }
  0x3d   :  { %517 = vadd.xlane.f32.xlu0 %v516_v19  ;;  %v242_v19 = vld [vmem:[#allocation3 + $0x128] sm:$0xff] }
  0x3e   :  { %v370_v23 = vsub.f32 %v114_v18, %v242_v19  ;;  %v576_v25 = vsel %vm461_vm0, %v371_v22, 0.0 }
  0x40   :  { %v573_v26 = vsel %vm461_vm0, %v370_v23, 0.0 }
  0x43   :  { %532 = vadd.xlane.f32.xlu2 %v531_v29  ;;  %529 = vadd.xlane.f32.xlu1 %v528_v30  ;;  %v246_v29 = vld [vmem:[#allocation3 + $0x148] sm:$0xff]  ;;  %v117_v30 = vld [vmem:[%s6197_s0 + $0x140] sm:$0xff] }
  0x44   :  { %v374_v34 = vsub.f32 %v118_v28, %v246_v29  ;;  %v130_v28 = vld [vmem:[%s6197_s0 + $0x1a8] sm:$0xff] }
  0x45   :  { %526 = vadd.xlane.f32.xlu0 %v525_v31  ;;  %v245_v31 = vld [vmem:[#allocation3 + $0x140] sm:$0xff] }
  0x46   :  { %v373_v35 = vsub.f32 %v117_v30, %v245_v31  ;;  %v585_v37 = vsel %vm461_vm0, %v374_v34, 0.0  ;;  %v258_v31 = vld [vmem:[#allocation3 + $0x1a8] sm:$0xff]  ;;  %v609_v34 = vsel %vm461_vm0, %v382_v20, 0.0 }
  0x48   :  { %v582_v38 = vsel %vm461_vm0, %v373_v35, 0.0 }
  0x4b   :  { %541 = vadd.xlane.f32.xlu2 %v540_v41  ;;  %538 = vadd.xlane.f32.xlu1 %v537_v42  ;;  %v249_v41 = vld [vmem:[#allocation3 + $0x160] sm:$0xff]  ;;  %v120_v42 = vld [vmem:[%s6197_s0 + $0x158] sm:$0xff] }
  0x4c   :  { %v377_v46 = vsub.f32 %v121_v40, %v249_v41 }
  0x4d   :  { %535 = vadd.xlane.f32.xlu0 %v534_v43  ;;  %v248_v43 = vld [vmem:[#allocation3 + $0x158] sm:$0xff] }
  0x4e   :  { %v376_v47 = vsub.f32 %v120_v42, %v248_v43  ;;  %v594_v49 = vsel %vm461_vm0, %v377_v46, 0.0  ;;  %v386_v43 = vsub.f32 %v130_v28, %v258_v31 }
  0x50   :  { %v591_v52 = vsel %vm461_vm0, %v376_v47, 0.0  ;;  %v385_v47 = vsub.f32 %v129_v32, %v257_v36 }
  0x52   :  { %v618_v4 = vsel %vm461_vm0, %v385_v47, 0.0 }
  0x53   :  { %550 = vadd.xlane.f32.xlu2 %v549_v53  ;;  %547 = vadd.xlane.f32.xlu1 %v546_v54  ;;  %v588_v53 = vsel %vm461_vm0, %v375_v48, 0.0  ;;  %v123_v54 = vld [vmem:[%s6197_s0 + $0x170] sm:$0xff] }
  0x55   :  { %544 = vadd.xlane.f32.xlu0 %v543_v55  ;;  %v251_v55 = vld [vmem:[#allocation3 + $0x170] sm:$0xff] }
  0x56   :  { %v379_v59 = vsub.f32 %v123_v54, %v251_v55 }
  0x58   :  { %v600_v7 = vsel %vm461_vm0, %v379_v59, 0.0 }
  0x5b   :  { %559 = vadd.xlane.f32.xlu2 %v558_v1  ;;  %556 = vadd.xlane.f32.xlu1 %v555_v2  ;;  %v603_v1 = vsel %vm461_vm0, %v380_v58, 0.0 }
  0x5d   :  { %553 = vadd.xlane.f32.xlu0 %v552_v3 }
  0x63   :  { %568 = vadd.xlane.f32.xlu2 %v567_v13  ;;  %565 = vadd.xlane.f32.xlu1 %v564_v14  ;;  %v125_v13 = vld [vmem:[%s6197_s0 + $0x180] sm:$0xff] }
  0x64   :  { %v253_v14 = vld [vmem:[#allocation3 + $0x180] sm:$0xff] }
  0x65   :  { %562 = vadd.xlane.f32.xlu0 %v561_v15  ;;  %v2769_v15 = vlaneseq  ;;  %v381_v21 = vsub.f32 %v125_v13, %v253_v14 }
  0x67   :  { %v4006_v23 = vand.u32 127, %v2769_v15  ;;  %v606_v35 = vsel %vm461_vm0, %v381_v21, 0.0 }
  0x69   :  { %v4028_v41 = vadd.s32 4294967264, %v4006_v23  ;;  %v4040_v55 = vadd.s32 4294967256, %v4006_v23  ;;  %v4060_v12 = vadd.s32 4294967288, %v4006_v23 }
  0x6b   :  { %577 = vadd.xlane.f32.xlu2 %v576_v25  ;;  %574 = vadd.xlane.f32.xlu1 %v573_v26 }
  0x6d   :  { %571 = vadd.xlane.f32.xlu0 %v570_v27  ;;  %v612_v27 = vsel %vm461_vm0, %v383_v17, 0.0 }
  0x73   :  { %586 = vadd.xlane.f32.xlu2 %v585_v37  ;;  %583 = vadd.xlane.f32.xlu1 %v582_v38  ;;  %v128_v37 = vld [vmem:[%s6197_s0 + $0x198] sm:$0xff] }
  0x74   :  { %v256_v38 = vld [vmem:[#allocation3 + $0x198] sm:$0xff] }
  0x75   :  { %580 = vadd.xlane.f32.xlu0 %v579_v39  ;;  %v384_v48 = vsub.f32 %v128_v37, %v256_v38 }
  0x77   :  { %v615_v5 = vsel %vm461_vm0, %v384_v48, 0.0 }
  0x7b   :  { %595 = vadd.xlane.f32.xlu2 %v594_v49  ;;  %592 = vadd.xlane.f32.xlu1 %v591_v52 }
  0x7d   :  { %589 = vadd.xlane.f32.xlu0 %v588_v53  ;;  %v4036_v53 = vadd.s32 4294967280, %v4006_v23 }
  0x7e   :  { %v3982_v61 = vpop.xlane.xlu2 %475  ;;  %v3985_v63 = vpop.xlane.xlu1 %469 }
  0x7f   :  { %v978_v62 = vand.u32 2147483647, %v3982_v61  ;;  %v976_v2 = vand.u32 2147483647, %v3985_v63  ;;  %v850_v56 = vmin.f32 %v3982_v61, 0.0  ;;  %v848_v57 = vmin.f32 %v3985_v63, 0.0 }
  0x80   :  { %v3987_v0 = vpop.xlane.xlu0 %463 }
  0x81   :  { %v974_v3 = vand.u32 2147483647, %v3987_v0  ;;  %v1106_v6 = vsub.f32 0.0, %v978_v62  ;;  %v1104_v10 = vsub.f32 0.0, %v976_v2  ;;  %v846_v58 = vmin.f32 %v3987_v0, 0.0 }
  0x82   :  { %v621_v2 = vsel %vm461_vm0, %v386_v43, 0.0 }
  0x83   :  { %v1102_v11 = vsub.f32 0.0, %v974_v3  ;;  %v1238_v16 = vmul.f32 1.442695, %v1106_v6  ;;  %604 = vadd.xlane.f32.xlu2 %v603_v1  ;;  %v1234_v18 = vmul.f32 1.442695, %v1104_v10  ;;  %601 = vadd.xlane.f32.xlu1 %v600_v7  ;;  %v4054_v7 = vadd.s32 4294967272, %v4006_v23 }
  0x85   :  { %v1230_v19 = vmul.f32 1.442695, %v1102_v11  ;;  %598 = vadd.xlane.f32.xlu0 %v597_v8  ;;  %3234 = vpow2.f32 %v1238_v16 }
  0x86   :  { %3236 = vpow2.f32 %v1234_v18  ;;  %v4003_v22 = vpop.xlane.xlu2 %478  ;;  %v4009_v25 = vpop.xlane.xlu1 %472 }
  0x87   :  { %3238 = vpow2.f32 %v1230_v19  ;;  %v979_v24 = vand.u32 2147483647, %v4003_v22  ;;  %v977_v29 = vand.u32 2147483647, %v4009_v25  ;;  %v851_v17 = vmin.f32 %v4003_v22, 0.0 }
  0x88   :  { %v4011_v26 = vpop.xlane.xlu0 %466 }
  0x89   :  { %v975_v30 = vand.u32 2147483647, %v4011_v26  ;;  %v1107_v33 = vsub.f32 0.0, %v979_v24  ;;  %v1105_v39 = vsub.f32 0.0, %v977_v29  ;;  %v847_v31 = vmin.f32 %v4011_v26, 0.0 }
  0x8b   :  { %v3235_v40 = vpop.eup %3234  ;;  %v1240_v42 = vmul.f32 1.442695, %v1107_v33  ;;  %613 = vadd.xlane.f32.xlu2 %v612_v27  ;;  %v1103_v46 = vsub.f32 0.0, %v975_v30  ;;  %610 = vadd.xlane.f32.xlu1 %v609_v34  ;;  %v1236_v52 = vmul.f32 1.442695, %v1105_v39  ;;  %v849_v27 = vmin.f32 %v4009_v25, 0.0 }
  0x8c   :  { %v4030_v44 = vpop.eup %3236  ;;  %v1522_v45 = vadd.f32 1.0, %v3235_v40  ;;  %v1525_v50 = vmul.f32 -0.5, %v3235_v40  ;;  %v1528_v6 = vand.u32 2147483647, %v3235_v40 }
  0x8d   :  { %607 = vadd.xlane.f32.xlu0 %v606_v35  ;;  %v4032_v49 = vpop.eup %3238  ;;  %v1504_v51 = vadd.f32 1.0, %v4030_v44  ;;  %3240 = vpow2.f32 %v1240_v42  ;;  %v1507_v60 = vmul.f32 -0.5, %v4030_v44  ;;  %v1232_v62 = vmul.f32 1.442695, %v1103_v46 }
  0x8e   :  { %3242 = vlog2.f32 %v1522_v45  ;;  %v1486_v54 = vadd.f32 1.0, %v4032_v49  ;;  %v4045_v59 = vpop.xlane.xlu2 %487  ;;  %v4048_v1 = vpop.xlane.xlu1 %484  ;;  %v1526_v3 = vadd.f32 1.0, %v1525_v50  ;;  %v1510_v10 = vand.u32 2147483647, %v4030_v44 }
  0x8f   :  { %3244 = vlog2.f32 %v1504_v51  ;;  %v982_v8 = vand.u32 2147483647, %v4045_v59  ;;  %v1489_v11 = vmul.f32 -0.5, %v4032_v49  ;;  %v981_v13 = vand.u32 2147483647, %v4048_v1 }
  0x90   :  { %3246 = vlog2.f32 %v1486_v54  ;;  %v1508_v16 = vadd.f32 1.0, %v1507_v60  ;;  %v1527_v24 = vmul.f32 %v3235_v40, %v1526_v3  ;;  %vm4065_vm1 = vcmp.lt.f32.partialorder %v1528_v6, 0.0004427343 }
  0x91   :  { %3248 = vpow2.f32 %v1236_v52  ;;  %v1110_v28 = vsub.f32 0.0, %v982_v8  ;;  %v1109_v32 = vsub.f32 0.0, %v981_v13  ;;  %vm4070_vm2 = vcmp.lt.f32.partialorder %v1510_v10, 0.0004427343 }
  0x92   :  { %3250 = vpow2.f32 %v1232_v62  ;;  %v1490_v35 = vadd.f32 1.0, %v1489_v11  ;;  %v1492_v36 = vand.u32 2147483647, %v4032_v49  ;;  %v1509_v40 = vmul.f32 %v4030_v44, %v1508_v16 }
  0x93   :  { %v3241_v9 = vpop.eup %3240  ;;  %622 = vadd.xlane.f32.xlu2 %v621_v2  ;;  %619 = vadd.xlane.f32.xlu1 %v618_v4  ;;  %v1246_v48 = vmul.f32 1.442695, %v1110_v28  ;;  %v4079_v51 = vadd.s32 4294967232, %v4006_v23  ;;  %v1244_v52 = vmul.f32 1.442695, %v1109_v32  ;;  %v4106_v16 = vadd.s32 4294967240, %v4006_v23 }
  0x94   :  { %v3243_v14 = vpop.eup %3242  ;;  %v1531_v18 = vadd.f32 1.0, %v3241_v9  ;;  %v1534_v19 = vmul.f32 -0.5, %v3241_v9  ;;  %v1537_v42 = vand.u32 2147483647, %v3241_v9  ;;  %v1491_v54 = vmul.f32 %v4032_v49, %v1490_v35  ;;  %v4096_v49 = vpop.xlane.xlu0 %481 }
  0x95   :  { %616 = vadd.xlane.f32.xlu0 %v615_v5  ;;  %v3245_v20 = vpop.eup %3244  ;;  %v1524_v21 = vmul.f32 0.6931472, %v3243_v14  ;;  %vm4082_vm3 = vcmp.lt.f32.partialorder %v1492_v36, 0.0004427343  ;;  %v854_v14 = vmin.f32 %v4045_v59, 0.0  ;;  %v132_v5 = vld [vmem:[%s6197_s0 + $0x1b8] sm:$0xff] }
  0x96   :  { %v3247_v29 = vpop.eup %3246  ;;  %3252 = vlog2.f32 %v1531_v18  ;;  %v1535_v37 = vadd.f32 1.0, %v1534_v19  ;;  %v1506_v39 = vmul.f32 0.6931472, %v3245_v20  ;;  %vm4092_vm4 = vcmp.lt.f32.partialorder %v1537_v42, 0.0004427343  ;;  %v4100_v10 = vpop.xlane.xlu2 %496 }
  0x97   :  { %v3249_v33 = vpop.eup %3248  ;;  %v1530_v45 = vsel %vm4065_vm1, %v1527_v24, %v1524_v21  ;;  %v1488_v46 = vmul.f32 0.6931472, %v3247_v29  ;;  %v980_v18 = vand.u32 2147483647, %v4096_v49  ;;  %v853_v24 = vmin.f32 %v4048_v1, 0.0  ;;  %v4115_v29 = vpop.xlane.xlu1 %493  ;;  %v134_v1 = vld [vmem:[%s6197_s0 + $0x1c8] sm:$0xff] }
  0x98   :  { %v3251_v38 = vpop.eup %3250  ;;  %v1513_v43 = vadd.f32 1.0, %v3249_v33  ;;  %v1516_v47 = vmul.f32 -0.5, %v3249_v33  ;;  %v1536_v44 = vmul.f32 %v3241_v9, %v1535_v37  ;;  %v4088_v3 = vsub.f32 %v850_v56, %v1530_v45 }
  0x99   :  { %v1495_v50 = vadd.f32 1.0, %v3251_v38  ;;  %v1498_v62 = vmul.f32 -0.5, %v3251_v38  ;;  %v1512_v4 = vsel %vm4070_vm2, %v1509_v40, %v1506_v39  ;;  %v1494_v6 = vsel %vm4082_vm3, %v1491_v54, %v1488_v46 }
  0x9a   :  { %3254 = vlog2.f32 %v1513_v43  ;;  %v1517_v9 = vadd.f32 1.0, %v1516_v47  ;;  %v1519_v61 = vand.u32 2147483647, %v3249_v33  ;;  %v1501_v11 = vand.u32 2147483647, %v3251_v38 }
  0x9b   :  { %3256 = vlog2.f32 %v1495_v50  ;;  %v1499_v56 = vadd.f32 1.0, %v1498_v62  ;;  %v2919_v20 = vperm.slane %v4088_v3, %v4028_v41  ;;  %v2640_v21 = vsub.f32 %v848_v57, %v1512_v4  ;;  %v133_v62 = vld [vmem:[%s6197_s0 + $0x1c0] sm:$0xff] }
  0x9c   :  { %v3253_v2 = vpop.eup %3252  ;;  %3258 = vpow2.f32 %v1246_v48  ;;  %v985_v28 = vand.u32 2147483647, %v4100_v10  ;;  %v2638_v30 = vsub.f32 %v846_v58, %v1494_v6  ;;  %v1518_v34 = vmul.f32 %v3249_v33, %v1517_v9  ;;  %v260_v6 = vld [vmem:[#allocation3 + $0x1b8] sm:$0xff] }
  0x9d   :  { %v1533_v8 = vmul.f32 0.6931472, %v3253_v2  ;;  %3260 = vpow2.f32 %v1244_v52  ;;  %v1108_v35 = vsub.f32 0.0, %v980_v18  ;;  %vm1520_vm8 = vcmp.lt.f32.partialorder %v1519_v61, 0.0004427343  ;;  %v261_v2 = vld [vmem:[#allocation3 + $0x1c0] sm:$0xff] }
  0x9e   :  { %v1500_v63 = vmul.f32 %v3251_v38, %v1499_v56  ;;  %vm4123_vm9 = vcmp.lt.f32.partialorder %v1501_v11, 0.0004427343  ;;  %v1113_v58 = vsub.f32 0.0, %v985_v28  ;;  %v984_v33 = vand.u32 2147483647, %v4115_v29 }
  0x9f   :  { %v1539_v13 = vsel %vm4092_vm4, %v1536_v44, %v1533_v8  ;;  %v1242_v45 = vmul.f32 1.442695, %v1108_v35  ;;  %v2911_v50 = vperm.slane %v2640_v21, %v4036_v53  ;;  %v2905_v60 = vperm.slane %v2638_v30, %v4006_v23  ;;  %v4141_v44 = vpop.xlane.xlu0 %490  ;;  %v131_v8 = vld [vmem:[%s6197_s0 + $0x1b0] sm:$0xff]  ;;  %v4204_v59 = vpop.xlane.xlu1 %502 }
  0xa0   :  { %v3255_v19 = vpop.eup %3254  ;;  %v4121_v37 = vsub.f32 %v851_v17, %v1539_v13  ;;  %v1252_v4 = vmul.f32 1.442695, %v1113_v58  ;;  %v1112_v11 = vsub.f32 0.0, %v984_v33  ;;  %v259_v13 = vld [vmem:[#allocation3 + $0x1b0] sm:$0xff]  ;;  %v983_v21 = vand.u32 2147483647, %v4141_v44 }
  0xa1   :  { %v1515_v32 = vmul.f32 0.6931472, %v3255_v19  ;;  %v3257_v36 = vpop.eup %3256  ;;  %v387_v57 = vsub.f32 %v131_v8, %v259_v13  ;;  %v855_v61 = vmin.f32 %v4141_v44, 0.0  ;;  %vm2936_vm2 = vcmask 589312  }
  0xa2   :  { %v3259_v39 = vpop.eup %3258  ;;  %v1497_v0 = vmul.f32 0.6931472, %v3257_v36  ;;  %v2923_v25 = vperm.slane %v4121_v37, %v4040_v55  ;;  %v1250_v30 = vmul.f32 1.442695, %v1112_v11  ;;  %vm2940_vm4 = vcmask 654912  }
  0xa3   :  { %v1521_v40 = vsel %vm1520_vm8, %v1518_v34, %v1515_v32  ;;  %v3261_v42 = vpop.eup %3260  ;;  %v1558_v17 = vadd.f32 1.0, %v3259_v39  ;;  %v1561_v43 = vmul.f32 -0.5, %v3259_v39  ;;  %v1564_v46 = vand.u32 2147483647, %v3259_v39 }
  0xa4   :  { %v2641_v22 = vsub.f32 %v849_v27, %v1521_v40  ;;  %v1503_v38 = vsel %vm4123_vm9, %v1500_v63, %v1497_v0  ;;  %v1549_v47 = vadd.f32 1.0, %v3261_v42  ;;  %v1552_v48 = vmul.f32 -0.5, %v3261_v42 }
  0xa5   :  { %v2639_v52 = vsub.f32 %v847_v31, %v1503_v38  ;;  %3262 = vlog2.f32 %v1558_v17  ;;  %v1562_v54 = vadd.f32 1.0, %v1561_v43  ;;  %v4139_v27 = vadd.s32 4294967248, %v4006_v23  ;;  %v135_v38 = vld [vmem:[%s6197_s0 + $0x1d0] sm:$0xff] }
  0xa6   :  { %3264 = vlog2.f32 %v1549_v47  ;;  %v1553_v31 = vadd.f32 1.0, %v1552_v48  ;;  %v2915_v9 = vperm.slane %v2641_v22, %v4054_v7  ;;  %vm4154_vm12 = vcmp.lt.f32.partialorder %v1564_v46, 0.0004427343 }
  0xa7   :  { %v2907_v26 = vperm.slane %v2639_v52, %v4060_v12  ;;  %3266 = vpow2.f32 %v1242_v45  ;;  %v1555_v56 = vand.u32 2147483647, %v3261_v42  ;;  %v1563_v19 = vmul.f32 %v3259_v39, %v1562_v54  ;;  %v4183_v52 = vpop.xlane.xlu2 %505 }
  0xa8   :  { %3268 = vpow2.f32 %v1252_v4  ;;  %v389_v32 = vsub.f32 %v133_v62, %v261_v2  ;;  %v388_v34 = vsub.f32 %v132_v5, %v260_v6  ;;  %v1554_v37 = vmul.f32 %v3261_v42, %v1553_v31 }
  0xa9   :  { %v2909_v18 = vsel %vm6202_vm5, %v2907_v26, %v2905_v60  ;;  %v1111_v63 = vsub.f32 0.0, %v983_v21  ;;  %3270 = vpow2.f32 %v1250_v30  ;;  %vm4173_vm13 = vcmp.lt.f32.partialorder %v1555_v56, 0.0004427343 }
  0xaa   :  { %v2913_v28 = vsel %vm2912_vm6, %v2911_v50, %v2909_v18  ;;  %v630_v58 = vsel %vm461_vm0, %v389_v32, 0.0  ;;  %v627_v42 = vsel %vm461_vm0, %v388_v34, 0.0  ;;  %v852_v48 = vmin.f32 %v4096_v49, 0.0 }
  0xab   :  { %v3263_v35 = vpop.eup %3262  ;;  %v2917_v36 = vsel %vm2916_vm7, %v2915_v9, %v2913_v28  ;;  %v1248_v43 = vmul.f32 1.442695, %v1111_v63  ;;  %631 = vadd.xlane.f32.xlu2 %v630_v58  ;;  %628 = vadd.xlane.f32.xlu1 %v627_v42  ;;  %v624_v50 = vsel %vm461_vm0, %v387_v57, 0.0  ;;  %v4186_v60 = vadd.s32 4294967208, %v4006_v23 }
  0xac   :  { %v3265_v40 = vpop.eup %3264  ;;  %v1560_v0 = vmul.f32 0.6931472, %v3263_v35  ;;  %v2921_v39 = vsel %vm2920_vm10, %v2919_v20, %v2917_v36  ;;  %625 = vadd.xlane.f32.xlu0 %v624_v50  ;;  %v4196_v26 = vadd.s32 4294967216, %v4006_v23  ;;  %v856_v6 = vmin.f32 %v4115_v29, 0.0  ;;  %v136_v36 = vld [vmem:[%s6197_s0 + $0x1d8] sm:$0xff] }
  0xad   :  { %v3267_v33 = vpop.eup %3266  ;;  %v1551_v22 = vmul.f32 0.6931472, %v3265_v40  ;;  %v4168_v17 = vsel %vm2924_vm11, %v2923_v25, %v2921_v39  ;;  %3272 = vpow2.f32 %v1248_v43  ;;  %v857_v25 = vmin.f32 %v4100_v10, 0.0 }
  0xae   :  { %v1566_v45 = vsel %vm4154_vm12, %v1563_v19, %v1560_v0  ;;  %v1540_v3 = vadd.f32 1.0, %v3267_v33  ;;  %v1543_v20 = vmul.f32 -0.5, %v3267_v33  ;;  %v4177_v46 = vpop.eup %3268  ;;  %v1546_v54 = vand.u32 2147483647, %v3267_v33 }
  0xaf   :  { %v1557_v47 = vsel %vm4173_vm13, %v1554_v37, %v1551_v22  ;;  %v4191_v62 = vsub.f32 %v854_v14, %v1566_v45  ;;  %v1585_v2 = vadd.f32 1.0, %v4177_v46  ;;  %v1588_v49 = vmul.f32 -0.5, %v4177_v46  ;;  %v3271_v31 = vpop.eup %3270  ;;  %v264_v37 = vld [vmem:[#allocation3 + $0x1d8] sm:$0xff] }
  0xb0   :  { %3274 = vlog2.f32 %v1540_v3  ;;  %v4200_v4 = vsub.f32 %v853_v24, %v1557_v47  ;;  %v1544_v5 = vadd.f32 1.0, %v1543_v20  ;;  %v988_v8 = vand.u32 2147483647, %v4183_v52  ;;  %v263_v3 = vld [vmem:[#allocation3 + $0x1d0] sm:$0xff] }
  0xb1   :  { %3276 = vlog2.f32 %v1585_v2  ;;  %v1576_v14 = vadd.f32 1.0, %v3271_v31  ;;  %v4207_v9 = vadd.s32 4294967224, %v4006_v23  ;;  %vm4210_vm1 = vcmp.lt.f32.partialorder %v1546_v54, 0.0004427343 }
  0xb2   :  { %v1579_v24 = vmul.f32 -0.5, %v3271_v31  ;;  %v4215_v56 = vadd.s32 4294967184, %v4006_v23  ;;  %v1116_v11 = vsub.f32 0.0, %v988_v8  ;;  %v2935_v18 = vperm.slane %v4191_v62, %v4079_v51  ;;  %v4233_v62 = vpop.xlane.xlu0 %499 }
  0xb3   :  { %v3273_v13 = vpop.eup %3272  ;;  %v1589_v19 = vadd.f32 1.0, %v1588_v49  ;;  %3278 = vlog2.f32 %v1576_v14  ;;  %v987_v21 = vand.u32 2147483647, %v4204_v59  ;;  %v2931_v30 = vperm.slane %v4200_v4, %v4106_v16  ;;  %v139_v49 = vld [vmem:[%s6197_s0 + $0x1f0] sm:$0xff] }
  0xb4   :  { %v1545_v32 = vmul.f32 %v3267_v33, %v1544_v5  ;;  %v1591_v34 = vand.u32 2147483647, %v4177_v46  ;;  %v1567_v35 = vadd.f32 1.0, %v3273_v13  ;;  %v1570_v57 = vmul.f32 -0.5, %v3273_v13 }
  0xb5   :  { %v860_v40 = vmin.f32 %v4183_v52, 0.0  ;;  %v1258_v0 = vmul.f32 1.442695, %v1116_v11  ;;  %v1580_v39 = vadd.f32 1.0, %v1579_v24  ;;  %v1582_v58 = vand.u32 2147483647, %v3271_v31 }
  0xb6   :  { %v3275_v28 = vpop.eup %3274  ;;  %3280 = vlog2.f32 %v1567_v35  ;;  %v1115_v22 = vsub.f32 0.0, %v987_v21  ;;  %v1590_v42 = vmul.f32 %v4177_v46, %v1589_v19  ;;  %v392_v45 = vsub.f32 %v136_v36, %v264_v37  ;;  %v262_v21 = vld [vmem:[#allocation3 + $0x1c8] sm:$0xff] }
  0xb7   :  { %v1542_v63 = vmul.f32 0.6931472, %v3275_v28  ;;  %v3277_v43 = vpop.eup %3276  ;;  %3282 = vpow2.f32 %v1258_v0  ;;  %v1573_v50 = vand.u32 2147483647, %v3273_v13  ;;  %vm4235_vm3 = vcmp.lt.f32.partialorder %v1591_v34, 0.0004427343 }
  0xb8   :  { %v1587_v47 = vmul.f32 0.6931472, %v3277_v43  ;;  %v1256_v54 = vmul.f32 1.442695, %v1115_v22  ;;  %v1571_v46 = vadd.f32 1.0, %v1570_v57  ;;  %v4240_v4 = vadd.s32 4294967192, %v4006_v23 }
  0xb9   :  { %v1548_v33 = vsel %vm4210_vm1, %v1545_v32, %v1542_v63  ;;  %v3279_v2 = vpop.eup %3278  ;;  %v859_v5 = vmin.f32 %v4204_v59, 0.0  ;;  %v1581_v14 = vmul.f32 %v3271_v31, %v1580_v39  ;;  %vm6201_vm8 = vcmask 720512  }
  0xba   :  { %v2644_v20 = vsub.f32 %v852_v48, %v1548_v33  ;;  %v1578_v48 = vmul.f32 0.6931472, %v3279_v2  ;;  %3284 = vpow2.f32 %v1256_v54  ;;  %vm1583_vm9 = vcmp.lt.f32.partialorder %v1582_v58, 0.0004427343 }
  0xbb   :  { %v986_v24 = vand.u32 2147483647, %v4233_v62  ;;  %v639_v11 = vsel %vm461_vm0, %v392_v45, 0.0  ;;  %v391_v19 = vsub.f32 %v135_v38, %v263_v3  ;;  %v1593_v31 = vsel %vm4235_vm3, %v1590_v42, %v1587_v47  ;;  %v4271_v3 = vpop.xlane.xlu1 %511 }
  0xbc   :  { %v2927_v8 = vperm.slane %v2644_v20, %v4139_v27  ;;  %v3281_v28 = vpop.eup %3280  ;;  %v1584_v34 = vsel %vm1583_vm9, %v1581_v14, %v1578_v48  ;;  %vm4253_vm12 = vcmp.lt.f32.partialorder %v1573_v50, 0.0004427343  ;;  %640 = vadd.xlane.f32.xlu2 %v639_v11  ;;  %v1572_v0 = vmul.f32 %v3273_v13, %v1571_v46  ;;  %v4286_v14 = vpop.xlane.xlu0 %508  ;;  %v266_v11 = vld [vmem:[#allocation3 + $0x1e8] sm:$0xff] }
  0xbd   :  { %v3283_v36 = vpop.eup %3282  ;;  %v2648_v63 = vsub.f32 %v856_v6, %v1584_v34  ;;  %v1569_v57 = vmul.f32 0.6931472, %v3281_v28  ;;  %v390_v22 = vsub.f32 %v134_v1, %v262_v21  ;;  %v2649_v43 = vsub.f32 %v857_v25, %v1593_v31  ;;  %v267_v1 = vld [vmem:[#allocation3 + $0x1f0] sm:$0xff]  ;;  %v137_v31 = vld [vmem:[%s6197_s0 + $0x1e0] sm:$0xff] }
  0xbe   :  { %v2929_v32 = vsel %vm2928_vm14, %v2927_v8, %v4168_v17  ;;  %v1612_v17 = vadd.f32 1.0, %v3283_v36  ;;  %v1615_v58 = vmul.f32 -0.5, %v3283_v36  ;;  %v1114_v42 = vsub.f32 0.0, %v986_v24  ;;  %v138_v24 = vld [vmem:[%s6197_s0 + $0x1e8] sm:$0xff]  ;;  %v265_v34 = vld [vmem:[#allocation3 + $0x1e0] sm:$0xff] }
  0xbf   :  { %v2933_v37 = vsel %vm2932_vm15, %v2931_v30, %v2929_v32  ;;  %v1575_v33 = vsel %vm4253_vm12, %v1572_v0, %v1569_v57  ;;  %v636_v45 = vsel %vm461_vm0, %v391_v19, 0.0  ;;  %v4266_v30 = vpop.xlane.xlu2 %514  ;;  %v1618_v13 = vand.u32 2147483647, %v3283_v36 }
  0xc0   :  { %v2937_v39 = vsel %vm2936_vm2, %v2935_v18, %v2933_v37  ;;  %v3285_v29 = vpop.eup %3284  ;;  %v2647_v6 = vsub.f32 %v855_v61, %v1575_v33  ;;  %3286 = vlog2.f32 %v1612_v17  ;;  %vm6200_vm13 = vcmask 786112   ;;  %637 = vadd.xlane.f32.xlu1 %v636_v45 }
  0xc1   :  { %v2943_v18 = vperm.slane %v2648_v63, %v4196_v26  ;;  %v1616_v10 = vadd.f32 1.0, %v1615_v58  ;;  %v1603_v25 = vadd.f32 1.0, %v3285_v29  ;;  %v1254_v38 = vmul.f32 1.442695, %v1114_v42 }
  0xc2   :  { %v2939_v20 = vperm.slane %v2647_v6, %v4207_v9  ;;  %v1606_v47 = vmul.f32 -0.5, %v3285_v29  ;;  %v633_v50 = vsel %vm461_vm0, %v390_v22, 0.0  ;;  %v991_v54 = vand.u32 2147483647, %v4266_v30 }
  0xc3   :  { %v2947_v44 = vperm.slane %v2649_v43, %v4186_v60  ;;  %3288 = vlog2.f32 %v1603_v25  ;;  %v4278_v61 = vadd.s32 4294967200, %v4006_v23  ;;  %v858_v2 = vmin.f32 %v4233_v62, 0.0  ;;  %634 = vadd.xlane.f32.xlu0 %v633_v50 }
  0xc4   :  { %v2941_v46 = vsel %vm2940_vm4, %v2939_v20, %v2937_v39  ;;  %3290 = vpow2.f32 %v1254_v38  ;;  %v1119_v8 = vsub.f32 0.0, %v991_v54  ;;  %v990_v48 = vand.u32 2147483647, %v4271_v3  ;;  %v4337_v59 = vpop.xlane.xlu0 %517 }
  0xc5   :  { %v2945_v19 = vsel %vm6201_vm8, %v2943_v18, %v2941_v46  ;;  %v1617_v21 = vmul.f32 %v3283_v36, %v1616_v10  ;;  %vm4292_vm1 = vcmp.lt.f32.partialorder %v1618_v13, 0.0004427343  ;;  %v1609_v32 = vand.u32 2147483647, %v3285_v29  ;;  %v4315_v46 = vpop.xlane.xlu1 %520 }
  0xc6   :  { %v3287_v35 = vpop.eup %3286  ;;  %v1607_v37 = vadd.f32 1.0, %v1606_v47  ;;  %v4300_v63 = vsel %vm6200_vm13, %v2947_v44, %v2945_v19  ;;  %v1264_v57 = vmul.f32 1.442695, %v1119_v8  ;;  %v1118_v0 = vsub.f32 0.0, %v990_v48 }
  0xc7   :  { %v1614_v39 = vmul.f32 0.6931472, %v3287_v35  ;;  %v863_v36 = vmin.f32 %v4266_v30, 0.0  ;;  %v989_v17 = vand.u32 2147483647, %v4286_v14  ;;  %v395_v58 = vsub.f32 %v139_v49, %v267_v1  ;;  %v4311_v10 = vpop.xlane.xlu2 %523 }
  0xc8   :  { %3292 = vpow2.f32 %v1264_v57  ;;  %v1262_v22 = vmul.f32 1.442695, %v1118_v0  ;;  %v394_v43 = vsub.f32 %v138_v24, %v266_v11  ;;  %v393_v33 = vsub.f32 %v137_v31, %v265_v34 }
  0xc9   :  { %v3289_v42 = vpop.eup %3288  ;;  %v1620_v45 = vsel %vm4292_vm1, %v1617_v21, %v1614_v39  ;;  %vm4306_vm3 = vcmp.lt.f32.partialorder %v1609_v32, 0.0004427343  ;;  %v1117_v13 = vsub.f32 0.0, %v989_v17  ;;  %v648_v18 = vsel %vm461_vm0, %v395_v58, 0.0 }
  0xca   :  { %v3291_v25 = vpop.eup %3290  ;;  %v1605_v38 = vmul.f32 0.6931472, %v3289_v42  ;;  %v1608_v20 = vmul.f32 %v3285_v29, %v1607_v37  ;;  %3294 = vpow2.f32 %v1262_v22  ;;  %649 = vadd.xlane.f32.xlu2 %v648_v18  ;;  %v645_v47 = vsel %vm461_vm0, %v394_v43, 0.0  ;;  %v142_v43 = vld [vmem:[%s6197_s0 + $0x208] sm:$0xff] }
  0xcb   :  { %v1594_v50 = vadd.f32 1.0, %v3291_v25  ;;  %v1597_v54 = vmul.f32 -0.5, %v3291_v25  ;;  %v862_v44 = vmin.f32 %v4271_v3, 0.0  ;;  %v1260_v49 = vmul.f32 1.442695, %v1117_v13  ;;  %646 = vadd.xlane.f32.xlu1 %v645_v47  ;;  %v141_v47 = vld [vmem:[%s6197_s0 + $0x200] sm:$0xff] }
  0xcc   :  { %v4319_v8 = vsub.f32 %v860_v40, %v1620_v45  ;;  %v1611_v48 = vsel %vm4306_vm3, %v1608_v20, %v1605_v38  ;;  %v642_v29 = vsel %vm461_vm0, %v393_v33, 0.0  ;;  %v994_v1 = vand.u32 2147483647, %v4311_v10  ;;  %v270_v33 = vld [vmem:[#allocation3 + $0x208] sm:$0xff] }
  0xcd   :  { %3296 = vlog2.f32 %v1594_v50  ;;  %v1600_v24 = vand.u32 2147483647, %v3291_v25  ;;  %v4326_v11 = vadd.s32 4294967176, %v4006_v23  ;;  %v861_v19 = vmin.f32 %v4286_v14, 0.0  ;;  %643 = vadd.xlane.f32.xlu0 %v642_v29  ;;  %v269_v50 = vld [vmem:[#allocation3 + $0x200] sm:$0xff] }
  0xce   :  { %v3293_v21 = vpop.eup %3292  ;;  %v4331_v52 = vsub.f32 %v859_v5, %v1611_v48  ;;  %3298 = vpow2.f32 %v1260_v49  ;;  %v1122_v40 = vsub.f32 0.0, %v994_v1  ;;  %v993_v28 = vand.u32 2147483647, %v4315_v46  ;;  %v157_v14 = vld [vmem:[%s6197_s0 + $0x280] sm:$0xff] }
  0xcf   :  { %v1598_v32 = vadd.f32 1.0, %v1597_v54  ;;  %v1639_v31 = vadd.f32 1.0, %v3293_v21  ;;  %v1642_v34 = vmul.f32 -0.5, %v3293_v21  ;;  %v866_v35 = vmin.f32 %v4311_v10, 0.0 }
  0xd0   :  { %v3295_v37 = vpop.eup %3294  ;;  %v2959_v57 = vperm.slane %v4319_v8, %v4215_v56  ;;  %vm2952_vm9 = vcmask 851712   ;;  %v1645_v0 = vand.u32 2147483647, %v3293_v21  ;;  %v1270_v39 = vmul.f32 1.442695, %v1122_v40 }
  0xd1   :  { %v1121_v17 = vsub.f32 0.0, %v993_v28  ;;  %vm2956_vm12 = vcmask 917312   ;;  %3300 = vlog2.f32 %v1639_v31  ;;  %v1643_v5 = vadd.f32 1.0, %v1642_v34 }
  0xd2   :  { %v1630_v58 = vadd.f32 1.0, %v3295_v37  ;;  %v1633_v22 = vmul.f32 -0.5, %v3295_v37  ;;  %v2955_v42 = vperm.slane %v4331_v52, %v4240_v4  ;;  %vm4344_vm1 = vcmp.lt.f32.partialorder %v1600_v24, 0.0004427343 }
  0xd3   :  { %vm2960_vm3 = vcmask 982912   ;;  %3302 = vpow2.f32 %v1270_v39  ;;  %v1268_v6 = vmul.f32 1.442695, %v1121_v17  ;;  %v3297_v13 = vpop.eup %3296  ;;  %v1599_v18 = vmul.f32 %v3291_v25, %v1598_v32 }
  0xd4   :  { %3304 = vlog2.f32 %v1630_v58  ;;  %v1636_v38 = vand.u32 2147483647, %v3295_v37  ;;  %v992_v20 = vand.u32 2147483647, %v4337_v59  ;;  %v3299_v54 = vpop.eup %3298  ;;  %v1596_v49 = vmul.f32 0.6931472, %v3297_v13 }
  0xd5   :  { %v1634_v48 = vadd.f32 1.0, %v1633_v22  ;;  %3306 = vpow2.f32 %v1268_v6  ;;  %v398_v29 = vsub.f32 %v142_v43, %v270_v33  ;;  %v1644_v1 = vmul.f32 %v3293_v21, %v1643_v5  ;;  %v268_v5 = vld [vmem:[#allocation3 + $0x1f8] sm:$0xff] }
  0xd6   :  { %vm4352_vm13 = vcmp.lt.f32.partialorder %v1645_v0, 0.0004427343  ;;  %v1621_v25 = vadd.f32 1.0, %v3299_v54  ;;  %v1624_v52 = vmul.f32 -0.5, %v3299_v54  ;;  %v1602_v40 = vsel %vm4344_vm1, %v1599_v18, %v1596_v49  ;;  %v140_v0 = vld [vmem:[%s6197_s0 + $0x1f8] sm:$0xff] }
  0xd7   :  { %v1120_v28 = vsub.f32 0.0, %v992_v20  ;;  %v657_v32 = vsel %vm461_vm0, %v398_v29, 0.0  ;;  %v397_v31 = vsub.f32 %v141_v47, %v269_v50  ;;  %v3301_v34 = vpop.eup %3300  ;;  %v2650_v39 = vsub.f32 %v858_v2, %v1602_v40 }
  0xd8   :  { %vm4361_vm8 = vcmp.lt.f32.partialorder %v1636_v38, 0.0004427343  ;;  %3308 = vlog2.f32 %v1621_v25  ;;  %v1625_v21 = vadd.f32 1.0, %v1624_v52  ;;  %658 = vadd.xlane.f32.xlu2 %v657_v32  ;;  %v1641_v22 = vmul.f32 0.6931472, %v3301_v34 }
  0xd9   :  { %v3303_v58 = vpop.eup %3302  ;;  %v1635_v43 = vmul.f32 %v3295_v37, %v1634_v48  ;;  %v1266_v33 = vmul.f32 1.442695, %v1120_v28  ;;  %v654_v45 = vsel %vm461_vm0, %v397_v31, 0.0  ;;  %v2951_v2 = vperm.slane %v2650_v39, %v4278_v61  ;;  %v4388_v31 = vpop.xlane.xlu1 %529 }
  0xda   :  { %v3305_v62 = vpop.eup %3304  ;;  %v1627_v6 = vand.u32 2147483647, %v3299_v54  ;;  %v1666_v13 = vadd.f32 1.0, %v3303_v58  ;;  %v1669_v18 = vmul.f32 -0.5, %v3303_v58  ;;  %655 = vadd.xlane.f32.xlu1 %v654_v45  ;;  %v1647_v20 = vsel %vm4352_vm13, %v1644_v1, %v1641_v22  ;;  %v4379_v1 = vpop.xlane.xlu2 %532 }
  0xdb   :  { %v3307_v38 = vpop.eup %3306  ;;  %v1632_v47 = vmul.f32 0.6931472, %v3305_v62  ;;  %vm2964_vm1 = vcmask 1048512   ;;  %3310 = vpow2.f32 %v1266_v33  ;;  %v396_v50 = vsub.f32 %v140_v0, %v268_v5  ;;  %v158_v62 = vld [vmem:[%s6197_s0 + $0x288] sm:$0xff] }
  0xdc   :  { %v2953_v37 = vsel %vm2952_vm9, %v2951_v2, %v4300_v63  ;;  %v2655_v49 = vsub.f32 %v863_v36, %v1647_v20  ;;  %v1626_v48 = vmul.f32 %v3299_v54, %v1625_v21  ;;  %3312 = vlog2.f32 %v1666_v13  ;;  %v286_v2 = vld [vmem:[#allocation3 + $0x288] sm:$0xff]  ;;  %v173_v13 = vld [vmem:[%s6197_s0 + $0x300] sm:$0xff] }
  0xdd   :  { %v2957_v29 = vsel %vm2956_vm12, %v2955_v42, %v2953_v37  ;;  %v1638_v25 = vsel %vm4361_vm8, %v1635_v43, %v1632_v47  ;;  %v1672_v52 = vand.u32 2147483647, %v3303_v58  ;;  %v1657_v24 = vadd.f32 1.0, %v3307_v38  ;;  %v271_v37 = vld [vmem:[#allocation3 + $0x210] sm:$0xff] }
  0xde   :  { %v3309_v40 = vpop.eup %3308  ;;  %v2967_v28 = vperm.slane %v2655_v49, %v4060_v12  ;;  %v2654_v63 = vsub.f32 %v862_v44, %v1638_v25  ;;  %v2961_v30 = vsel %vm2960_vm3, %v2959_v57, %v2957_v29  ;;  %v1670_v36 = vadd.f32 1.0, %v1669_v18  ;;  %v4393_v44 = vpop.xlane.xlu0 %526 }
  0xdf   :  { %v1623_v42 = vmul.f32 0.6931472, %v3309_v40  ;;  %3314 = vlog2.f32 %v1657_v24  ;;  %v1660_v54 = vmul.f32 -0.5, %v3307_v38  ;;  %v1663_v32 = vand.u32 2147483647, %v3307_v38 }
  0xe0   :  { %v2966_v34 = vperm.slane %v2654_v63, %v4006_v23  ;;  %vm1628_vm8 = vcmp.lt.f32.partialorder %v1627_v6, 0.0004427343  ;;  %v651_v39 = vsel %vm461_vm0, %v396_v50, 0.0  ;;  %v997_v3 = vand.u32 2147483647, %v4379_v1  ;;  %v143_v50 = vld [vmem:[%s6197_s0 + $0x210] sm:$0xff] }
  0xe1   :  { %v3311_v17 = vpop.eup %3310  ;;  %v1629_v8 = vsel %vm1628_vm8, %v1626_v48, %v1623_v42  ;;  %v865_v57 = vmin.f32 %v4315_v46, 0.0  ;;  %v1661_v21 = vadd.f32 1.0, %v1660_v54  ;;  %v864_v0 = vmin.f32 %v4337_v59, 0.0  ;;  %652 = vadd.xlane.f32.xlu0 %v651_v39 }
  0xe2   :  { %v3313_v5 = vpop.eup %3312  ;;  %v4398_v22 = vsel %vm6202_vm5, %v2967_v28, %v2966_v34  ;;  %v2653_v43 = vsub.f32 %v861_v19, %v1629_v8  ;;  %v1648_v33 = vadd.f32 1.0, %v3311_v17  ;;  %v1651_v45 = vmul.f32 -0.5, %v3311_v17  ;;  %v285_v19 = vld [vmem:[#allocation3 + $0x280] sm:$0xff] }
  0xe3   :  { %v1671_v6 = vmul.f32 %v3303_v58, %v1670_v36  ;;  %vm4405_vm13 = vcmp.lt.f32.partialorder %v1672_v52, 0.0004427343  ;;  %vm4409_vm8 = vcmp.lt.f32.partialorder %v1663_v32, 0.0004427343  ;;  %v1125_v18 = vsub.f32 0.0, %v997_v3  ;;  %v4427_v32 = vpop.xlane.xlu2 %541 }
  0xe4   :  { %v2963_v20 = vperm.slane %v2653_v43, %v4326_v11  ;;  %v1668_v47 = vmul.f32 0.6931472, %v3313_v5  ;;  %3316 = vlog2.f32 %v1648_v33  ;;  %v996_v58 = vand.u32 2147483647, %v4388_v31  ;;  %v4438_v43 = vpop.xlane.xlu1 %538 }
  0xe5   :  { %v3315_v49 = vpop.eup %3314  ;;  %v1654_v48 = vand.u32 2147483647, %v3311_v17  ;;  %v869_v29 = vmin.f32 %v4379_v1, 0.0  ;;  %v1276_v25 = vmul.f32 1.442695, %v1125_v18  ;;  %v868_v52 = vmin.f32 %v4388_v31, 0.0 }
  0xe6   :  { %v4424_v24 = vsel %vm2964_vm1, %v2963_v20, %v2961_v30  ;;  %v1659_v40 = vmul.f32 0.6931472, %v3315_v49  ;;  %v1662_v28 = vmul.f32 %v3307_v38, %v1661_v21  ;;  %v1652_v63 = vadd.f32 1.0, %v1651_v45  ;;  %v4443_v46 = vpop.xlane.xlu0 %535  ;;  %v301_v18 = vld [vmem:[#allocation3 + $0x300] sm:$0xff] }
  0xe7   :  { %3318 = vpow2.f32 %v1276_v25  ;;  %v1124_v36 = vsub.f32 0.0, %v996_v58  ;;  %v995_v42 = vand.u32 2147483647, %v4393_v44  ;;  %v414_v54 = vsub.f32 %v158_v62, %v286_v2 }
  0xe8   :  { %v1674_v34 = vsel %vm4405_vm13, %v1671_v6, %v1668_v47  ;;  %v1665_v39 = vsel %vm4409_vm8, %v1662_v28, %v1659_v40  ;;  %v413_v3 = vsub.f32 %v157_v14, %v285_v19  ;;  %v399_v8 = vsub.f32 %v143_v50, %v271_v37  ;;  %v159_v28 = vld [vmem:[%s6197_s0 + $0x290] sm:$0xff] }
  0xe9   :  { %vm4433_vm5 = vcmp.lt.f32.partialorder %v1654_v48, 0.0004427343  ;;  %v1274_v38 = vmul.f32 1.442695, %v1124_v36  ;;  %v1123_v21 = vsub.f32 0.0, %v995_v42  ;;  %v705_v5 = vsel %vm461_vm0, %v414_v54, 0.0 }
  0xea   :  { %v3317_v33 = vpop.eup %3316  ;;  %v2657_v45 = vsub.f32 %v865_v57, %v1665_v39  ;;  %706 = vadd.xlane.f32.xlu2 %v705_v5  ;;  %v702_v62 = vsel %vm461_vm0, %v413_v3, 0.0  ;;  %v660_v2 = vsel %vm461_vm0, %v399_v8, 0.0  ;;  %v1000_v6 = vand.u32 2147483647, %v4427_v32 }
  0xeb   :  { %v1650_v14 = vmul.f32 0.6931472, %v3317_v33  ;;  %v1653_v19 = vmul.f32 %v3311_v17, %v1652_v63  ;;  %3320 = vpow2.f32 %v1274_v38  ;;  %v1272_v20 = vmul.f32 1.442695, %v1123_v21  ;;  %703 = vadd.xlane.f32.xlu1 %v702_v62  ;;  %661 = vadd.xlane.f32.xlu0 %v660_v2  ;;  %v287_v63 = vld [vmem:[#allocation3 + $0x290] sm:$0xff] }
  0xec   :  { %v2658_v57 = vsub.f32 %v866_v35, %v1674_v34  ;;  %v867_v47 = vmin.f32 %v4393_v44, 0.0  ;;  %v1128_v58 = vsub.f32 0.0, %v1000_v6  ;;  %v999_v50 = vand.u32 2147483647, %v4438_v43 }
  0xed   :  { %v3319_v37 = vpop.eup %3318  ;;  %v1656_v49 = vsel %vm4433_vm5, %v1653_v19, %v1650_v14  ;;  %3322 = vpow2.f32 %v1272_v20  ;;  %v998_v48 = vand.u32 2147483647, %v4443_v46  ;;  %v429_v17 = vsub.f32 %v173_v13, %v301_v18  ;;  %v144_v18 = vld [vmem:[%s6197_s0 + $0x218] sm:$0xff] }
  0xee   :  { %v2971_v25 = vperm.slane %v2657_v45, %v4054_v7  ;;  %v2656_v40 = vsub.f32 %v864_v0, %v1656_v49  ;;  %v1693_v10 = vadd.f32 1.0, %v3319_v37  ;;  %v1696_v35 = vmul.f32 -0.5, %v3319_v37  ;;  %v272_v14 = vld [vmem:[#allocation3 + $0x218] sm:$0xff] }
  0xef   :  { %v1282_v36 = vmul.f32 1.442695, %v1128_v58  ;;  %v1127_v42 = vsub.f32 0.0, %v999_v50  ;;  %v1126_v54 = vsub.f32 0.0, %v998_v48  ;;  %v750_v34 = vsel %vm461_vm0, %v429_v17, 0.0 }
  0xf0   :  { %v2973_v39 = vperm.slane %v2658_v57, %v4028_v41  ;;  %v2969_v3 = vperm.slane %v2656_v40, %v4036_v53  ;;  %3324 = vlog2.f32 %v1693_v10  ;;  %v1697_v8 = vadd.f32 1.0, %v1696_v35 }
  0xf1   :  { %v3321_v59 = vpop.eup %3320  ;;  %3326 = vpow2.f32 %v1282_v36  ;;  %v1280_v0 = vmul.f32 1.442695, %v1127_v42  ;;  %v1278_v30 = vmul.f32 1.442695, %v1126_v54  ;;  %v415_v38 = vsub.f32 %v159_v28, %v287_v63  ;;  %v4481_v63 = vpop.xlane.xlu2 %550 }
  0xf2   :  { %v2970_v21 = vsel %vm2912_vm6, %v2969_v3, %v4398_v22  ;;  %v1699_v5 = vand.u32 2147483647, %v3319_v37  ;;  %v1684_v33 = vadd.f32 1.0, %v3321_v59  ;;  %v1687_v45 = vmul.f32 -0.5, %v3321_v59  ;;  %751 = vadd.xlane.f32.xlu2 %v750_v34 }
  0xf3   :  { %v3323_v62 = vpop.eup %3322  ;;  %v2972_v2 = vsel %vm2916_vm7, %v2971_v25, %v2970_v21  ;;  %v1698_v6 = vmul.f32 %v3319_v37, %v1697_v8  ;;  %3328 = vpow2.f32 %v1280_v0  ;;  %v708_v13 = vsel %vm461_vm0, %v415_v38, 0.0  ;;  %v4494_v38 = vpop.xlane.xlu1 %547  ;;  %v145_v0 = vld [vmem:[%s6197_s0 + $0x220] sm:$0xff] }
  0xf4   :  { %3330 = vlog2.f32 %v1684_v33  ;;  %v1690_v19 = vand.u32 2147483647, %v3321_v59  ;;  %v4472_v22 = vsel %vm2920_vm10, %v2973_v39, %v2972_v2  ;;  %v1675_v20 = vadd.f32 1.0, %v3323_v62  ;;  %709 = vadd.xlane.f32.xlu1 %v708_v13 }
  0xf5   :  { %v1688_v57 = vadd.f32 1.0, %v1687_v45  ;;  %v1678_v58 = vmul.f32 -0.5, %v3323_v62  ;;  %v1681_v50 = vand.u32 2147483647, %v3323_v62  ;;  %3332 = vpow2.f32 %v1278_v30 }
  0xf6   :  { %v3325_v37 = vpop.eup %3324  ;;  %vm4474_vm5 = vcmp.lt.f32.partialorder %v1699_v5, 0.0004427343  ;;  %3334 = vlog2.f32 %v1675_v20  ;;  %v872_v48 = vmin.f32 %v4427_v32, 0.0  ;;  %v400_v17 = vsub.f32 %v144_v18, %v272_v14 }
  0xf7   :  { %v3327_v25 = vpop.eup %3326  ;;  %v1695_v40 = vmul.f32 0.6931472, %v3325_v37  ;;  %v1679_v10 = vadd.f32 1.0, %v1678_v58  ;;  %v871_v35 = vmin.f32 %v4438_v43, 0.0  ;;  %v870_v28 = vmin.f32 %v4443_v46, 0.0 }
  0xf8   :  { %vm4483_vm13 = vcmp.lt.f32.partialorder %v1690_v19, 0.0004427343  ;;  %v1720_v42 = vadd.f32 1.0, %v3327_v25  ;;  %v1723_v54 = vmul.f32 -0.5, %v3327_v25  ;;  %v663_v34 = vsel %vm461_vm0, %v400_v17, 0.0  ;;  %v160_v17 = vld [vmem:[%s6197_s0 + $0x298] sm:$0xff] }
  0xf9   :  { %v3329_v39 = vpop.eup %3328  ;;  %v1701_v3 = vsel %vm4474_vm5, %v1698_v6, %v1695_v40  ;;  %v1689_v8 = vmul.f32 %v3321_v59, %v1688_v57  ;;  %vm4490_vm8 = vcmp.lt.f32.partialorder %v1681_v50, 0.0004427343  ;;  %v1726_v30 = vand.u32 2147483647, %v3327_v25  ;;  %664 = vadd.xlane.f32.xlu0 %v663_v34  ;;  %v288_v40 = vld [vmem:[#allocation3 + $0x298] sm:$0xff]  ;;  %v4517_v34 = vpop.xlane.xlu0 %544 }
  0xfa   :  { %v3331_v21 = vpop.eup %3330  ;;  %v4498_v5 = vsub.f32 %v869_v29, %v1701_v3  ;;  %v1680_v33 = vmul.f32 %v3323_v62, %v1679_v10  ;;  %3336 = vlog2.f32 %v1720_v42  ;;  %v1003_v45 = vand.u32 2147483647, %v4481_v63 }
  0xfb   :  { %v3333_v2 = vpop.eup %3332  ;;  %v1686_v6 = vmul.f32 0.6931472, %v3331_v21  ;;  %v1724_v59 = vadd.f32 1.0, %v1723_v54  ;;  %v1711_v13 = vadd.f32 1.0, %v3329_v39  ;;  %v1714_v18 = vmul.f32 -0.5, %v3329_v39  ;;  %v273_v21 = vld [vmem:[#allocation3 + $0x220] sm:$0xff] }
  0xfc   :  { %v3335_v14 = vpop.eup %3334  ;;  %v1717_v19 = vand.u32 2147483647, %v3329_v39  ;;  %v1702_v20 = vadd.f32 1.0, %v3333_v2  ;;  %v1705_v57 = vmul.f32 -0.5, %v3333_v2  ;;  %v1002_v58 = vand.u32 2147483647, %v4494_v38 }
  0xfd   :  { %v1692_v1 = vsel %vm4483_vm13, %v1689_v8, %v1686_v6  ;;  %v1677_v29 = vmul.f32 0.6931472, %v3335_v14  ;;  %3338 = vlog2.f32 %v1711_v13  ;;  %v1715_v62 = vadd.f32 1.0, %v1714_v18 }
  0xfe   :  { %v2979_v50 = vperm.slane %v4498_v5, %v4106_v16  ;;  %v2660_v37 = vsub.f32 %v868_v52, %v1692_v1  ;;  %vm4508_vm5 = vcmp.lt.f32.partialorder %v1726_v30, 0.0004427343  ;;  %3340 = vlog2.f32 %v1702_v20  ;;  %v302_v20 = vld [vmem:[#allocation3 + $0x308] sm:$0xff] }
  0xff   :  { %v1683_v10 = vsel %vm4490_vm8, %v1680_v33, %v1677_v29  ;;  %v1725_v36 = vmul.f32 %v3327_v25, %v1724_v59  ;;  %v1706_v42 = vadd.f32 1.0, %v1705_v57  ;;  %v1131_v54 = vsub.f32 0.0, %v1003_v45 }
 0x100   :  { %v3337_v31 = vpop.eup %3336  ;;  %v2659_v52 = vsub.f32 %v867_v47, %v1683_v10  ;;  %v1716_v3 = vmul.f32 %v3329_v39, %v1715_v62  ;;  %vm4521_vm13 = vcmp.lt.f32.partialorder %v1717_v19, 0.0004427343  ;;  %v1130_v30 = vsub.f32 0.0, %v1002_v58  ;;  %v174_v19 = vld [vmem:[%s6197_s0 + $0x308] sm:$0xff] }
 0x101   :  { %v2977_v25 = vperm.slane %v2660_v37, %v4139_v27  ;;  %v1722_v5 = vmul.f32 0.6931472, %v3337_v31  ;;  %v1288_v33 = vmul.f32 1.442695, %v1131_v54  ;;  %v416_v45 = vsub.f32 %v160_v17, %v288_v40  ;;  %v4541_v40 = vpop.xlane.xlu2 %559  ;;  %v4548_v31 = vpop.xlane.xlu1 %556 }
 0x102   :  { %v2975_v6 = vperm.slane %v2659_v52, %v4040_v55  ;;  %v1708_v44 = vand.u32 2147483647, %v3333_v2  ;;  %v1286_v47 = vmul.f32 1.442695, %v1130_v30  ;;  %v1001_v39 = vand.u32 2147483647, %v4517_v34 }
 0x103   :  { %v3339_v59 = vpop.eup %3338  ;;  %v1707_v13 = vmul.f32 %v3333_v2, %v1706_v42  ;;  %3342 = vpow2.f32 %v1288_v33  ;;  %v711_v18 = vsel %vm461_vm0, %v416_v45, 0.0  ;;  %v401_v14 = vsub.f32 %v145_v0, %v273_v21 }
 0x104   :  { %v3341_v57 = vpop.eup %3340  ;;  %v2976_v58 = vsel %vm2924_vm11, %v2975_v6, %v4472_v22  ;;  %v1728_v1 = vsel %vm4508_vm5, %v1725_v36, %v1722_v5  ;;  %v1713_v29 = vmul.f32 0.6931472, %v3339_v59  ;;  %3344 = vpow2.f32 %v1286_v47  ;;  %712 = vadd.xlane.f32.xlu2 %v711_v18  ;;  %v190_v59 = vld [vmem:[%s6197_s0 + $0x388] sm:$0xff] }
 0x105   :  { %v2978_v2 = vsel %vm2928_vm14, %v2977_v25, %v2976_v58  ;;  %v1704_v62 = vmul.f32 0.6931472, %v3341_v57  ;;  %v1129_v37 = vsub.f32 0.0, %v1001_v39  ;;  %v666_v17 = vsel %vm461_vm0, %v401_v14, 0.0  ;;  %v4563_v39 = vpop.xlane.xlu0 %553  ;;  %v317_v57 = vld [vmem:[#allocation3 + $0x380] sm:$0xff] }
 0x106   :  { %v1719_v10 = vsel %vm4521_vm13, %v1716_v3, %v1713_v29  ;;  %v2980_v42 = vsel %vm2932_vm15, %v2979_v50, %v2978_v2  ;;  %vm1709_vm8 = vcmp.lt.f32.partialorder %v1708_v44, 0.0004427343  ;;  %667 = vadd.xlane.f32.xlu1 %v666_v17  ;;  %v430_v22 = vsub.f32 %v174_v19, %v302_v20  ;;  %v189_v20 = vld [vmem:[%s6197_s0 + $0x380] sm:$0xff] }
 0x107   :  { %v2663_v49 = vsub.f32 %v871_v35, %v1719_v10  ;;  %v1710_v36 = vsel %vm1709_vm8, %v1707_v13, %v1704_v62  ;;  %v1284_v54 = vmul.f32 1.442695, %v1129_v37  ;;  %v2664_v52 = vsub.f32 %v872_v48, %v1728_v1  ;;  %v318_v13 = vld [vmem:[#allocation3 + $0x388] sm:$0xff]  ;;  %v175_v62 = vld [vmem:[%s6197_s0 + $0x310] sm:$0xff] }
 0x108   :  { %v2662_v30 = vsub.f32 %v870_v28, %v1710_v36  ;;  %v753_v3 = vsel %vm461_vm0, %v430_v22, 0.0  ;;  %v1006_v50 = vand.u32 2147483647, %v4541_v40  ;;  %v875_v43 = vmin.f32 %v4481_v63, 0.0 }
 0x109   :  { %v3343_v8 = vpop.eup %3342  ;;  %v2983_v0 = vperm.slane %v2663_v49, %v4207_v9  ;;  %v874_v35 = vmin.f32 %v4494_v38, 0.0  ;;  %3346 = vpow2.f32 %v1284_v54  ;;  %754 = vadd.xlane.f32.xlu0 %v753_v3  ;;  %v1005_v46 = vand.u32 2147483647, %v4548_v31  ;;  %v303_v49 = vld [vmem:[#allocation3 + $0x310] sm:$0xff] }
 0x10a   :  { %v3345_v21 = vpop.eup %3344  ;;  %v2981_v32 = vperm.slane %v2662_v30, %v4079_v51  ;;  %v1747_v48 = vadd.f32 1.0, %v3343_v8  ;;  %v1750_v25 = vmul.f32 -0.5, %v3343_v8  ;;  %v1753_v28 = vand.u32 2147483647, %v3343_v8 }
 0x10b   :  { %v1738_v5 = vadd.f32 1.0, %v3345_v21  ;;  %v1741_v33 = vmul.f32 -0.5, %v3345_v21  ;;  %v1134_v45 = vsub.f32 0.0, %v1006_v50  ;;  %v2985_v6 = vperm.slane %v2664_v52, %v4196_v26 }
 0x10c   :  { %v2982_v44 = vsel %vm2936_vm2, %v2981_v32, %v2980_v42  ;;  %3348 = vlog2.f32 %v1747_v48  ;;  %v1751_v47 = vadd.f32 1.0, %v1750_v25  ;;  %v873_v14 = vmin.f32 %v4517_v34, 0.0  ;;  %v161_v34 = vld [vmem:[%s6197_s0 + $0x2a0] sm:$0xff] }
 0x10d   :  { %v2984_v18 = vsel %vm2940_vm4, %v2983_v0, %v2982_v44  ;;  %3350 = vlog2.f32 %v1738_v5  ;;  %v878_v19 = vmin.f32 %v4541_v40, 0.0  ;;  %v1744_v58 = vand.u32 2147483647, %v3345_v21 }
 0x10e   :  { %vm6249_vm5 = vcmask 720512   ;;  %v1294_v29 = vmul.f32 1.442695, %v1134_v45  ;;  %v1133_v2 = vsub.f32 0.0, %v1005_v46  ;;  %vm4580_vm13 = vcmp.lt.f32.partialorder %v1753_v28, 0.0004427343  ;;  %v4586_v28 = vpop.xlane.xlu2 %568 }
 0x10f   :  { %v4575_v1 = vsel %vm6249_vm5, %v2985_v6, %v2984_v18  ;;  %v3347_v37 = vpop.eup %3346  ;;  %v1742_v10 = vadd.f32 1.0, %v1741_v33  ;;  %v1004_v42 = vand.u32 2147483647, %v4563_v39  ;;  %v446_v22 = vsub.f32 %v190_v59, %v318_v13  ;;  %v4589_v6 = vpop.xlane.xlu1 %565 }
 0x110   :  { %v1752_v36 = vmul.f32 %v3343_v8, %v1751_v47  ;;  %v1729_v54 = vadd.f32 1.0, %v3347_v37  ;;  %v1732_v52 = vmul.f32 -0.5, %v3347_v37  ;;  %3352 = vpow2.f32 %v1294_v29 }
 0x111   :  { %v1292_v30 = vmul.f32 1.442695, %v1133_v2  ;;  %v1132_v3 = vsub.f32 0.0, %v1004_v42  ;;  %v801_v50 = vsel %vm461_vm0, %v446_v22, 0.0  ;;  %v445_v0 = vsub.f32 %v189_v20, %v317_v57  ;;  %v4606_v22 = vpop.xlane.xlu0 %562  ;;  %v274_v42 = vld [vmem:[#allocation3 + $0x228] sm:$0xff] }
 0x112   :  { %v3349_v32 = vpop.eup %3348  ;;  %3354 = vlog2.f32 %v1729_v54  ;;  %v1733_v48 = vadd.f32 1.0, %v1732_v52  ;;  %v1735_v25 = vand.u32 2147483647, %v3347_v37  ;;  %802 = vadd.xlane.f32.xlu2 %v801_v50  ;;  %v431_v46 = vsub.f32 %v175_v62, %v303_v49 }
 0x113   :  { %v3351_v5 = vpop.eup %3350  ;;  %v1749_v33 = vmul.f32 0.6931472, %v3349_v32  ;;  %3356 = vpow2.f32 %v1292_v30  ;;  %v1290_v8 = vmul.f32 1.442695, %v1132_v3  ;;  %v798_v45 = vsel %vm461_vm0, %v445_v0, 0.0 }
 0x114   :  { %v1740_v44 = vmul.f32 0.6931472, %v3351_v5  ;;  %v1743_v47 = vmul.f32 %v3345_v21, %v1742_v10  ;;  %v877_v59 = vmin.f32 %v4548_v31, 0.0  ;;  %799 = vadd.xlane.f32.xlu1 %v798_v45  ;;  %v756_v13 = vsel %vm461_vm0, %v431_v46, 0.0 }
 0x115   :  { %v1755_v18 = vsel %vm4580_vm13, %v1752_v36, %v1749_v33  ;;  %vm1745_vm8 = vcmp.lt.f32.partialorder %v1744_v58, 0.0004427343  ;;  %3358 = vpow2.f32 %v1290_v8  ;;  %757 = vadd.xlane.f32.xlu0 %v756_v13  ;;  %v1009_v20 = vand.u32 2147483647, %v4586_v28 }
 0x116   :  { %v3353_v57 = vpop.eup %3352  ;;  %v4598_v29 = vsub.f32 %v875_v43, %v1755_v18  ;;  %v1746_v2 = vsel %vm1745_vm8, %v1743_v47, %v1740_v44  ;;  %v876_v21 = vmin.f32 %v4563_v39, 0.0  ;;  %v1008_v62 = vand.u32 2147483647, %v4589_v6  ;;  %v176_v44 = vld [vmem:[%s6197_s0 + $0x318] sm:$0xff]  ;;  %v290_v39 = vld [vmem:[#allocation3 + $0x2a8] sm:$0xff] }
 0x117   :  { %v1734_v10 = vmul.f32 %v3347_v37, %v1733_v48  ;;  %vm4602_vm5 = vcmp.lt.f32.partialorder %v1735_v25, 0.0004427343  ;;  %v1774_v58 = vadd.f32 1.0, %v3353_v57  ;;  %v1777_v17 = vmul.f32 -0.5, %v3353_v57  ;;  %v304_v47 = vld [vmem:[#allocation3 + $0x318] sm:$0xff] }
 0x118   :  { %v3355_v49 = vpop.eup %3354  ;;  %v2666_v63 = vsub.f32 %v874_v35, %v1746_v2  ;;  %v1780_v43 = vand.u32 2147483647, %v3353_v57  ;;  %v1137_v36 = vsub.f32 0.0, %v1009_v20  ;;  %v1136_v54 = vsub.f32 0.0, %v1008_v62 }
 0x119   :  { %v3357_v52 = vpop.eup %3356  ;;  %v1731_v30 = vmul.f32 0.6931472, %v3355_v49  ;;  %3360 = vlog2.f32 %v1774_v58  ;;  %v881_v37 = vmin.f32 %v4586_v28, 0.0  ;;  %v880_v3 = vmin.f32 %v4589_v6, 0.0 }
 0x11a   :  { %v2991_v50 = vperm.slane %v4598_v29, %v4240_v4  ;;  %v1778_v0 = vadd.f32 1.0, %v1777_v17  ;;  %v1765_v32 = vadd.f32 1.0, %v3357_v52  ;;  %v1007_v48 = vand.u32 2147483647, %v4606_v22 }
 0x11b   :  { %v4615_v25 = vpop.eup %3358  ;;  %v1737_v38 = vsel %vm4602_vm5, %v1734_v10, %v1731_v30  ;;  %v1768_v35 = vmul.f32 -0.5, %v3357_v52  ;;  %v1300_v46 = vmul.f32 1.442695, %v1137_v36  ;;  %v1298_v5 = vmul.f32 1.442695, %v1136_v54  ;;  %v146_v10 = vld [vmem:[%s6197_s0 + $0x228] sm:$0xff] }
 0x11c   :  { %v2989_v33 = vperm.slane %v2666_v63, %v4278_v61  ;;  %v2665_v8 = vsub.f32 %v873_v14, %v1737_v38  ;;  %vm4622_vm13 = vcmp.lt.f32.partialorder %v1780_v43, 0.0004427343  ;;  %3362 = vlog2.f32 %v1765_v32  ;;  %v289_v14 = vld [vmem:[#allocation3 + $0x2a0] sm:$0xff]  ;;  %v4646_v38 = vpop.xlane.xlu2 %577 }
 0x11d   :  { %v1771_v13 = vand.u32 2147483647, %v3357_v52  ;;  %v1756_v18 = vadd.f32 1.0, %v4615_v25  ;;  %v1759_v20 = vmul.f32 -0.5, %v4615_v25  ;;  %3364 = vpow2.f32 %v1300_v46 }
 0x11e   :  { %v2987_v29 = vperm.slane %v2665_v8, %v4186_v60  ;;  %v1779_v2 = vmul.f32 %v3353_v57, %v1778_v0  ;;  %3366 = vpow2.f32 %v1298_v5  ;;  %v1135_v62 = vsub.f32 0.0, %v1007_v48 }
 0x11f   :  { %v3361_v58 = vpop.eup %3360  ;;  %v1769_v17 = vadd.f32 1.0, %v1768_v35  ;;  %3368 = vlog2.f32 %v1756_v18  ;;  %v1760_v49 = vadd.f32 1.0, %v1759_v20  ;;  %v432_v63 = vsub.f32 %v176_v44, %v304_v47 }
 0x120   :  { %vm6256_vm8 = vcmask 786112   ;;  %v1776_v36 = vmul.f32 0.6931472, %v3361_v58  ;;  %v1296_v54 = vmul.f32 1.442695, %v1135_v62  ;;  %v417_v30 = vsub.f32 %v161_v34, %v289_v14 }
 0x121   :  { %v2988_v43 = vsel %vm6256_vm8, %v2987_v29, %v4575_v1  ;;  %vm4641_vm5 = vcmp.lt.f32.partialorder %v1771_v13, 0.0004427343  ;;  %v759_v32 = vsel %vm461_vm0, %v432_v63, 0.0  ;;  %v402_v48 = vsub.f32 %v146_v10, %v274_v42 }
 0x122   :  { %v2990_v57 = vsel %vm2952_vm9, %v2989_v33, %v2988_v43  ;;  %v3363_v35 = vpop.eup %3362  ;;  %v1762_v5 = vand.u32 2147483647, %v4615_v25  ;;  %3370 = vpow2.f32 %v1296_v54  ;;  %760 = vadd.xlane.f32.xlu2 %v759_v32  ;;  %v714_v1 = vsel %vm461_vm0, %v417_v30, 0.0  ;;  %v4665_v30 = vpop.xlane.xlu1 %574 }
 0x123   :  { %v2992_v46 = vsel %vm2956_vm12, %v2991_v50, %v2990_v57  ;;  %v3365_v8 = vpop.eup %3364  ;;  %v1767_v33 = vmul.f32 0.6931472, %v3363_v35  ;;  %v1770_v44 = vmul.f32 %v3357_v52, %v1769_v17  ;;  %v1761_v47 = vmul.f32 %v4615_v25, %v1760_v49  ;;  %715 = vadd.xlane.f32.xlu1 %v714_v1  ;;  %v4674_v32 = vpop.xlane.xlu0 %571 }
 0x124   :  { %v669_v13 = vsel %vm461_vm0, %v402_v48, 0.0  ;;  %v3367_v18 = vpop.eup %3366  ;;  %v1782_v20 = vsel %vm4622_vm13, %v1779_v2, %v1776_v36  ;;  %vm3183_vm8 = vcmask 1041409   ;;  %v1801_v50 = vadd.f32 1.0, %v3365_v8 }
 0x125   :  { %v1804_v34 = vmul.f32 -0.5, %v3365_v8  ;;  %670 = vadd.xlane.f32.xlu0 %v669_v13  ;;  %v1012_v14 = vand.u32 2147483647, %v4646_v38  ;;  %v3369_v29 = vpop.eup %3368  ;;  %v1773_v62 = vsel %vm4641_vm5, %v1770_v44, %v1767_v33  ;;  %v1807_v52 = vand.u32 2147483647, %v3365_v8 }
 0x126   :  { %v1792_v10 = vadd.f32 1.0, %v3367_v18  ;;  %v1795_v25 = vmul.f32 -0.5, %v3367_v18  ;;  %v2669_v42 = vsub.f32 %v877_v59, %v1773_v62  ;;  %v1758_v58 = vmul.f32 0.6931472, %v3369_v29  ;;  %v275_v62 = vld [vmem:[#allocation3 + $0x230] sm:$0xff] }
 0x127   :  { %3372 = vlog2.f32 %v1801_v50  ;;  %v1805_v45 = vadd.f32 1.0, %v1804_v34  ;;  %vm1763_vm13 = vcmp.lt.f32.partialorder %v1762_v5, 0.0004427343  ;;  %v879_v17 = vmin.f32 %v4606_v22, 0.0  ;;  %v162_v5 = vld [vmem:[%s6197_s0 + $0x2a8] sm:$0xff]  ;;  %v192_v22 = vld [vmem:[%s6197_s0 + $0x398] sm:$0xff] }
 0x128   :  { %3374 = vlog2.f32 %v1792_v10  ;;  %v1796_v2 = vadd.f32 1.0, %v1795_v25  ;;  %v3371_v49 = vpop.eup %3370  ;;  %v4663_v63 = vsub.f32 %v878_v19, %v1782_v20  ;;  %v1764_v43 = vsel %vm1763_vm13, %v1761_v47, %v1758_v58 }
 0x129   :  { %v1798_v36 = vand.u32 2147483647, %v3367_v18  ;;  %v1140_v54 = vsub.f32 0.0, %v1012_v14  ;;  %v2668_v31 = vsub.f32 %v876_v21, %v1764_v43  ;;  %vm4669_vm5 = vcmp.lt.f32.partialorder %v1807_v52, 0.0004427343  ;;  %v191_v52 = vld [vmem:[%s6197_s0 + $0x390] sm:$0xff] }
 0x12a   :  { %v1783_v57 = vadd.f32 1.0, %v3371_v49  ;;  %v884_v0 = vmin.f32 %v4646_v38, 0.0  ;;  %v2995_v40 = vperm.slane %v2669_v42, %v4326_v11  ;;  %v1806_v19 = vmul.f32 %v3365_v8, %v1805_v45  ;;  %v319_v45 = vld [vmem:[#allocation3 + $0x390] sm:$0xff]  ;;  %v4714_v28 = vpop.xlane.xlu1 %583 }
 0x12b   :  { %v1786_v48 = vmul.f32 -0.5, %v3371_v49  ;;  %v1306_v35 = vmul.f32 1.442695, %v1140_v54  ;;  %v2993_v21 = vperm.slane %v2668_v31, %v4215_v56  ;;  %v1797_v1 = vmul.f32 %v3367_v18, %v1796_v2  ;;  %v147_v18 = vld [vmem:[%s6197_s0 + $0x230] sm:$0xff] }
 0x12c   :  { %3376 = vlog2.f32 %v1783_v57  ;;  %v1011_v33 = vand.u32 2147483647, %v4665_v30  ;;  %vm4682_vm13 = vcmp.lt.f32.partialorder %v1798_v36, 0.0004427343  ;;  %v1010_v8 = vand.u32 2147483647, %v4674_v32 }
 0x12d   :  { %v3373_v44 = vpop.eup %3372  ;;  %v1787_v13 = vadd.f32 1.0, %v1786_v48  ;;  %3378 = vpow2.f32 %v1306_v35  ;;  %v2994_v50 = vsel %vm2960_vm3, %v2993_v21, %v2992_v46  ;;  %v418_v29 = vsub.f32 %v162_v5, %v290_v39 }
 0x12e   :  { %v3375_v20 = vpop.eup %3374  ;;  %v1803_v34 = vmul.f32 0.6931472, %v3373_v44  ;;  %v1139_v14 = vsub.f32 0.0, %v1011_v33  ;;  %v2996_v10 = vsel %vm2964_vm1, %v2995_v40, %v2994_v50  ;;  %v1789_v42 = vand.u32 2147483647, %v3371_v49  ;;  %v148_v50 = vld [vmem:[%s6197_s0 + $0x238] sm:$0xff] }
 0x12f   :  { %v1794_v25 = vmul.f32 0.6931472, %v3375_v20  ;;  %v1138_v58 = vsub.f32 0.0, %v1010_v8  ;;  %v4697_v46 = vsel %vm3183_vm8, %v2996_v10, %v4424_v24  ;;  %v717_v36 = vsel %vm461_vm0, %v418_v29, 0.0 }
 0x130   :  { %v1809_v2 = vsel %vm4669_vm5, %v1806_v19, %v1803_v34  ;;  %v1304_v43 = vmul.f32 1.442695, %v1139_v14  ;;  %v2997_v54 = vperm.slane %v4663_v63, %v4006_v23  ;;  %718 = vadd.xlane.f32.xlu2 %v717_v36  ;;  %v403_v40 = vsub.f32 %v147_v18, %v275_v62  ;;  %v4708_v19 = vpop.xlane.xlu2 %586  ;;  %v276_v34 = vld [vmem:[#allocation3 + $0x238] sm:$0xff] }
 0x131   :  { %v1800_v31 = vsel %vm4682_vm13, %v1797_v1, %v1794_v25  ;;  %v1302_v57 = vmul.f32 1.442695, %v1138_v58  ;;  %v2673_v24 = vsub.f32 %v881_v37, %v1809_v2  ;;  %v1788_v35 = vmul.f32 %v3371_v49, %v1787_v13 }
 0x132   :  { %v3377_v48 = vpop.eup %3376  ;;  %3380 = vpow2.f32 %v1304_v43  ;;  %v447_v59 = vsub.f32 %v191_v52, %v319_v45  ;;  %v2672_v39 = vsub.f32 %v880_v3, %v1800_v31  ;;  %v672_v21 = vsel %vm461_vm0, %v403_v40, 0.0  ;;  %v4719_v3 = vpop.xlane.xlu0 %580 }
 0x133   :  { %v3379_v5 = vpop.eup %3378  ;;  %v1785_v63 = vmul.f32 0.6931472, %v3377_v48  ;;  %3382 = vpow2.f32 %v1302_v57  ;;  %vm1790_vm8 = vcmp.lt.f32.partialorder %v1789_v42, 0.0004427343  ;;  %v883_v44 = vmin.f32 %v4665_v30, 0.0  ;;  %673 = vadd.xlane.f32.xlu1 %v672_v21 }
 0x134   :  { %v1828_v1 = vadd.f32 1.0, %v3379_v5  ;;  %v1831_v33 = vmul.f32 -0.5, %v3379_v5  ;;  %v882_v49 = vmin.f32 %v4674_v32, 0.0  ;;  %v804_v47 = vsel %vm461_vm0, %v447_v59, 0.0 }
 0x135   :  { %v1791_v37 = vsel %vm1790_vm8, %v1788_v35, %v1785_v63  ;;  %v1015_v6 = vand.u32 2147483647, %v4708_v19  ;;  %v3002_v13 = vperm.slane %v2673_v24, %v4054_v7  ;;  %805 = vadd.xlane.f32.xlu0 %v804_v47  ;;  %v887_v20 = vmin.f32 %v4708_v19, 0.0 }
 0x136   :  { %v2671_v8 = vsub.f32 %v879_v17, %v1791_v37  ;;  %3384 = vlog2.f32 %v1828_v1  ;;  %v3000_v14 = vperm.slane %v2672_v39, %v4036_v53  ;;  %v1834_v29 = vand.u32 2147483647, %v3379_v5  ;;  %v320_v17 = vld [vmem:[#allocation3 + $0x398] sm:$0xff]  ;;  %v305_v37 = vld [vmem:[#allocation3 + $0x320] sm:$0xff] }
 0x137   :  { %v1143_v18 = vsub.f32 0.0, %v1015_v6  ;;  %v886_v62 = vmin.f32 %v4714_v28, 0.0  ;;  %v1832_v25 = vadd.f32 1.0, %v1831_v33  ;;  %v1014_v42 = vand.u32 2147483647, %v4714_v28 }
 0x138   :  { %v3381_v52 = vpop.eup %3380  ;;  %v2998_v10 = vperm.slane %v2671_v8, %v4060_v12  ;;  %v1013_v58 = vand.u32 2147483647, %v4719_v3  ;;  %v404_v31 = vsub.f32 %v148_v50, %v276_v34  ;;  %vm6263_vm5 = vcmask 130112   ;;  %v4748_v50 = vpop.xlane.xlu2 %595 }
 0x139   :  { %v3383_v45 = vpop.eup %3382  ;;  %v1819_v2 = vadd.f32 1.0, %v3381_v52  ;;  %v1822_v43 = vmul.f32 -0.5, %v3381_v52  ;;  %v1312_v36 = vmul.f32 1.442695, %v1143_v18  ;;  %v448_v24 = vsub.f32 %v192_v22, %v320_v17  ;;  %v193_v18 = vld [vmem:[%s6197_s0 + $0x3a0] sm:$0xff] }
 0x13a   :  { %v2999_v57 = vsel %vm6263_vm5, %v2998_v10, %v2997_v54  ;;  %v1810_v40 = vadd.f32 1.0, %v3383_v45  ;;  %v1813_v48 = vmul.f32 -0.5, %v3383_v45  ;;  %vm4738_vm13 = vcmp.lt.f32.partialorder %v1834_v29, 0.0004427343  ;;  %v177_v54 = vld [vmem:[%s6197_s0 + $0x320] sm:$0xff]  ;;  %v4752_v29 = vpop.xlane.xlu1 %592 }
 0x13b   :  { %v3001_v35 = vsel %vm2912_vm6, %v3000_v14, %v2999_v57  ;;  %3386 = vlog2.f32 %v1819_v2  ;;  %v1825_v39 = vand.u32 2147483647, %v3381_v52  ;;  %v1833_v21 = vmul.f32 %v3379_v5, %v1832_v25 }
 0x13c   :  { %v3385_v63 = vpop.eup %3384  ;;  %v4743_v1 = vsel %vm2916_vm7, %v3002_v13, %v3001_v35  ;;  %3388 = vlog2.f32 %v1810_v40  ;;  %v1816_v33 = vand.u32 2147483647, %v3383_v45  ;;  %v1823_v6 = vadd.f32 1.0, %v1822_v43 }
 0x13d   :  { %v1830_v47 = vmul.f32 0.6931472, %v3385_v63  ;;  %3390 = vpow2.f32 %v1312_v36  ;;  %v1142_v8 = vsub.f32 0.0, %v1014_v42  ;;  %v1814_v34 = vadd.f32 1.0, %v1813_v48  ;;  %v321_v42 = vld [vmem:[#allocation3 + $0x3a0] sm:$0xff] }
 0x13e   :  { %v1141_v14 = vsub.f32 0.0, %v1013_v58  ;;  %v675_v5 = vsel %vm461_vm0, %v404_v31, 0.0  ;;  %v807_v13 = vsel %vm461_vm0, %v448_v24, 0.0  ;;  %vm4757_vm8 = vcmp.lt.f32.partialorder %v1825_v39, 0.0004427343  ;;  %v4769_v31 = vpop.xlane.xlu0 %589 }
 0x13f   :  { %v1310_v17 = vmul.f32 1.442695, %v1142_v8  ;;  %v885_v10 = vmin.f32 %v4719_v3, 0.0  ;;  %676 = vadd.xlane.f32.xlu2 %v675_v5  ;;  %808 = vadd.xlane.f32.xlu1 %v807_v13  ;;  %v433_v25 = vsub.f32 %v177_v54, %v305_v37  ;;  %v1836_v58 = vsel %vm4738_vm13, %v1833_v21, %v1830_v47  ;;  %v307_v3 = vld [vmem:[#allocation3 + $0x330] sm:$0xff] }
 0x140   :  { %vm4764_vm5 = vcmp.lt.f32.partialorder %v1816_v33, 0.0004427343  ;;  %v1308_v43 = vmul.f32 1.442695, %v1141_v14  ;;  %v1018_v36 = vand.u32 2147483647, %v4748_v50  ;;  %v1824_v40 = vmul.f32 %v3381_v52, %v1823_v6 }
 0x141   :  { %v3387_v57 = vpop.eup %3386  ;;  %3392 = vpow2.f32 %v1310_v17  ;;  %v762_v48 = vsel %vm461_vm0, %v433_v25, 0.0  ;;  %v1017_v24 = vand.u32 2147483647, %v4752_v29  ;;  %v1815_v59 = vmul.f32 %v3383_v45, %v1814_v34 }
 0x142   :  { %v3389_v35 = vpop.eup %3388  ;;  %v1821_v39 = vmul.f32 0.6931472, %v3387_v57  ;;  %3394 = vpow2.f32 %v1308_v43  ;;  %763 = vadd.xlane.f32.xlu0 %v762_v48  ;;  %v1146_v63 = vsub.f32 0.0, %v1018_v36  ;;  %v2676_v33 = vsub.f32 %v884_v0, %v1836_v58 }
 0x143   :  { %v3391_v21 = vpop.eup %3390  ;;  %v1812_v54 = vmul.f32 0.6931472, %v3389_v35  ;;  %v1016_v37 = vand.u32 2147483647, %v4769_v31  ;;  %v449_v47 = vsub.f32 %v193_v18, %v321_v42  ;;  %v1145_v14 = vsub.f32 0.0, %v1017_v24  ;;  %v178_v35 = vld [vmem:[%s6197_s0 + $0x328] sm:$0xff] }
 0x144   :  { %v1827_v52 = vsel %vm4757_vm8, %v1824_v40, %v1821_v39  ;;  %v1855_v6 = vadd.f32 1.0, %v3391_v21  ;;  %v1858_v8 = vmul.f32 -0.5, %v3391_v21  ;;  %v1861_v5 = vand.u32 2147483647, %v3391_v21  ;;  %v306_v39 = vld [vmem:[#allocation3 + $0x328] sm:$0xff] }
 0x145   :  { %v2675_v45 = vsub.f32 %v883_v44, %v1827_v52  ;;  %v1818_v34 = vsel %vm4764_vm5, %v1815_v59, %v1812_v54  ;;  %v1318_v13 = vmul.f32 1.442695, %v1146_v63  ;;  %v890_v18 = vmin.f32 %v4748_v50, 0.0  ;;  %v163_v54 = vld [vmem:[%s6197_s0 + $0x2b0] sm:$0xff] }
 0x146   :  { %v2674_v38 = vsub.f32 %v882_v49, %v1818_v34  ;;  %3396 = vlog2.f32 %v1855_v6  ;;  %v1859_v0 = vadd.f32 1.0, %v1858_v8  ;;  %v1144_v25 = vsub.f32 0.0, %v1016_v37  ;;  %v291_v37 = vld [vmem:[#allocation3 + $0x2b0] sm:$0xff]  ;;  %v4805_v6 = vpop.xlane.xlu2 %604 }
 0x147   :  { %v3393_v22 = vpop.eup %3392  ;;  %v3006_v17 = vperm.slane %v2675_v45, %v4040_v55  ;;  %3398 = vpow2.f32 %v1318_v13  ;;  %v810_v30 = vsel %vm461_vm0, %v449_v47, 0.0  ;;  %v1316_v43 = vmul.f32 1.442695, %v1145_v14 }
 0x148   :  { %v3395_v44 = vpop.eup %3394  ;;  %v3004_v42 = vperm.slane %v2674_v38, %v4028_v41  ;;  %v1846_v58 = vadd.f32 1.0, %v3393_v22  ;;  %v1849_v2 = vmul.f32 -0.5, %v3393_v22  ;;  %811 = vadd.xlane.f32.xlu2 %v810_v30  ;;  %v3008_v32 = vperm.slane %v2676_v33, %v4139_v27 }
 0x149   :  { %vm4789_vm13 = vcmp.lt.f32.partialorder %v1861_v5, 0.0004427343  ;;  %v1837_v36 = vadd.f32 1.0, %v3395_v44  ;;  %v1840_v57 = vmul.f32 -0.5, %v3395_v44  ;;  %v1860_v48 = vmul.f32 %v3391_v21, %v1859_v0 }
 0x14a   :  { %v3005_v40 = vsel %vm2920_vm10, %v3004_v42, %v4743_v1  ;;  %3400 = vlog2.f32 %v1846_v58  ;;  %v1314_v24 = vmul.f32 1.442695, %v1144_v25  ;;  %v1852_v63 = vand.u32 2147483647, %v3393_v22  ;;  %v4817_v58 = vpop.xlane.xlu1 %601  ;;  %v4844_v25 = vpop.xlane.xlu0 %598 }
 0x14b   :  { %v3007_v59 = vsel %vm2924_vm11, %v3006_v17, %v3005_v40  ;;  %3402 = vlog2.f32 %v1837_v36  ;;  %v1843_v33 = vand.u32 2147483647, %v3395_v44  ;;  %v1850_v1 = vadd.f32 1.0, %v1849_v2  ;;  %v277_v36 = vld [vmem:[#allocation3 + $0x240] sm:$0xff] }
 0x14c   :  { %v3397_v47 = vpop.eup %3396  ;;  %v4803_v21 = vsel %vm2928_vm14, %v3008_v32, %v3007_v59  ;;  %v1841_v52 = vadd.f32 1.0, %v1840_v57  ;;  %3404 = vpow2.f32 %v1316_v43  ;;  %v889_v45 = vmin.f32 %v4752_v29, 0.0 }
 0x14d   :  { %v3399_v8 = vpop.eup %3398  ;;  %v1857_v14 = vmul.f32 0.6931472, %v3397_v47  ;;  %3406 = vpow2.f32 %v1314_v24  ;;  %v434_v34 = vsub.f32 %v178_v35, %v306_v39  ;;  %v888_v38 = vmin.f32 %v4769_v31, 0.0 }
 0x14e   :  { %v1882_v5 = vadd.f32 1.0, %v3399_v8  ;;  %v1885_v13 = vmul.f32 -0.5, %v3399_v8  ;;  %v419_v0 = vsub.f32 %v163_v54, %v291_v37  ;;  %vm4811_vm8 = vcmp.lt.f32.partialorder %v1852_v63, 0.0004427343 }
 0x14f   :  { %v1863_v17 = vsel %vm4789_vm13, %v1860_v48, %v1857_v14  ;;  %v765_v30 = vsel %vm461_vm0, %v434_v34, 0.0  ;;  %v1021_v42 = vand.u32 2147483647, %v4805_v6  ;;  %v1851_v43 = vmul.f32 %v3393_v22, %v1850_v1 }
 0x150   :  { %v3401_v2 = vpop.eup %3400  ;;  %v1842_v32 = vmul.f32 %v3395_v44, %v1841_v52  ;;  %vm4819_vm5 = vcmp.lt.f32.partialorder %v1843_v33, 0.0004427343  ;;  %3408 = vlog2.f32 %v1882_v5  ;;  %766 = vadd.xlane.f32.xlu1 %v765_v30  ;;  %v2679_v57 = vsub.f32 %v887_v20, %v1863_v17  ;;  %v292_v30 = vld [vmem:[#allocation3 + $0x2b8] sm:$0xff] }
 0x151   :  { %v3403_v49 = vpop.eup %3402  ;;  %v1848_v40 = vmul.f32 0.6931472, %v3401_v2  ;;  %v1888_v48 = vand.u32 2147483647, %v3399_v8  ;;  %v720_v24 = vsel %vm461_vm0, %v419_v0, 0.0  ;;  %v1886_v59 = vadd.f32 1.0, %v1885_v13 }
 0x152   :  { %v3405_v35 = vpop.eup %3404  ;;  %v1839_v39 = vmul.f32 0.6931472, %v3403_v49  ;;  %721 = vadd.xlane.f32.xlu0 %v720_v24  ;;  %v1149_v22 = vsub.f32 0.0, %v1021_v42  ;;  %v1020_v44 = vand.u32 2147483647, %v4817_v58  ;;  %v893_v5 = vmin.f32 %v4805_v6, 0.0 }
 0x153   :  { %v3407_v63 = vpop.eup %3406  ;;  %v1854_v33 = vsel %vm4811_vm8, %v1851_v43, %v1848_v40  ;;  %v1873_v54 = vadd.f32 1.0, %v3405_v35  ;;  %v1876_v37 = vmul.f32 -0.5, %v3405_v35  ;;  %v1879_v47 = vand.u32 2147483647, %v3405_v35  ;;  %v179_v13 = vld [vmem:[%s6197_s0 + $0x330] sm:$0xff] }
 0x154   :  { %v2678_v19 = vsub.f32 %v886_v62, %v1854_v33  ;;  %v1845_v20 = vsel %vm4819_vm5, %v1842_v32, %v1839_v39  ;;  %v1864_v1 = vadd.f32 1.0, %v3407_v63  ;;  %v1867_v52 = vmul.f32 -0.5, %v3407_v63 }
 0x155   :  { %v2677_v14 = vsub.f32 %v885_v10, %v1845_v20  ;;  %3410 = vlog2.f32 %v1873_v54  ;;  %v1877_v34 = vadd.f32 1.0, %v1876_v37  ;;  %v1887_v62 = vmul.f32 %v3399_v8, %v1886_v59  ;;  %v164_v10 = vld [vmem:[%s6197_s0 + $0x2b8] sm:$0xff]  ;;  %v149_v8 = vld [vmem:[%s6197_s0 + $0x240] sm:$0xff] }
 0x156   :  { %v3409_v0 = vpop.eup %3408  ;;  %v3012_v28 = vperm.slane %v2678_v19, %v4079_v51  ;;  %vm4840_vm13 = vcmp.lt.f32.partialorder %v1888_v48, 0.0004427343  ;;  %3412 = vlog2.f32 %v1864_v1  ;;  %v3014_v42 = vperm.slane %v2679_v57, %v4207_v9 }
 0x157   :  { %v3010_v2 = vperm.slane %v2677_v14, %v4106_v16  ;;  %v1884_v43 = vmul.f32 0.6931472, %v3409_v0  ;;  %v1324_v32 = vmul.f32 1.442695, %v1149_v22  ;;  %vm4854_vm8 = vcmp.lt.f32.partialorder %v1879_v47, 0.0004427343  ;;  %v4868_v0 = vpop.xlane.xlu1 %610 }
 0x158   :  { %v1868_v40 = vadd.f32 1.0, %v1867_v52  ;;  %v1870_v48 = vand.u32 2147483647, %v3407_v63  ;;  %v1148_v24 = vsub.f32 0.0, %v1020_v44  ;;  %v1878_v57 = vmul.f32 %v3405_v35, %v1877_v34  ;;  %v4865_v52 = vpop.xlane.xlu2 %613 }
 0x159   :  { %v3011_v39 = vsel %vm2932_vm15, %v3010_v2, %v4803_v21  ;;  %3414 = vpow2.f32 %v1324_v32  ;;  %v1019_v59 = vand.u32 2147483647, %v4844_v25  ;;  %v1890_v33 = vsel %vm4840_vm13, %v1887_v62, %v1884_v43 }
 0x15a   :  { %v3013_v22 = vsel %vm2936_vm2, %v3012_v28, %v3011_v39  ;;  %v1322_v54 = vmul.f32 1.442695, %v1148_v24  ;;  %v435_v37 = vsub.f32 %v179_v13, %v307_v3  ;;  %v420_v1 = vsub.f32 %v164_v10, %v292_v30  ;;  %v4884_v24 = vpop.xlane.xlu0 %607 }
 0x15b   :  { %v3411_v47 = vpop.eup %3410  ;;  %v3015_v19 = vsel %vm2940_vm4, %v3014_v42, %v3013_v22  ;;  %v1147_v20 = vsub.f32 0.0, %v1019_v59  ;;  %v405_v44 = vsub.f32 %v149_v8, %v277_v36  ;;  %v1869_v14 = vmul.f32 %v3407_v63, %v1868_v40 }
 0x15c   :  { %v3413_v21 = vpop.eup %3412  ;;  %v1875_v35 = vmul.f32 0.6931472, %v3411_v47  ;;  %3416 = vpow2.f32 %v1322_v54  ;;  %v768_v34 = vsel %vm461_vm0, %v435_v37, 0.0  ;;  %v723_v13 = vsel %vm461_vm0, %v420_v1, 0.0  ;;  %v293_v1 = vld [vmem:[#allocation3 + $0x2c0] sm:$0xff] }
 0x15d   :  { %v1866_v28 = vmul.f32 0.6931472, %v3413_v21  ;;  %v1320_v62 = vmul.f32 1.442695, %v1147_v20  ;;  %769 = vadd.xlane.f32.xlu2 %v768_v34  ;;  %v678_v17 = vsel %vm461_vm0, %v405_v44, 0.0  ;;  %v2682_v3 = vsub.f32 %v890_v18, %v1890_v33  ;;  %724 = vadd.xlane.f32.xlu1 %v723_v13  ;;  %v165_v33 = vld [vmem:[%s6197_s0 + $0x2c0] sm:$0xff] }
 0x15e   :  { %v1881_v10 = vsel %vm4854_vm8, %v1878_v57, %v1875_v35  ;;  %vm1871_vm5 = vcmp.lt.f32.partialorder %v1870_v48, 0.0004427343  ;;  %679 = vadd.xlane.f32.xlu0 %v678_v17  ;;  %v1024_v63 = vand.u32 2147483647, %v4865_v52  ;;  %v1023_v43 = vand.u32 2147483647, %v4868_v0 }
 0x15f   :  { %v3415_v30 = vpop.eup %3414  ;;  %v2681_v42 = vsub.f32 %v889_v45, %v1881_v10  ;;  %v1872_v2 = vsel %vm1871_vm5, %v1869_v14, %v1866_v28  ;;  %3418 = vpow2.f32 %v1320_v62  ;;  %v892_v49 = vmin.f32 %v4817_v58, 0.0  ;;  %v150_v34 = vld [vmem:[%s6197_s0 + $0x248] sm:$0xff] }
 0x160   :  { %v2680_v50 = vsub.f32 %v888_v38, %v1872_v2  ;;  %v1909_v18 = vadd.f32 1.0, %v3415_v30  ;;  %v1912_v32 = vmul.f32 -0.5, %v3415_v30  ;;  %v1915_v8 = vand.u32 2147483647, %v3415_v30  ;;  %v322_v2 = vld [vmem:[#allocation3 + $0x3a8] sm:$0xff] }
 0x161   :  { %v3018_v36 = vperm.slane %v2681_v42, %v4186_v60  ;;  %v1152_v40 = vsub.f32 0.0, %v1024_v63  ;;  %v1151_v48 = vsub.f32 0.0, %v1023_v43  ;;  %v891_v57 = vmin.f32 %v4844_v25, 0.0  ;;  %v194_v42 = vld [vmem:[%s6197_s0 + $0x3a8] sm:$0xff] }
 0x162   :  { %v3417_v29 = vpop.eup %3416  ;;  %v3016_v45 = vperm.slane %v2680_v50, %v4196_v26  ;;  %3420 = vlog2.f32 %v1909_v18  ;;  %v1913_v39 = vadd.f32 1.0, %v1912_v32  ;;  %v3020_v31 = vperm.slane %v2682_v3, %v4278_v61 }
 0x163   :  { %v1900_v38 = vadd.f32 1.0, %v3417_v29  ;;  %v1903_v59 = vmul.f32 -0.5, %v3417_v29  ;;  %v1330_v22 = vmul.f32 1.442695, %v1152_v40  ;;  %vm6280_vm13 = vcmask 720512  }
 0x164   :  { %v3017_v54 = vsel %vm6280_vm13, %v3016_v45, %v3015_v19  ;;  %vm4893_vm8 = vcmp.lt.f32.partialorder %v1915_v8, 0.0004427343  ;;  %v896_v47 = vmin.f32 %v4865_v52, 0.0  ;;  %v1022_v20 = vand.u32 2147483647, %v4884_v24  ;;  %v278_v19 = vld [vmem:[#allocation3 + $0x248] sm:$0xff] }
 0x165   :  { %v3419_v44 = vpop.eup %3418  ;;  %vm6283_vm5 = vcmask 786112   ;;  %3422 = vlog2.f32 %v1900_v38  ;;  %v1906_v35 = vand.u32 2147483647, %v3417_v29  ;;  %v1328_v14 = vmul.f32 1.442695, %v1151_v48  ;;  %v4915_v38 = vpop.xlane.xlu1 %619 }
 0x166   :  { %v3019_v21 = vsel %vm6283_vm5, %v3018_v36, %v3017_v54  ;;  %v1914_v28 = vmul.f32 %v3415_v30, %v1913_v39  ;;  %v1891_v13 = vadd.f32 1.0, %v3419_v44  ;;  %v1894_v17 = vmul.f32 -0.5, %v3419_v44  ;;  %v4909_v30 = vpop.xlane.xlu2 %622 }
 0x167   :  { %v4904_v62 = vsel %vm2952_vm9, %v3020_v31, %v3019_v21  ;;  %v1904_v3 = vadd.f32 1.0, %v1903_v59  ;;  %3424 = vpow2.f32 %v1330_v22  ;;  %v1150_v10 = vsub.f32 0.0, %v1022_v20 }
 0x168   :  { %v421_v63 = vsub.f32 %v165_v33, %v293_v1  ;;  %v3421_v43 = vpop.eup %3420  ;;  %3426 = vlog2.f32 %v1891_v13  ;;  %v1895_v50 = vadd.f32 1.0, %v1894_v17  ;;  %v1897_v18 = vand.u32 2147483647, %v3419_v44  ;;  %v195_v33 = vld [vmem:[%s6197_s0 + $0x3b0] sm:$0xff] }
 0x169   :  { %v406_v32 = vsub.f32 %v150_v34, %v278_v19  ;;  %v1911_v8 = vmul.f32 0.6931472, %v3421_v43  ;;  %3428 = vpow2.f32 %v1328_v14  ;;  %v1326_v36 = vmul.f32 1.442695, %v1150_v10 }
 0x16a   :  { %v726_v40 = vsel %vm461_vm0, %v421_v63, 0.0  ;;  %v895_v48 = vmin.f32 %v4868_v0, 0.0  ;;  %v894_v45 = vmin.f32 %v4884_v24, 0.0  ;;  %v450_v31 = vsub.f32 %v194_v42, %v322_v2  ;;  %v4935_v63 = vpop.xlane.xlu0 %616  ;;  %v279_v42 = vld [vmem:[#allocation3 + $0x250] sm:$0xff] }
 0x16b   :  { %727 = vadd.xlane.f32.xlu2 %v726_v40  ;;  %v681_v39 = vsel %vm461_vm0, %v406_v32, 0.0  ;;  %v3423_v59 = vpop.eup %3422  ;;  %v1917_v22 = vsel %vm4893_vm8, %v1914_v28, %v1911_v8  ;;  %vm4919_vm13 = vcmp.lt.f32.partialorder %v1906_v35, 0.0004427343  ;;  %3430 = vpow2.f32 %v1326_v36 }
 0x16c   :  { %682 = vadd.xlane.f32.xlu1 %v681_v39  ;;  %v1027_v54 = vand.u32 2147483647, %v4909_v30  ;;  %v1902_v20 = vmul.f32 0.6931472, %v3423_v59  ;;  %v1905_v1 = vmul.f32 %v3417_v29, %v1904_v3  ;;  %vm4924_vm5 = vcmp.lt.f32.partialorder %v1897_v18, 0.0004427343 }
 0x16d   :  { %v813_v14 = vsel %vm461_vm0, %v450_v31, 0.0  ;;  %v3425_v34 = vpop.eup %3424  ;;  %v1896_v19 = vmul.f32 %v3419_v44, %v1895_v50  ;;  %v899_v37 = vmin.f32 %v4909_v30, 0.0  ;;  %v898_v28 = vmin.f32 %v4915_v38, 0.0  ;;  %v151_v44 = vld [vmem:[%s6197_s0 + $0x250] sm:$0xff] }
 0x16e   :  { %814 = vadd.xlane.f32.xlu0 %v813_v14  ;;  %v1155_v35 = vsub.f32 0.0, %v1027_v54  ;;  %v3427_v13 = vpop.eup %3426  ;;  %v2685_v17 = vsub.f32 %v893_v5, %v1917_v22  ;;  %v1908_v29 = vsel %vm4919_vm13, %v1905_v1, %v1902_v20  ;;  %v1936_v3 = vadd.f32 1.0, %v3425_v34  ;;  %v323_v54 = vld [vmem:[#allocation3 + $0x3b0] sm:$0xff] }
 0x16f   :  { %v1939_v10 = vmul.f32 -0.5, %v3425_v34  ;;  %v3429_v2 = vpop.eup %3428  ;;  %v2684_v43 = vsub.f32 %v892_v49, %v1908_v29  ;;  %v1893_v50 = vmul.f32 0.6931472, %v3427_v13  ;;  %v1942_v18 = vand.u32 2147483647, %v3425_v34  ;;  %v180_v29 = vld [vmem:[%s6197_s0 + $0x338] sm:$0xff] }
 0x170   :  { %v1026_v6 = vand.u32 2147483647, %v4915_v38  ;;  %3432 = vlog2.f32 %v1936_v3  ;;  %v1927_v32 = vadd.f32 1.0, %v3429_v2  ;;  %v1336_v8 = vmul.f32 1.442695, %v1155_v35  ;;  %v308_v3 = vld [vmem:[#allocation3 + $0x338] sm:$0xff] }
 0x171   :  { %v1940_v5 = vadd.f32 1.0, %v1939_v10  ;;  %v3431_v36 = vpop.eup %3430  ;;  %v1899_v40 = vsel %vm4924_vm5, %v1896_v19, %v1893_v50  ;;  %v1930_v39 = vmul.f32 -0.5, %v3429_v2  ;;  %v1025_v31 = vand.u32 2147483647, %v4935_v63  ;;  %v182_v38 = vld [vmem:[%s6197_s0 + $0x348] sm:$0xff] }
 0x172   :  { %v407_v59 = vsub.f32 %v151_v44, %v279_v42  ;;  %v3026_v22 = vperm.slane %v2685_v17, %v4326_v11  ;;  %v3024_v58 = vperm.slane %v2684_v43, %v4215_v56  ;;  %v2683_v49 = vsub.f32 %v891_v57, %v1899_v40 }
 0x173   :  { %3434 = vlog2.f32 %v1927_v32  ;;  %vm4953_vm8 = vcmp.lt.f32.partialorder %v1942_v18, 0.0004427343  ;;  %v1933_v1 = vand.u32 2147483647, %v3429_v2  ;;  %v1918_v21 = vadd.f32 1.0, %v3431_v36  ;;  %v4965_v32 = vpop.xlane.xlu2 %631 }
 0x174   :  { %v1921_v14 = vmul.f32 -0.5, %v3431_v36  ;;  %v3022_v19 = vperm.slane %v2683_v49, %v4240_v4  ;;  %v1941_v35 = vmul.f32 %v3425_v34, %v1940_v5  ;;  %3436 = vpow2.f32 %v1336_v8 }
 0x175   :  { %v1154_v13 = vsub.f32 0.0, %v1026_v6  ;;  %v1931_v25 = vadd.f32 1.0, %v1930_v39  ;;  %3438 = vlog2.f32 %v1918_v21  ;;  %v1924_v57 = vand.u32 2147483647, %v3431_v36  ;;  %v4976_v21 = vpop.xlane.xlu1 %628 }
 0x176   :  { %v1153_v17 = vsub.f32 0.0, %v1025_v31  ;;  %v3433_v10 = vpop.eup %3432  ;;  %v3023_v44 = vsel %vm2956_vm12, %v3022_v19, %v4904_v62  ;;  %v684_v43 = vsel %vm461_vm0, %v407_v59, 0.0  ;;  %v451_v50 = vsub.f32 %v195_v33, %v323_v54 }
 0x177   :  { %v1334_v42 = vmul.f32 1.442695, %v1154_v13  ;;  %v3025_v34 = vsel %vm2960_vm3, %v3024_v58, %v3023_v44  ;;  %v1938_v18 = vmul.f32 0.6931472, %v3433_v10  ;;  %v1922_v6 = vadd.f32 1.0, %v1921_v14  ;;  %685 = vadd.xlane.f32.xlu2 %v684_v43 }
 0x178   :  { %v1332_v5 = vmul.f32 1.442695, %v1153_v17  ;;  %v4968_v40 = vsel %vm2964_vm1, %v3026_v22, %v3025_v34  ;;  %v816_v39 = vsel %vm461_vm0, %v451_v50, 0.0  ;;  %v436_v62 = vsub.f32 %v180_v29, %v308_v3 }
 0x179   :  { %v3435_v8 = vpop.eup %3434  ;;  %3440 = vpow2.f32 %v1334_v42  ;;  %v1944_v31 = vsel %vm4953_vm8, %v1941_v35, %v1938_v18  ;;  %v1932_v49 = vmul.f32 %v3429_v2, %v1931_v25  ;;  %817 = vadd.xlane.f32.xlu1 %v816_v39  ;;  %vm1934_vm13 = vcmp.lt.f32.partialorder %v1933_v1, 0.0004427343 }
 0x17a   :  { %v1929_v59 = vmul.f32 0.6931472, %v3435_v8  ;;  %3442 = vpow2.f32 %v1332_v5  ;;  %v3437_v58 = vpop.eup %3436  ;;  %v897_v33 = vmin.f32 %v4935_v63, 0.0  ;;  %v771_v54 = vsel %vm461_vm0, %v436_v62, 0.0  ;;  %v196_v5 = vld [vmem:[%s6197_s0 + $0x3b8] sm:$0xff]  ;;  %v310_v63 = vld [vmem:[#allocation3 + $0x348] sm:$0xff] }
 0x17b   :  { %v1030_v22 = vand.u32 2147483647, %v4965_v32  ;;  %v3439_v14 = vpop.eup %3438  ;;  %v1923_v13 = vmul.f32 %v3431_v36, %v1922_v6  ;;  %v1963_v17 = vadd.f32 1.0, %v3437_v58  ;;  %v1966_v20 = vmul.f32 -0.5, %v3437_v58  ;;  %772 = vadd.xlane.f32.xlu0 %v771_v54  ;;  %v324_v62 = vld [vmem:[#allocation3 + $0x3b8] sm:$0xff] }
 0x17c   :  { %v1935_v19 = vsel %vm1934_vm13, %v1932_v49, %v1929_v59  ;;  %v2688_v2 = vsub.f32 %v896_v47, %v1944_v31  ;;  %v1920_v35 = vmul.f32 0.6931472, %v3439_v14  ;;  %vm1925_vm5 = vcmp.lt.f32.partialorder %v1924_v57, 0.0004427343  ;;  %v181_v31 = vld [vmem:[%s6197_s0 + $0x340] sm:$0xff]  ;;  %v166_v14 = vld [vmem:[%s6197_s0 + $0x2c8] sm:$0xff] }
 0x17d   :  { %v2687_v1 = vsub.f32 %v895_v48, %v1935_v19  ;;  %v1158_v25 = vsub.f32 0.0, %v1030_v22  ;;  %3444 = vlog2.f32 %v1963_v17  ;;  %v1969_v29 = vand.u32 2147483647, %v3437_v58  ;;  %v309_v59 = vld [vmem:[#allocation3 + $0x340] sm:$0xff]  ;;  %v294_v19 = vld [vmem:[#allocation3 + $0x2c8] sm:$0xff] }
 0x17e   :  { %v1029_v3 = vand.u32 2147483647, %v4976_v21  ;;  %v1926_v36 = vsel %vm1925_vm5, %v1923_v13, %v1920_v35  ;;  %v1967_v42 = vadd.f32 1.0, %v1966_v20  ;;  %v902_v43 = vmin.f32 %v4965_v32, 0.0 }
 0x17f   :  { %v3441_v10 = vpop.eup %3440  ;;  %v3029_v44 = vperm.slane %v2687_v1, %v4060_v12  ;;  %v2686_v52 = vsub.f32 %v894_v45, %v1926_v36  ;;  %v1342_v48 = vmul.f32 1.442695, %v1158_v25  ;;  %v3031_v57 = vperm.slane %v2688_v2, %v4036_v53  ;;  %v4997_v45 = vpop.xlane.xlu0 %625 }
 0x180   :  { %v3443_v50 = vpop.eup %3442  ;;  %v1954_v0 = vadd.f32 1.0, %v3441_v10  ;;  %v1957_v47 = vmul.f32 -0.5, %v3441_v10  ;;  %v901_v6 = vmin.f32 %v4976_v21, 0.0  ;;  %vm4993_vm8 = vcmp.lt.f32.partialorder %v1969_v29, 0.0004427343  ;;  %v5006_v1 = vpop.xlane.xlu2 %640 }
 0x181   :  { %v1945_v34 = vadd.f32 1.0, %v3443_v50  ;;  %v1948_v18 = vmul.f32 -0.5, %v3443_v50  ;;  %v3028_v8 = vperm.slane %v2686_v52, %v4006_v23  ;;  %v1157_v24 = vsub.f32 0.0, %v1029_v3 }
 0x182   :  { %3446 = vlog2.f32 %v1954_v0  ;;  %v1968_v49 = vmul.f32 %v3437_v58, %v1967_v42  ;;  %v1960_v54 = vand.u32 2147483647, %v3441_v10  ;;  %v1951_v22 = vand.u32 2147483647, %v3443_v50 }
 0x183   :  { %3448 = vlog2.f32 %v1945_v34  ;;  %v3445_v13 = vpop.eup %3444  ;;  %vm6292_vm13 = vcmask 130112   ;;  %v1958_v20 = vadd.f32 1.0, %v1957_v47  ;;  %v1340_v2 = vmul.f32 1.442695, %v1157_v24  ;;  %v152_v34 = vld [vmem:[%s6197_s0 + $0x258] sm:$0xff] }
 0x184   :  { %v3030_v17 = vsel %vm6292_vm13, %v3029_v44, %v3028_v8  ;;  %3450 = vpow2.f32 %v1342_v48  ;;  %v1965_v35 = vmul.f32 0.6931472, %v3445_v13  ;;  %v1949_v58 = vadd.f32 1.0, %v1948_v18  ;;  %v5019_v48 = vpop.xlane.xlu1 %637  ;;  %v295_v44 = vld [vmem:[#allocation3 + $0x2d0] sm:$0xff] }
 0x185   :  { %v5009_v25 = vsel %vm2912_vm6, %v3031_v57, %v3030_v17  ;;  %v1028_v29 = vand.u32 2147483647, %v4997_v45  ;;  %3452 = vpow2.f32 %v1340_v2  ;;  %v452_v3 = vsub.f32 %v196_v5, %v324_v62 }
 0x186   :  { %v437_v36 = vsub.f32 %v181_v31, %v309_v59  ;;  %v422_v42 = vsub.f32 %v166_v14, %v294_v19  ;;  %v1971_v52 = vsel %vm4993_vm8, %v1968_v49, %v1965_v35  ;;  %vm5014_vm5 = vcmp.lt.f32.partialorder %v1960_v54, 0.0004427343 }
 0x187   :  { %v1156_v0 = vsub.f32 0.0, %v1028_v29  ;;  %v1033_v47 = vand.u32 2147483647, %v5006_v1  ;;  %vm5021_vm13 = vcmp.lt.f32.partialorder %v1951_v22, 0.0004427343  ;;  %v819_v18 = vsel %vm461_vm0, %v452_v3, 0.0  ;;  %v5043_v3 = vpop.xlane.xlu0 %634 }
 0x188   :  { %v3447_v57 = vpop.eup %3446  ;;  %v774_v5 = vsel %vm461_vm0, %v437_v36, 0.0  ;;  %v729_v8 = vsel %vm461_vm0, %v422_v42, 0.0  ;;  %v1959_v62 = vmul.f32 %v3441_v10, %v1958_v20  ;;  %820 = vadd.xlane.f32.xlu2 %v819_v18  ;;  %v2691_v54 = vsub.f32 %v899_v37, %v1971_v52  ;;  %v280_v18 = vld [vmem:[#allocation3 + $0x258] sm:$0xff] }
 0x189   :  { %v3449_v39 = vpop.eup %3448  ;;  %v1956_v24 = vmul.f32 0.6931472, %v3447_v57  ;;  %v1338_v31 = vmul.f32 1.442695, %v1156_v0  ;;  %775 = vadd.xlane.f32.xlu1 %v774_v5  ;;  %v1161_v59 = vsub.f32 0.0, %v1033_v47  ;;  %v1950_v14 = vmul.f32 %v3443_v50, %v1949_v58  ;;  %730 = vadd.xlane.f32.xlu0 %v729_v8 }
 0x18a   :  { %v3451_v49 = vpop.eup %3450  ;;  %v1947_v22 = vmul.f32 0.6931472, %v3449_v39  ;;  %v1032_v19 = vand.u32 2147483647, %v5019_v48  ;;  %v900_v58 = vmin.f32 %v4997_v45, 0.0  ;;  %v905_v29 = vmin.f32 %v5006_v1, 0.0 }
 0x18b   :  { %v1962_v13 = vsel %vm5014_vm5, %v1959_v62, %v1956_v24  ;;  %v1990_v17 = vadd.f32 1.0, %v3451_v49  ;;  %v1993_v2 = vmul.f32 -0.5, %v3451_v49  ;;  %v1996_v35 = vand.u32 2147483647, %v3451_v49  ;;  %v5033_v10 = vpop.eup %3452  ;;  %v325_v45 = vld [vmem:[#allocation3 + $0x3c0] sm:$0xff] }
 0x18c   :  { %v2690_v20 = vsub.f32 %v898_v28, %v1962_v13  ;;  %v1953_v30 = vsel %vm5021_vm13, %v1950_v14, %v1947_v22  ;;  %3454 = vpow2.f32 %v1338_v31  ;;  %v1348_v37 = vmul.f32 1.442695, %v1161_v59 }
 0x18d   :  { %v2689_v50 = vsub.f32 %v897_v33, %v1953_v30  ;;  %3456 = vlog2.f32 %v1990_v17  ;;  %v1994_v36 = vadd.f32 1.0, %v1993_v2  ;;  %v1981_v42 = vadd.f32 1.0, %v5033_v10  ;;  %v167_v33 = vld [vmem:[%s6197_s0 + $0x2d0] sm:$0xff] }
 0x18e   :  { %v3035_v28 = vperm.slane %v2690_v20, %v4028_v41  ;;  %v1984_v52 = vmul.f32 -0.5, %v5033_v10  ;;  %v3037_v0 = vperm.slane %v2691_v54, %v4040_v55  ;;  %3458 = vpow2.f32 %v1348_v37 }
 0x18f   :  { %v3033_v47 = vperm.slane %v2689_v50, %v4054_v7  ;;  %v1160_v57 = vsub.f32 0.0, %v1032_v19  ;;  %vm5059_vm8 = vcmp.lt.f32.partialorder %v1996_v35, 0.0004427343  ;;  %3460 = vlog2.f32 %v1981_v42 }
 0x190   :  { %v1987_v8 = vand.u32 2147483647, %v5033_v10  ;;  %v1031_v39 = vand.u32 2147483647, %v5043_v3  ;;  %v438_v31 = vsub.f32 %v182_v38, %v310_v63  ;;  %v423_v59 = vsub.f32 %v167_v33, %v295_v44 }
 0x191   :  { %v3034_v24 = vsel %vm2916_vm7, %v3033_v47, %v5009_v25  ;;  %v1346_v62 = vmul.f32 1.442695, %v1160_v57  ;;  %v1995_v14 = vmul.f32 %v3451_v49, %v1994_v36  ;;  %v1985_v19 = vadd.f32 1.0, %v1984_v52 }
 0x192   :  { %v3455_v54 = vpop.eup %3454  ;;  %v3036_v22 = vsel %vm2920_vm10, %v3035_v28, %v3034_v24  ;;  %v1159_v13 = vsub.f32 0.0, %v1031_v39  ;;  %v408_v30 = vsub.f32 %v152_v34, %v280_v18  ;;  %v777_v25 = vsel %vm461_vm0, %v438_v31, 0.0  ;;  %v5079_v18 = vpop.xlane.xlu1 %646 }
 0x193   :  { %v3457_v17 = vpop.eup %3456  ;;  %v5069_v2 = vsel %vm2924_vm11, %v3037_v0, %v3036_v22  ;;  %v1972_v35 = vadd.f32 1.0, %v3455_v54  ;;  %v1975_v20 = vmul.f32 -0.5, %v3455_v54  ;;  %3462 = vpow2.f32 %v1346_v62  ;;  %778 = vadd.xlane.f32.xlu2 %v777_v25  ;;  %v5075_v0 = vpop.xlane.xlu2 %649 }
 0x194   :  { %v1992_v37 = vmul.f32 0.6931472, %v3457_v17  ;;  %v1344_v50 = vmul.f32 1.442695, %v1159_v13  ;;  %v3459_v38 = vpop.eup %3458  ;;  %v1978_v63 = vand.u32 2147483647, %v3455_v54  ;;  %v1986_v57 = vmul.f32 %v5033_v10, %v1985_v19 }
 0x195   :  { %3464 = vlog2.f32 %v1972_v35  ;;  %v1976_v42 = vadd.f32 1.0, %v1975_v20  ;;  %v732_v49 = vsel %vm461_vm0, %v423_v59, 0.0  ;;  %v3461_v28 = vpop.eup %3460  ;;  %v2017_v52 = vadd.f32 1.0, %v3459_v38 }
 0x196   :  { %v1998_v36 = vsel %vm5059_vm8, %v1995_v14, %v1992_v37  ;;  %v2020_v33 = vmul.f32 -0.5, %v3459_v38  ;;  %v2023_v44 = vand.u32 2147483647, %v3459_v38  ;;  %733 = vadd.xlane.f32.xlu1 %v732_v49  ;;  %v1983_v47 = vmul.f32 0.6931472, %v3461_v28 }
 0x197   :  { %v904_v34 = vmin.f32 %v5019_v48, 0.0  ;;  %3466 = vpow2.f32 %v1344_v50  ;;  %v5083_v39 = vsub.f32 %v902_v43, %v1998_v36  ;;  %vm1988_vm5 = vcmp.lt.f32.partialorder %v1987_v8, 0.0004427343 }
 0x198   :  { %3468 = vlog2.f32 %v2017_v52  ;;  %v687_v5 = vsel %vm461_vm0, %v408_v30, 0.0  ;;  %v1989_v24 = vsel %vm1988_vm5, %v1986_v57, %v1983_v47  ;;  %v2021_v62 = vadd.f32 1.0, %v2020_v33  ;;  %v5104_v52 = vpop.xlane.xlu0 %643  ;;  %v168_v33 = vld [vmem:[%s6197_s0 + $0x2d8] sm:$0xff] }
 0x199   :  { %v903_v31 = vmin.f32 %v5043_v3, 0.0  ;;  %688 = vadd.xlane.f32.xlu0 %v687_v5  ;;  %v1036_v10 = vand.u32 2147483647, %v5075_v0  ;;  %v3463_v59 = vpop.eup %3462  ;;  %v1977_v22 = vmul.f32 %v3455_v54, %v1976_v42  ;;  %vm5088_vm13 = vcmp.lt.f32.partialorder %v1978_v63, 0.0004427343  ;;  %v281_v5 = vld [vmem:[#allocation3 + $0x260] sm:$0xff] }
 0x19a   :  { %vm5092_vm8 = vcmp.lt.f32.partialorder %v2023_v44, 0.0004427343  ;;  %v1035_v43 = vand.u32 2147483647, %v5079_v18  ;;  %v2693_v19 = vsub.f32 %v901_v6, %v1989_v24  ;;  %v2008_v13 = vadd.f32 1.0, %v3463_v59  ;;  %v296_v44 = vld [vmem:[#allocation3 + $0x2d8] sm:$0xff] }
 0x19b   :  { %v3465_v8 = vpop.eup %3464  ;;  %v2011_v17 = vmul.f32 -0.5, %v3463_v59  ;;  %v1164_v35 = vsub.f32 0.0, %v1036_v10  ;;  %v3043_v54 = vperm.slane %v5083_v39, %v4079_v51  ;;  %v2014_v30 = vand.u32 2147483647, %v3463_v59  ;;  %v153_v39 = vld [vmem:[%s6197_s0 + $0x260] sm:$0xff] }
 0x19c   :  { %v1974_v20 = vmul.f32 0.6931472, %v3465_v8  ;;  %v1163_v37 = vsub.f32 0.0, %v1035_v43  ;;  %v2022_v25 = vmul.f32 %v3459_v38, %v2021_v62  ;;  %3470 = vlog2.f32 %v2008_v13  ;;  %v197_v24 = vld [vmem:[%s6197_s0 + $0x3c0] sm:$0xff] }
 0x19d   :  { %v3467_v50 = vpop.eup %3466  ;;  %v908_v42 = vmin.f32 %v5075_v0, 0.0  ;;  %v1354_v63 = vmul.f32 1.442695, %v1164_v35  ;;  %v2012_v6 = vadd.f32 1.0, %v2011_v17  ;;  %v3041_v38 = vperm.slane %v2693_v19, %v4106_v16 }
 0x19e   :  { %v3469_v49 = vpop.eup %3468  ;;  %v1980_v21 = vsel %vm5088_vm13, %v1977_v22, %v1974_v20  ;;  %v1999_v28 = vadd.f32 1.0, %v3467_v50  ;;  %v2002_v36 = vmul.f32 -0.5, %v3467_v50  ;;  %vm5118_vm5 = vcmp.lt.f32.partialorder %v2014_v30, 0.0004427343 }
 0x19f   :  { %v2692_v47 = vsub.f32 %v900_v58, %v1980_v21  ;;  %v2019_v57 = vmul.f32 0.6931472, %v3469_v49  ;;  %3472 = vpow2.f32 %v1354_v63  ;;  %v1352_v22 = vmul.f32 1.442695, %v1163_v37  ;;  %v5135_v21 = vpop.xlane.xlu2 %658 }
 0x1a0   :  { %3474 = vlog2.f32 %v1999_v28  ;;  %v2003_v10 = vadd.f32 1.0, %v2002_v36  ;;  %v1034_v43 = vand.u32 2147483647, %v5104_v52  ;;  %v424_v8 = vsub.f32 %v168_v33, %v296_v44 }
 0x1a1   :  { %v3039_v58 = vperm.slane %v2692_v47, %v4139_v27  ;;  %v2025_v14 = vsel %vm5092_vm8, %v2022_v25, %v2019_v57  ;;  %v2013_v19 = vmul.f32 %v3463_v59, %v2012_v6  ;;  %v2005_v13 = vand.u32 2147483647, %v3467_v50 }
 0x1a2   :  { %3476 = vpow2.f32 %v1352_v22  ;;  %v409_v17 = vsub.f32 %v153_v39, %v281_v5  ;;  %v3471_v35 = vpop.eup %3470  ;;  %v1162_v30 = vsub.f32 0.0, %v1034_v43  ;;  %v735_v37 = vsel %vm461_vm0, %v424_v8, 0.0  ;;  %v5153_v8 = vpop.xlane.xlu0 %652 }
 0x1a3   :  { %v3040_v20 = vsel %vm2928_vm14, %v3039_v58, %v5069_v2  ;;  %v453_v63 = vsub.f32 %v197_v24, %v325_v45  ;;  %v5132_v32 = vsub.f32 %v905_v29, %v2025_v14  ;;  %v2010_v25 = vmul.f32 0.6931472, %v3471_v35  ;;  %736 = vadd.xlane.f32.xlu2 %v735_v37 }
 0x1a4   :  { %v3042_v49 = vsel %vm2932_vm15, %v3041_v38, %v3040_v20  ;;  %v690_v59 = vsel %vm461_vm0, %v409_v17, 0.0  ;;  %v2004_v2 = vmul.f32 %v3467_v50, %v2003_v10  ;;  %v1350_v36 = vmul.f32 1.442695, %v1162_v30  ;;  %v5144_v50 = vpop.xlane.xlu1 %655  ;;  %v326_v20 = vld [vmem:[#allocation3 + $0x3c8] sm:$0xff] }
 0x1a5   :  { %v3473_v6 = vpop.eup %3472  ;;  %v3044_v28 = vsel %vm2936_vm2, %v3043_v54, %v3042_v49  ;;  %691 = vadd.xlane.f32.xlu1 %v690_v59  ;;  %v822_v33 = vsel %vm461_vm0, %v453_v63, 0.0  ;;  %v2016_v1 = vsel %vm5118_vm5, %v2013_v19, %v2010_v25  ;;  %v1039_v54 = vand.u32 2147483647, %v5135_v21  ;;  %v154_v19 = vld [vmem:[%s6197_s0 + $0x268] sm:$0xff] }
 0x1a6   :  { %v3475_v44 = vpop.eup %3474  ;;  %v2044_v29 = vadd.f32 1.0, %v3473_v6  ;;  %v2047_v38 = vmul.f32 -0.5, %v3473_v6  ;;  %v2050_v47 = vand.u32 2147483647, %v3473_v6  ;;  %823 = vadd.xlane.f32.xlu0 %v822_v33  ;;  %v2696_v57 = vsub.f32 %v904_v34, %v2016_v1 }
 0x1a7   :  { %v2001_v39 = vmul.f32 0.6931472, %v3475_v44  ;;  %3478 = vpow2.f32 %v1350_v36  ;;  %vm2006_vm13 = vcmp.lt.f32.partialorder %v2005_v13, 0.0004427343  ;;  %v907_v62 = vmin.f32 %v5079_v18, 0.0  ;;  %v282_v13 = vld [vmem:[#allocation3 + $0x268] sm:$0xff] }
 0x1a8   :  { %v3477_v5 = vpop.eup %3476  ;;  %3480 = vlog2.f32 %v2044_v29  ;;  %v2048_v24 = vadd.f32 1.0, %v2047_v38  ;;  %v906_v58 = vmin.f32 %v5104_v52, 0.0  ;;  %v3049_v48 = vperm.slane %v5132_v32, %v4186_v60  ;;  %v199_v18 = vld [vmem:[%s6197_s0 + $0x3d0] sm:$0xff]  ;;  %v184_v52 = vld [vmem:[%s6197_s0 + $0x358] sm:$0xff] }
 0x1a9   :  { %v2007_v10 = vsel %vm2006_vm13, %v2004_v2, %v2001_v39  ;;  %v2035_v22 = vadd.f32 1.0, %v3477_v5  ;;  %v2038_v45 = vmul.f32 -0.5, %v3477_v5  ;;  %v911_v14 = vmin.f32 %v5135_v21, 0.0 }
 0x1aa   :  { %v2695_v34 = vsub.f32 %v903_v31, %v2007_v10  ;;  %v1167_v43 = vsub.f32 0.0, %v1039_v54  ;;  %v3047_v17 = vperm.slane %v2696_v57, %v4196_v26  ;;  %vm5159_vm8 = vcmp.lt.f32.partialorder %v2050_v47, 0.0004427343  ;;  %v198_v31 = vld [vmem:[%s6197_s0 + $0x3c8] sm:$0xff]  ;;  %v183_v10 = vld [vmem:[%s6197_s0 + $0x350] sm:$0xff] }
 0x1ab   :  { %3482 = vlog2.f32 %v2035_v22  ;;  %v1038_v3 = vand.u32 2147483647, %v5144_v50  ;;  %v2049_v37 = vmul.f32 %v3473_v6, %v2048_v24  ;;  %v2041_v63 = vand.u32 2147483647, %v3477_v5  ;;  %v5178_v22 = vpop.xlane.xlu2 %706 }
 0x1ac   :  { %v3045_v30 = vperm.slane %v2695_v34, %v4207_v9  ;;  %v1360_v49 = vmul.f32 1.442695, %v1167_v43  ;;  %v2039_v25 = vadd.f32 1.0, %v2038_v45  ;;  %v1037_v2 = vand.u32 2147483647, %v5153_v8 }
 0x1ad   :  { %v3479_v32 = vpop.eup %3478  ;;  %v1166_v59 = vsub.f32 0.0, %v1038_v3  ;;  %v410_v36 = vsub.f32 %v154_v19, %v282_v13  ;;  %v454_v38 = vsub.f32 %v198_v31, %v326_v20  ;;  %vm6307_vm5 = vcmask 720512   ;;  %v5183_v19 = vpop.xlane.xlu1 %703 }
 0x1ae   :  { %v3481_v33 = vpop.eup %3480  ;;  %v3046_v44 = vsel %vm2940_vm4, %v3045_v30, %v3044_v28  ;;  %v2026_v1 = vadd.f32 1.0, %v3479_v32  ;;  %v2029_v29 = vmul.f32 -0.5, %v3479_v32  ;;  %3484 = vpow2.f32 %v1360_v49  ;;  %v311_v28 = vld [vmem:[#allocation3 + $0x350] sm:$0xff] }
 0x1af   :  { %v3048_v47 = vsel %vm6307_vm5, %v3047_v17, %v3046_v44  ;;  %v2046_v57 = vmul.f32 0.6931472, %v3481_v33  ;;  %v1358_v39 = vmul.f32 1.442695, %v1166_v59  ;;  %vm6308_vm13 = vcmask 786112  }
 0x1b0   :  { %v5172_v6 = vsel %vm6308_vm13, %v3049_v48, %v3048_v47  ;;  %3486 = vlog2.f32 %v2026_v1  ;;  %v2032_v54 = vand.u32 2147483647, %v3479_v32  ;;  %v910_v24 = vmin.f32 %v5144_v50, 0.0 }
 0x1b1   :  { %v3483_v45 = vpop.eup %3482  ;;  %v2052_v34 = vsel %vm5159_vm8, %v2049_v37, %v2046_v57  ;;  %3488 = vpow2.f32 %v1358_v39  ;;  %v1165_v43 = vsub.f32 0.0, %v1037_v2  ;;  %v693_v48 = vsel %vm461_vm0, %v410_v36, 0.0 }
 0x1b2   :  { %v2037_v13 = vmul.f32 0.6931472, %v3483_v45  ;;  %v2040_v17 = vmul.f32 %v3477_v5, %v2039_v25  ;;  %vm5185_vm5 = vcmp.lt.f32.partialorder %v2041_v63, 0.0004427343  ;;  %694 = vadd.xlane.f32.xlu2 %v693_v48  ;;  %v825_v31 = vsel %vm461_vm0, %v454_v38, 0.0 }
 0x1b3   :  { %v2030_v20 = vadd.f32 1.0, %v2029_v29  ;;  %v1356_v30 = vmul.f32 1.442695, %v1165_v43  ;;  %826 = vadd.xlane.f32.xlu1 %v825_v31  ;;  %v439_v35 = vsub.f32 %v183_v10, %v311_v28  ;;  %v1055_v37 = vand.u32 2147483647, %v5178_v22 }
 0x1b4   :  { %v5193_v49 = vsub.f32 %v908_v42, %v2052_v34  ;;  %v2043_v5 = vsel %vm5185_vm5, %v2040_v17, %v2037_v13  ;;  %v909_v63 = vmin.f32 %v5153_v8, 0.0  ;;  %v1054_v25 = vand.u32 2147483647, %v5183_v19  ;;  %v3485_v59 = vpop.eup %3484  ;;  %v5208_v34 = vpop.xlane.xlu0 %661 }
 0x1b5   :  { %vm5199_vm8 = vcmp.lt.f32.partialorder %v2032_v54, 0.0004427343  ;;  %3490 = vpow2.f32 %v1356_v30  ;;  %v780_v36 = vsel %vm461_vm0, %v439_v35, 0.0  ;;  %v1183_v33 = vsub.f32 0.0, %v1055_v37 }
 0x1b6   :  { %v3487_v44 = vpop.eup %3486  ;;  %v2699_v0 = vsub.f32 %v907_v62, %v2043_v5  ;;  %v2071_v42 = vadd.f32 1.0, %v3485_v59  ;;  %v2074_v1 = vmul.f32 -0.5, %v3485_v59  ;;  %781 = vadd.xlane.f32.xlu0 %v780_v36  ;;  %v1182_v29 = vsub.f32 0.0, %v1054_v25  ;;  %v327_v62 = vld [vmem:[#allocation3 + $0x3d0] sm:$0xff] }
 0x1b7   :  { %v3489_v38 = vpop.eup %3488  ;;  %v2028_v47 = vmul.f32 0.6931472, %v3487_v44  ;;  %v2031_v57 = vmul.f32 %v3479_v32, %v2030_v20  ;;  %v2077_v39 = vand.u32 2147483647, %v3485_v59  ;;  %v1392_v54 = vmul.f32 1.442695, %v1183_v33 }
 0x1b8   :  { %v3055_v10 = vperm.slane %v5193_v49, %v4215_v56  ;;  %3492 = vlog2.f32 %v2071_v42  ;;  %v2075_v28 = vadd.f32 1.0, %v2074_v1  ;;  %v2062_v45 = vadd.f32 1.0, %v3489_v38 }
 0x1b9   :  { %v2034_v43 = vsel %vm5199_vm8, %v2031_v57, %v2028_v47  ;;  %v2065_v48 = vmul.f32 -0.5, %v3489_v38  ;;  %v2068_v32 = vand.u32 2147483647, %v3489_v38  ;;  %3494 = vpow2.f32 %v1392_v54 }
 0x1ba   :  { %v3053_v13 = vperm.slane %v2699_v0, %v4240_v4  ;;  %v2698_v17 = vsub.f32 %v906_v58, %v2034_v43  ;;  %3496 = vlog2.f32 %v2062_v45  ;;  %v1390_v3 = vmul.f32 1.442695, %v1182_v29  ;;  %v312_v58 = vld [vmem:[#allocation3 + $0x358] sm:$0xff] }
 0x1bb   :  { %v3491_v31 = vpop.eup %3490  ;;  %vm5218_vm13 = vcmp.lt.f32.partialorder %v2077_v39, 0.0004427343  ;;  %v2066_v30 = vadd.f32 1.0, %v2065_v48  ;;  %v1040_v35 = vand.u32 2147483647, %v5208_v34  ;;  %v455_v37 = vsub.f32 %v199_v18, %v327_v62 }
 0x1bc   :  { %v3051_v49 = vperm.slane %v2698_v17, %v4278_v61  ;;  %v2076_v5 = vmul.f32 %v3485_v59, %v2075_v28  ;;  %v2053_v25 = vadd.f32 1.0, %v3491_v31  ;;  %v2056_v2 = vmul.f32 -0.5, %v3491_v31 }
 0x1bd   :  { %vm5227_vm5 = vcmp.lt.f32.partialorder %v2068_v32, 0.0004427343  ;;  %3498 = vpow2.f32 %v1390_v3  ;;  %v1168_v33 = vsub.f32 0.0, %v1040_v35  ;;  %v828_v44 = vsel %vm461_vm0, %v455_v37, 0.0 }
 0x1be   :  { %v3493_v0 = vpop.eup %3492  ;;  %v3052_v42 = vsel %vm2952_vm9, %v3051_v49, %v5172_v6  ;;  %v2067_v59 = vmul.f32 %v3489_v38, %v2066_v30  ;;  %3500 = vlog2.f32 %v2053_v25  ;;  %v2059_v1 = vand.u32 2147483647, %v3491_v31  ;;  %829 = vadd.xlane.f32.xlu2 %v828_v44  ;;  %v169_v6 = vld [vmem:[%s6197_s0 + $0x2e0] sm:$0xff] }
 0x1bf   :  { %v3495_v29 = vpop.eup %3494  ;;  %v3054_v47 = vsel %vm2956_vm12, %v3053_v13, %v3052_v42  ;;  %v2073_v57 = vmul.f32 0.6931472, %v3493_v0  ;;  %v1362_v39 = vmul.f32 1.442695, %v1168_v33  ;;  %v440_v54 = vsub.f32 %v184_v52, %v312_v58  ;;  %v297_v38 = vld [vmem:[#allocation3 + $0x2e0] sm:$0xff]  ;;  %v5258_v58 = vpop.xlane.xlu1 %709 }
 0x1c0   :  { %v3497_v28 = vpop.eup %3496  ;;  %v5236_v45 = vsel %vm2960_vm3, %v3055_v10, %v3054_v47  ;;  %v2057_v18 = vadd.f32 1.0, %v2056_v2  ;;  %v2215_v62 = vadd.f32 1.0, %v3495_v29  ;;  %v2218_v43 = vmul.f32 -0.5, %v3495_v29 }
 0x1c1   :  { %v2079_v48 = vsel %vm5218_vm13, %v2076_v5, %v2073_v57  ;;  %v2064_v32 = vmul.f32 0.6931472, %v3497_v28  ;;  %v2221_v13 = vand.u32 2147483647, %v3495_v29  ;;  %3502 = vpow2.f32 %v1362_v39  ;;  %v5253_v5 = vpop.xlane.xlu2 %751 }
 0x1c2   :  { %v2703_v17 = vsub.f32 %v911_v14, %v2079_v48  ;;  %3504 = vlog2.f32 %v2215_v62  ;;  %v2219_v10 = vadd.f32 1.0, %v2218_v43  ;;  %v783_v3 = vsel %vm461_vm0, %v440_v54, 0.0  ;;  %v185_v48 = vld [vmem:[%s6197_s0 + $0x360] sm:$0xff] }
 0x1c3   :  { %v3499_v30 = vpop.eup %3498  ;;  %v2070_v35 = vsel %vm5227_vm5, %v2067_v59, %v2064_v32  ;;  %vm5248_vm8 = vcmp.lt.f32.partialorder %v2059_v1, 0.0004427343  ;;  %v927_v20 = vmin.f32 %v5178_v22, 0.0  ;;  %784 = vadd.xlane.f32.xlu1 %v783_v3  ;;  %v425_v49 = vsub.f32 %v169_v6, %v297_v38 }
 0x1c4   :  { %v3501_v21 = vpop.eup %3500  ;;  %v3060_v14 = vperm.slane %v2703_v17, %v4060_v12  ;;  %v2702_v25 = vsub.f32 %v910_v24, %v2070_v35  ;;  %v2058_v2 = vmul.f32 %v3491_v31, %v2057_v18  ;;  %v2206_v52 = vadd.f32 1.0, %v3499_v30  ;;  %v5267_v24 = vpop.xlane.xlu0 %664  ;;  %v170_v17 = vld [vmem:[%s6197_s0 + $0x2e8] sm:$0xff]  ;;  %v284_v35 = vld [vmem:[#allocation3 + $0x278] sm:$0xff] }
 0x1c5   :  { %v2055_v36 = vmul.f32 0.6931472, %v3501_v21  ;;  %vm5260_vm13 = vcmp.lt.f32.partialorder %v2221_v13, 0.0004427343  ;;  %v2209_v22 = vmul.f32 -0.5, %v3499_v30  ;;  %v738_v44 = vsel %vm461_vm0, %v425_v49, 0.0 }
 0x1c6   :  { %v3059_v0 = vperm.slane %v2702_v25, %v4006_v23  ;;  %v2220_v42 = vmul.f32 %v3495_v29, %v2219_v10  ;;  %3506 = vlog2.f32 %v2206_v52  ;;  %739 = vadd.xlane.f32.xlu0 %v738_v44  ;;  %v1070_v50 = vand.u32 2147483647, %v5253_v5  ;;  %v313_v13 = vld [vmem:[#allocation3 + $0x360] sm:$0xff]  ;;  %v298_v10 = vld [vmem:[#allocation3 + $0x2e8] sm:$0xff]  ;;  %v155_v49 = vld [vmem:[%s6197_s0 + $0x270] sm:$0xff] }
 0x1c7   :  { %v5269_v31 = vpop.eup %3502  ;;  %v2061_v59 = vsel %vm5248_vm8, %v2058_v2, %v2055_v36  ;;  %v2210_v1 = vadd.f32 1.0, %v2209_v22  ;;  %v2212_v47 = vand.u32 2147483647, %v3499_v30  ;;  %v1056_v57 = vand.u32 2147483647, %v5258_v58  ;;  %v283_v21 = vld [vmem:[#allocation3 + $0x270] sm:$0xff] }
 0x1c8   :  { %v3505_v39 = vpop.eup %3504  ;;  %vm6321_vm5 = vcmask 130112   ;;  %v2701_v29 = vsub.f32 %v909_v63, %v2061_v59  ;;  %v2080_v28 = vadd.f32 1.0, %v5269_v31  ;;  %v2083_v18 = vmul.f32 -0.5, %v5269_v31 }
 0x1c9   :  { %v5275_v54 = vsel %vm6321_vm5, %v3060_v14, %v3059_v0  ;;  %v2217_v62 = vmul.f32 0.6931472, %v3505_v39  ;;  %v926_v43 = vmin.f32 %v5183_v19, 0.0  ;;  %v912_v6 = vmin.f32 %v5208_v34, 0.0  ;;  %v5305_v44 = vpop.xlane.xlu2 %712 }
 0x1ca   :  { %v1198_v38 = vsub.f32 0.0, %v1070_v50  ;;  %v3057_v32 = vperm.slane %v2701_v29, %v4326_v11  ;;  %3508 = vlog2.f32 %v2080_v28  ;;  %v942_v8 = vmin.f32 %v5253_v5, 0.0 }
 0x1cb   :  { %v1184_v63 = vsub.f32 0.0, %v1056_v57  ;;  %v2223_v19 = vsel %vm5260_vm13, %v2220_v42, %v2217_v62  ;;  %v2211_v3 = vmul.f32 %v3499_v30, %v2210_v1  ;;  %vm5293_vm8 = vcmp.lt.f32.partialorder %v2212_v47, 0.0004427343 }
 0x1cc   :  { %v1422_v37 = vmul.f32 1.442695, %v1198_v38  ;;  %v3507_v14 = vpop.eup %3506  ;;  %v5302_v25 = vsel %vm2964_vm1, %v3057_v32, %v5236_v45  ;;  %v2719_v2 = vsub.f32 %v927_v20, %v2223_v19  ;;  %v2084_v52 = vadd.f32 1.0, %v2083_v18  ;;  %v5315_v18 = vpop.xlane.xlu1 %667  ;;  %v171_v38 = vld [vmem:[%s6197_s0 + $0x2f0] sm:$0xff] }
 0x1cd   :  { %v1394_v36 = vmul.f32 1.442695, %v1184_v63  ;;  %v2208_v33 = vmul.f32 0.6931472, %v3507_v14  ;;  %v1041_v30 = vand.u32 2147483647, %v5267_v24  ;;  %v441_v22 = vsub.f32 %v185_v48, %v313_v13  ;;  %v5317_v62 = vpop.xlane.xlu0 %754 }
 0x1ce   :  { %3510 = vpow2.f32 %v1422_v37  ;;  %v2086_v0 = vand.u32 2147483647, %v5269_v31  ;;  %v426_v42 = vsub.f32 %v170_v17, %v298_v10  ;;  %v411_v50 = vsub.f32 %v155_v49, %v283_v21  ;;  %v299_v13 = vld [vmem:[#allocation3 + $0x2f0] sm:$0xff] }
 0x1cf   :  { %3512 = vpow2.f32 %v1394_v36  ;;  %v3091_v59 = vperm.slane %v2719_v2, %v4060_v12  ;;  %v2214_v45 = vsel %vm5293_vm8, %v2211_v3, %v2208_v33  ;;  %v1169_v20 = vsub.f32 0.0, %v1041_v30  ;;  %v156_v3 = vld [vmem:[%s6197_s0 + $0x278] sm:$0xff] }
 0x1d0   :  { %v786_v1 = vsel %vm461_vm0, %v441_v22, 0.0  ;;  %v3509_v47 = vpop.eup %3508  ;;  %v2718_v57 = vsub.f32 %v926_v43, %v2214_v45  ;;  %v741_v39 = vsel %vm461_vm0, %v426_v42, 0.0  ;;  %v696_v29 = vsel %vm461_vm0, %v411_v50, 0.0 }
 0x1d1   :  { %787 = vadd.xlane.f32.xlu2 %v786_v1  ;;  %v1057_v28 = vand.u32 2147483647, %v5305_v44  ;;  %v2082_v48 = vmul.f32 0.6931472, %v3509_v47  ;;  %v2085_v32 = vmul.f32 %v5269_v31, %v2084_v52  ;;  %v928_v43 = vmin.f32 %v5258_v58, 0.0  ;;  %742 = vadd.xlane.f32.xlu1 %v741_v39  ;;  %v200_v39 = vld [vmem:[%s6197_s0 + $0x3d8] sm:$0xff] }
 0x1d2   :  { %v1364_v63 = vmul.f32 1.442695, %v1169_v20  ;;  %697 = vadd.xlane.f32.xlu0 %v696_v29  ;;  %v3090_v17 = vperm.slane %v2718_v57, %v4006_v23  ;;  %vm2087_vm13 = vcmp.lt.f32.partialorder %v2086_v0, 0.0004427343  ;;  %v913_v10 = vmin.f32 %v5267_v24, 0.0  ;;  %v328_v29 = vld [vmem:[#allocation3 + $0x3d8] sm:$0xff] }
 0x1d3   :  { %v1185_v19 = vsub.f32 0.0, %v1057_v28  ;;  %v2088_v49 = vsel %vm2087_vm13, %v2085_v32, %v2082_v48  ;;  %v1042_v31 = vand.u32 2147483647, %v5315_v18  ;;  %v1071_v21 = vand.u32 2147483647, %v5317_v62  ;;  %v5346_v28 = vpop.xlane.xlu2 %802 }
 0x1d4   :  { %v3511_v37 = vpop.eup %3510  ;;  %3514 = vpow2.f32 %v1364_v63  ;;  %v5332_v2 = vsel %vm6321_vm5, %v3091_v59, %v3090_v17  ;;  %v2704_v52 = vsub.f32 %v912_v6, %v2088_v49  ;;  %v427_v0 = vsub.f32 %v171_v38, %v299_v13 }
 0x1d5   :  { %v3513_v14 = vpop.eup %3512  ;;  %v2350_v36 = vadd.f32 1.0, %v3511_v37  ;;  %v2353_v33 = vmul.f32 -0.5, %v3511_v37  ;;  %v412_v42 = vsub.f32 %v156_v3, %v284_v35  ;;  %v929_v45 = vmin.f32 %v5305_v44, 0.0 }
 0x1d6   :  { %v2224_v30 = vadd.f32 1.0, %v3513_v14  ;;  %v2227_v22 = vmul.f32 -0.5, %v3513_v14  ;;  %v3062_v50 = vperm.slane %v2704_v52, %v4036_v53  ;;  %v1396_v20 = vmul.f32 1.442695, %v1185_v19 }
 0x1d7   :  { %3516 = vlog2.f32 %v2350_v36  ;;  %v2354_v1 = vadd.f32 1.0, %v2353_v33  ;;  %v2356_v47 = vand.u32 2147483647, %v3511_v37  ;;  %v914_v59 = vmin.f32 %v5315_v18, 0.0  ;;  %v5356_v36 = vpop.xlane.xlu1 %799 }
 0x1d8   :  { %3518 = vlog2.f32 %v2224_v30  ;;  %v5341_v34 = vsel %vm2912_vm6, %v3062_v50, %v5275_v54  ;;  %v2228_v6 = vadd.f32 1.0, %v2227_v22  ;;  %v1170_v57 = vsub.f32 0.0, %v1042_v31 }
 0x1d9   :  { %3520 = vpow2.f32 %v1396_v20  ;;  %v943_v48 = vmin.f32 %v5317_v62, 0.0  ;;  %v1199_v32 = vsub.f32 0.0, %v1071_v21  ;;  %v744_v63 = vsel %vm461_vm0, %v427_v0, 0.0 }
 0x1da   :  { %v3515_v38 = vpop.eup %3514  ;;  %v699_v13 = vsel %vm461_vm0, %v412_v42, 0.0  ;;  %v2230_v54 = vand.u32 2147483647, %v3513_v14  ;;  %v1366_v3 = vmul.f32 1.442695, %v1170_v57  ;;  %745 = vadd.xlane.f32.xlu2 %v744_v63  ;;  %v456_v31 = vsub.f32 %v200_v39, %v328_v29 }
 0x1db   :  { %v2089_v17 = vadd.f32 1.0, %v3515_v38  ;;  %v2092_v19 = vmul.f32 -0.5, %v3515_v38  ;;  %700 = vadd.xlane.f32.xlu1 %v699_v13  ;;  %vm5351_vm8 = vcmp.lt.f32.partialorder %v2356_v47, 0.0004427343  ;;  %v1424_v49 = vmul.f32 1.442695, %v1199_v32 }
 0x1dc   :  { %v1087_v52 = vand.u32 2147483647, %v5346_v28  ;;  %v2355_v33 = vmul.f32 %v3511_v37, %v2354_v1  ;;  %v2229_v30 = vmul.f32 %v3513_v14, %v2228_v6  ;;  %v2095_v22 = vand.u32 2147483647, %v3515_v38  ;;  %v5413_v1 = vpop.xlane.xlu2 %760 }
 0x1dd   :  { %v3517_v21 = vpop.eup %3516  ;;  %3522 = vlog2.f32 %v2089_v17  ;;  %v2093_v42 = vadd.f32 1.0, %v2092_v19  ;;  %v831_v50 = vsel %vm461_vm0, %v456_v31, 0.0  ;;  %v1086_v39 = vand.u32 2147483647, %v5356_v36  ;;  %v5365_v17 = vpop.xlane.xlu0 %757 }
 0x1de   :  { %v3519_v0 = vpop.eup %3518  ;;  %3524 = vpow2.f32 %v1366_v3  ;;  %v1215_v20 = vsub.f32 0.0, %v1087_v52  ;;  %v2352_v57 = vmul.f32 0.6931472, %v3517_v21  ;;  %832 = vadd.xlane.f32.xlu0 %v831_v50  ;;  %vm2231_vm13 = vcmp.lt.f32.partialorder %v2230_v54, 0.0004427343 }
 0x1df   :  { %v3521_v47 = vpop.eup %3520  ;;  %v2226_v63 = vmul.f32 0.6931472, %v3519_v0  ;;  %3526 = vpow2.f32 %v1424_v49  ;;  %v959_v37 = vmin.f32 %v5346_v28, 0.0  ;;  %vm5361_vm5 = vcmp.lt.f32.partialorder %v2095_v22, 0.0004427343  ;;  %v187_v28 = vld [vmem:[%s6197_s0 + $0x370] sm:$0xff] }
 0x1e0   :  { %v2233_v29 = vadd.f32 1.0, %v3521_v47  ;;  %v2236_v32 = vmul.f32 -0.5, %v3521_v47  ;;  %v1456_v6 = vmul.f32 1.442695, %v1215_v20  ;;  %v1214_v13 = vsub.f32 0.0, %v1086_v39 }
 0x1e1   :  { %v2232_v14 = vsel %vm2231_vm13, %v2229_v30, %v2226_v63  ;;  %v2094_v3 = vmul.f32 %v3515_v38, %v2093_v42  ;;  %v958_v54 = vmin.f32 %v5356_v36, 0.0  ;;  %v2358_v31 = vsel %vm5351_vm8, %v2355_v33, %v2352_v57 }
 0x1e2   :  { %v2720_v19 = vsub.f32 %v928_v43, %v2232_v14  ;;  %3528 = vlog2.f32 %v2233_v29  ;;  %v2237_v52 = vadd.f32 1.0, %v2236_v32  ;;  %v1454_v21 = vmul.f32 1.442695, %v1214_v13  ;;  %v172_v14 = vld [vmem:[%s6197_s0 + $0x2f8] sm:$0xff] }
 0x1e3   :  { %v3523_v49 = vpop.eup %3522  ;;  %3530 = vpow2.f32 %v1456_v6  ;;  %v2239_v50 = vand.u32 2147483647, %v3521_v47  ;;  %v1072_v20 = vand.u32 2147483647, %v5365_v17  ;;  %v5380_v39 = vsub.f32 %v942_v8, %v2358_v31  ;;  %v300_v6 = vld [vmem:[#allocation3 + $0x2f8] sm:$0xff] }
 0x1e4   :  { %v3525_v30 = vpop.eup %3524  ;;  %v3093_v22 = vperm.slane %v2720_v19, %v4036_v53  ;;  %v2091_v0 = vmul.f32 0.6931472, %v3523_v49  ;;  %3532 = vpow2.f32 %v1454_v21  ;;  %v2238_v32 = vmul.f32 %v3521_v47, %v2237_v52 }
 0x1e5   :  { %v3527_v58 = vpop.eup %3526  ;;  %v2098_v43 = vadd.f32 1.0, %v3525_v30  ;;  %v2101_v38 = vmul.f32 -0.5, %v3525_v30  ;;  %v2104_v42 = vand.u32 2147483647, %v3525_v30  ;;  %vm5387_vm8 = vcmp.lt.f32.partialorder %v2239_v50, 0.0004427343 }
 0x1e6   :  { %v3094_v63 = vsel %vm2912_vm6, %v3093_v22, %v5332_v2  ;;  %v2097_v35 = vsel %vm5361_vm5, %v2094_v3, %v2091_v0  ;;  %v2359_v33 = vadd.f32 1.0, %v3527_v58  ;;  %v2362_v57 = vmul.f32 -0.5, %v3527_v58 }
 0x1e7   :  { %v2705_v29 = vsub.f32 %v913_v10, %v2097_v35  ;;  %3534 = vlog2.f32 %v2098_v43  ;;  %v2102_v13 = vadd.f32 1.0, %v2101_v38  ;;  %v1200_v5 = vsub.f32 0.0, %v1072_v20  ;;  %v201_v35 = vld [vmem:[%s6197_s0 + $0x3e0] sm:$0xff] }
 0x1e8   :  { %v3529_v2 = vpop.eup %3528  ;;  %3536 = vlog2.f32 %v2359_v33  ;;  %vm5392_vm13 = vcmp.lt.f32.partialorder %v2104_v42, 0.0004427343  ;;  %v2363_v47 = vadd.f32 1.0, %v2362_v57  ;;  %v2365_v3 = vand.u32 2147483647, %v3527_v58 }
 0x1e9   :  { %v3531_v8 = vpop.eup %3530  ;;  %v3064_v19 = vperm.slane %v2705_v29, %v4054_v7  ;;  %v2235_v24 = vmul.f32 0.6931472, %v3529_v2  ;;  %v428_v52 = vsub.f32 %v172_v14, %v300_v6  ;;  %v1426_v20 = vmul.f32 1.442695, %v1200_v5  ;;  %v314_v6 = vld [vmem:[#allocation3 + $0x368] sm:$0xff]  ;;  %v316_v2 = vld [vmem:[#allocation3 + $0x378] sm:$0xff] }
 0x1ea   :  { %v2503_v49 = vadd.f32 1.0, %v3531_v8  ;;  %v2506_v31 = vmul.f32 -0.5, %v3531_v8  ;;  %v3533_v21 = vpop.eup %3532  ;;  %v2509_v50 = vand.u32 2147483647, %v3531_v8  ;;  %v2103_v38 = vmul.f32 %v3525_v30, %v2102_v13 }
 0x1eb   :  { %v3065_v22 = vsel %vm2916_vm7, %v3064_v19, %v5341_v34  ;;  %v2241_v0 = vsel %vm5387_vm8, %v2238_v32, %v2235_v24  ;;  %v2494_v42 = vadd.f32 1.0, %v3533_v21  ;;  %v2364_v57 = vmul.f32 %v3527_v58, %v2363_v47  ;;  %v329_v34 = vld [vmem:[#allocation3 + $0x3e0] sm:$0xff]  ;;  %v186_v32 = vld [vmem:[%s6197_s0 + $0x368] sm:$0xff] }
 0x1ec   :  { %v2721_v43 = vsub.f32 %v929_v45, %v2241_v0  ;;  %3538 = vlog2.f32 %v2503_v49  ;;  %v2507_v29 = vadd.f32 1.0, %v2506_v31  ;;  %v2497_v14 = vmul.f32 -0.5, %v3533_v21  ;;  %v5425_v31 = vpop.xlane.xlu1 %715 }
 0x1ed   :  { %v3535_v33 = vpop.eup %3534  ;;  %3540 = vpow2.f32 %v1426_v20  ;;  %vm5409_vm5 = vcmp.lt.f32.partialorder %v2365_v3, 0.0004427343  ;;  %vm5415_vm8 = vcmp.lt.f32.partialorder %v2509_v50, 0.0004427343  ;;  %v747_v19 = vsel %vm461_vm0, %v428_v52, 0.0  ;;  %v5431_v52 = vpop.xlane.xlu0 %670 }
 0x1ee   :  { %v3537_v44 = vpop.eup %3536  ;;  %v3095_v45 = vperm.slane %v2721_v43, %v4054_v7  ;;  %v2100_v30 = vmul.f32 0.6931472, %v3535_v33  ;;  %3542 = vlog2.f32 %v2494_v42  ;;  %v2498_v5 = vadd.f32 1.0, %v2497_v14  ;;  %748 = vadd.xlane.f32.xlu2 %v747_v19  ;;  %v330_v19 = vld [vmem:[#allocation3 + $0x3e8] sm:$0xff] }
 0x1ef   :  { %v2361_v58 = vmul.f32 0.6931472, %v3537_v44  ;;  %v457_v3 = vsub.f32 %v201_v35, %v329_v34  ;;  %v442_v49 = vsub.f32 %v186_v32, %v314_v6  ;;  %v2508_v20 = vmul.f32 %v3531_v8, %v2507_v29 }
 0x1f0   :  { %v5421_v24 = vsel %vm2916_vm7, %v3095_v45, %v3094_v63  ;;  %v2106_v47 = vsel %vm5392_vm13, %v2103_v38, %v2100_v30  ;;  %v2500_v43 = vand.u32 2147483647, %v3533_v21  ;;  %v1073_v35 = vand.u32 2147483647, %v5413_v1 }
 0x1f1   :  { %v2706_v0 = vsub.f32 %v914_v59, %v2106_v47  ;;  %v2367_v50 = vsel %vm5409_vm5, %v2364_v57, %v2361_v58  ;;  %v834_v38 = vsel %vm461_vm0, %v457_v3, 0.0  ;;  %v789_v42 = vsel %vm461_vm0, %v442_v49, 0.0 }
 0x1f2   :  { %v3539_v63 = vpop.eup %3538  ;;  %v2735_v10 = vsub.f32 %v943_v48, %v2367_v50  ;;  %v3121_v18 = vperm.slane %v5380_v39, %v4006_v23  ;;  %835 = vadd.xlane.f32.xlu1 %v834_v38  ;;  %790 = vadd.xlane.f32.xlu0 %v789_v42  ;;  %v1058_v57 = vand.u32 2147483647, %v5425_v31  ;;  %v2499_v29 = vmul.f32 %v3533_v21, %v2498_v5  ;;  %v188_v21 = vld [vmem:[%s6197_s0 + $0x378] sm:$0xff] }
 0x1f3   :  { %v5438_v33 = vpop.eup %3540  ;;  %v3066_v59 = vperm.slane %v2706_v0, %v4028_v41  ;;  %v2505_v8 = vmul.f32 0.6931472, %v3539_v63  ;;  %v1201_v44 = vsub.f32 0.0, %v1073_v35  ;;  %vm6336_vm13 = vcmask 130112   ;;  %v5469_v0 = vpop.xlane.xlu2 %718 }
 0x1f4   :  { %v3543_v62 = vpop.eup %3542  ;;  %v3122_v48 = vperm.slane %v2735_v10, %v4060_v12  ;;  %v2368_v14 = vadd.f32 1.0, %v5438_v33  ;;  %v2371_v34 = vmul.f32 -0.5, %v5438_v33  ;;  %vm2501_vm5 = vcmp.lt.f32.partialorder %v2500_v43, 0.0004427343 }
 0x1f5   :  { %v5448_v32 = vsel %vm2920_vm10, %v3066_v59, %v3065_v22  ;;  %v2511_v39 = vsel %vm5415_vm8, %v2508_v20, %v2505_v8  ;;  %v2496_v6 = vmul.f32 0.6931472, %v3543_v62  ;;  %v202_v22 = vld [vmem:[%s6197_s0 + $0x3e8] sm:$0xff]  ;;  %v1428_v13 = vmul.f32 1.442695, %v1201_v44  ;;  %v204_v59 = vld [vmem:[%s6197_s0 + $0x3f8] sm:$0xff]  ;;  %vm6337_vm8 = vmmov %vm6336_vm13 }
 0x1f6   :  { %v5453_v45 = vsel %vm6336_vm13, %v3122_v48, %v3121_v18  ;;  %v2751_v30 = vsub.f32 %v959_v37, %v2511_v39  ;;  %3544 = vlog2.f32 %v2368_v14  ;;  %v1186_v5 = vsub.f32 0.0, %v1058_v57  ;;  %v315_v37 = vld [vmem:[#allocation3 + $0x370] sm:$0xff]  ;;  %v5478_v18 = vpop.xlane.xlu0 %805  ;;  %v332_v8 = vld [vmem:[#allocation3 + $0x3f8] sm:$0xff] }
 0x1f7   :  { %v2502_v58 = vsel %vm2501_vm5, %v2499_v29, %v2496_v6  ;;  %v2372_v49 = vadd.f32 1.0, %v2371_v34  ;;  %3546 = vpow2.f32 %v1428_v13  ;;  %v1043_v20 = vand.u32 2147483647, %v5431_v52  ;;  %v203_v34 = vld [vmem:[%s6197_s0 + $0x3f0] sm:$0xff] }
 0x1f8   :  { %v3153_v47 = vperm.slane %v2751_v30, %v4060_v12  ;;  %v2750_v3 = vsub.f32 %v958_v54, %v2502_v58  ;;  %v1398_v50 = vmul.f32 1.442695, %v1186_v5  ;;  %v444_v43 = vsub.f32 %v188_v21, %v316_v2  ;;  %v5476_v54 = vpop.xlane.xlu1 %673  ;;  %v331_v21 = vld [vmem:[#allocation3 + $0x3f0] sm:$0xff] }
 0x1f9   :  { %v2374_v10 = vand.u32 2147483647, %v5438_v33  ;;  %v458_v38 = vsub.f32 %v202_v22, %v330_v19  ;;  %v443_v42 = vsub.f32 %v187_v28, %v315_v37  ;;  %v1171_v35 = vsub.f32 0.0, %v1043_v20 }
 0x1fa   :  { %v3152_v63 = vperm.slane %v2750_v3, %v4006_v23  ;;  %3548 = vpow2.f32 %v1398_v50  ;;  %v795_v12 = vsel %vm461_vm0, %v444_v43, 0.0  ;;  %v1059_v36 = vand.u32 2147483647, %v5469_v0 }
 0x1fb   :  { %v944_v48 = vmin.f32 %v5365_v17, 0.0  ;;  %796 = vadd.xlane.f32.xlu2 %v795_v12  ;;  %v837_v29 = vsel %vm461_vm0, %v458_v38, 0.0  ;;  %v792_v14 = vsel %vm461_vm0, %v443_v42, 0.0  ;;  %v2373_v6 = vmul.f32 %v5438_v33, %v2372_v49  ;;  %v5499_v38 = vpop.xlane.xlu2 %676 }
 0x1fc   :  { %v3545_v57 = vpop.eup %3544  ;;  %v5484_v62 = vsel %vm6337_vm8, %v3153_v47, %v3152_v63  ;;  %v1368_v44 = vmul.f32 1.442695, %v1171_v35  ;;  %838 = vadd.xlane.f32.xlu1 %v837_v29  ;;  %793 = vadd.xlane.f32.xlu0 %v792_v14  ;;  %v1187_v30 = vsub.f32 0.0, %v1059_v36  ;;  %vm2375_vm13 = vcmp.lt.f32.partialorder %v2374_v10, 0.0004427343 }
 0x1fd   :  { %v2370_v39 = vmul.f32 0.6931472, %v3545_v57  ;;  %v1044_v17 = vand.u32 2147483647, %v5476_v54  ;;  %v1088_v2 = vand.u32 2147483647, %v5478_v18  ;;  %v460_v22 = vsub.f32 %v204_v59, %v332_v8  ;;  %v3547_v58 = vpop.eup %3546 }
 0x1fe   :  { %v945_v5 = vmin.f32 %v5413_v1, 0.0  ;;  %3550 = vpow2.f32 %v1368_v44  ;;  %v1400_v19 = vmul.f32 1.442695, %v1187_v30  ;;  %v2377_v37 = vadd.f32 1.0, %v3547_v58 }
 0x1ff   :  { %v2376_v13 = vsel %vm2375_vm13, %v2373_v6, %v2370_v39  ;;  %v2380_v33 = vmul.f32 -0.5, %v3547_v58  ;;  %v459_v47 = vsub.f32 %v203_v34, %v331_v21  ;;  %v2383_v49 = vand.u32 2147483647, %v3547_v58 }
 0x200   :  { %v2736_v28 = vsub.f32 %v944_v48, %v2376_v13  ;;  %v3549_v3 = vpop.eup %3548  ;;  %3552 = vpow2.f32 %v1400_v19  ;;  %v1172_v50 = vsub.f32 0.0, %v1044_v17  ;;  %v1216_v20 = vsub.f32 0.0, %v1088_v2  ;;  %v5510_v2 = vpop.xlane.xlu1 %808 }
 0x201   :  { %3554 = vlog2.f32 %v2377_v37  ;;  %v930_v63 = vmin.f32 %v5425_v31, 0.0  ;;  %v843_v10 = vsel %vm461_vm0, %v460_v22, 0.0  ;;  %v2381_v1 = vadd.f32 1.0, %v2380_v33 }
 0x202   :  { %v3124_v43 = vperm.slane %v2736_v28, %v4036_v53  ;;  %v2242_v42 = vadd.f32 1.0, %v3549_v3  ;;  %v2245_v35 = vmul.f32 -0.5, %v3549_v3  ;;  %v1370_v12 = vmul.f32 1.442695, %v1172_v50 }
 0x203   :  { %v2248_v59 = vand.u32 2147483647, %v3549_v3  ;;  %v1458_v8 = vmul.f32 1.442695, %v1216_v20  ;;  %v840_v57 = vsel %vm461_vm0, %v459_v47, 0.0  ;;  %v915_v14 = vmin.f32 %v5431_v52, 0.0 }
 0x204   :  { %v3125_v36 = vsel %vm2912_vm6, %v3124_v43, %v5453_v45  ;;  %v3551_v48 = vpop.eup %3550  ;;  %vm5504_vm5 = vcmp.lt.f32.partialorder %v2383_v49, 0.0004427343  ;;  %3556 = vlog2.f32 %v2242_v42  ;;  %844 = vadd.xlane.f32.xlu1 %v843_v10  ;;  %841 = vadd.xlane.f32.xlu0 %v840_v57  ;;  %v1045_v34 = vand.u32 2147483647, %v5499_v38  ;;  %v5518_v43 = vpop.xlane.xlu0 %763 }
 0x205   :  { %v2246_v39 = vadd.f32 1.0, %v2245_v35  ;;  %v2107_v6 = vadd.f32 1.0, %v3551_v48  ;;  %v2110_v44 = vmul.f32 -0.5, %v3551_v48  ;;  %3558 = vpow2.f32 %v1370_v12 }
 0x206   :  { %v3553_v45 = vpop.eup %3552  ;;  %v2382_v30 = vmul.f32 %v3547_v58, %v2381_v1  ;;  %v2113_v21 = vand.u32 2147483647, %v3551_v48  ;;  %3560 = vpow2.f32 %v1458_v8  ;;  %v1173_v17 = vsub.f32 0.0, %v1045_v34 }
 0x207   :  { %v3555_v22 = vpop.eup %3554  ;;  %vm5512_vm0 = vcmp.lt.f32.partialorder %v2248_v59, 0.0004427343  ;;  %3562 = vlog2.f32 %v2107_v6  ;;  %v2111_v19 = vadd.f32 1.0, %v2110_v44  ;;  %v2251_v28 = vadd.f32 1.0, %v3553_v45 }
 0x208   :  { %v2379_v37 = vmul.f32 0.6931472, %v3555_v22  ;;  %v931_v33 = vmin.f32 %v5469_v0, 0.0  ;;  %v2254_v47 = vmul.f32 -0.5, %v3553_v45  ;;  %v2257_v49 = vand.u32 2147483647, %v3553_v45 }
 0x209   :  { %v2247_v50 = vmul.f32 %v3549_v3, %v2246_v39  ;;  %3564 = vlog2.f32 %v2251_v28  ;;  %v1372_v58 = vmul.f32 1.442695, %v1173_v17  ;;  %v1089_v20 = vand.u32 2147483647, %v5510_v2  ;;  %v5534_v17 = vpop.xlane.xlu2 %811 }
 0x20a   :  { %v3557_v10 = vpop.eup %3556  ;;  %v2385_v1 = vsel %vm5504_vm5, %v2382_v30, %v2379_v37  ;;  %v2112_v42 = vmul.f32 %v3551_v48, %v2111_v19  ;;  %vm5522_vm8 = vcmp.lt.f32.partialorder %v2113_v21, 0.0004427343  ;;  %v2255_v12 = vadd.f32 1.0, %v2254_v47 }
 0x20b   :  { %v3559_v0 = vpop.eup %3558  ;;  %v2737_v59 = vsub.f32 %v945_v5, %v2385_v1  ;;  %v2244_v8 = vmul.f32 0.6931472, %v3557_v10  ;;  %vm5526_vm13 = vcmp.lt.f32.partialorder %v2257_v49, 0.0004427343  ;;  %3566 = vpow2.f32 %v1372_v58 }
 0x20c   :  { %v3561_v57 = vpop.eup %3560  ;;  %v2116_v34 = vadd.f32 1.0, %v3559_v0  ;;  %v2119_v39 = vmul.f32 -0.5, %v3559_v0  ;;  %v1217_v6 = vsub.f32 0.0, %v1089_v20  ;;  %v1074_v29 = vand.u32 2147483647, %v5518_v43 }
 0x20d   :  { %v3563_v48 = vpop.eup %3562  ;;  %v3126_v44 = vperm.slane %v2737_v59, %v4054_v7  ;;  %v2250_v30 = vsel %vm5512_vm0, %v2247_v50, %v2244_v8  ;;  %v2512_v21 = vadd.f32 1.0, %v3561_v57  ;;  %v2515_v5 = vmul.f32 -0.5, %v3561_v57 }
 0x20e   :  { %v2722_v22 = vsub.f32 %v930_v63, %v2250_v30  ;;  %v2109_v19 = vmul.f32 0.6931472, %v3563_v48  ;;  %v2256_v28 = vmul.f32 %v3553_v45, %v2255_v12  ;;  %3568 = vlog2.f32 %v2116_v34 }
 0x20f   :  { %v3565_v37 = vpop.eup %3564  ;;  %v5539_v47 = vsel %vm2916_vm7, %v3126_v44, %v3125_v36  ;;  %v2120_v49 = vadd.f32 1.0, %v2119_v39  ;;  %v2122_v58 = vand.u32 2147483647, %v3559_v0  ;;  %3570 = vlog2.f32 %v2512_v21  ;;  %v5560_v21 = vpop.xlane.xlu1 %766 }
 0x210   :  { %v3097_v13 = vperm.slane %v2722_v22, %v4028_v41  ;;  %v2115_v50 = vsel %vm5522_vm8, %v2112_v42, %v2109_v19  ;;  %v2253_v20 = vmul.f32 0.6931472, %v3565_v37  ;;  %v2516_v10 = vadd.f32 1.0, %v2515_v5  ;;  %v5562_v19 = vpop.xlane.xlu0 %721 }
 0x211   :  { %v3567_v1 = vpop.eup %3566  ;;  %v2707_v31 = vsub.f32 %v915_v14, %v2115_v50  ;;  %v916_v63 = vmin.f32 %v5476_v54, 0.0  ;;  %v960_v45 = vmin.f32 %v5478_v18, 0.0  ;;  %v1460_v36 = vmul.f32 1.442695, %v1217_v6 }
 0x212   :  { %v3098_v12 = vsel %vm2920_vm10, %v3097_v13, %v5421_v24  ;;  %v2259_v59 = vsel %vm5526_vm13, %v2256_v28, %v2253_v20  ;;  %v2125_v8 = vadd.f32 1.0, %v3567_v1  ;;  %v2128_v35 = vmul.f32 -0.5, %v3567_v1 }
 0x213   :  { %v3068_v42 = vperm.slane %v2707_v31, %v4040_v55  ;;  %v2723_v34 = vsub.f32 %v931_v33, %v2259_v59  ;;  %vm5553_vm5 = vcmp.lt.f32.partialorder %v2122_v58, 0.0004427343  ;;  %v2518_v52 = vand.u32 2147483647, %v3561_v57 }
 0x214   :  { %v3569_v54 = vpop.eup %3568  ;;  %v2121_v14 = vmul.f32 %v3559_v0, %v2120_v49  ;;  %v2517_v18 = vmul.f32 %v3561_v57, %v2516_v10  ;;  %3572 = vlog2.f32 %v2125_v8  ;;  %v1202_v6 = vsub.f32 0.0, %v1074_v29  ;;  %v5570_v29 = vpop.xlane.xlu2 %769 }
 0x215   :  { %v3571_v48 = vpop.eup %3570  ;;  %v3069_v24 = vsel %vm2924_vm11, %v3068_v42, %v5448_v32  ;;  %v3099_v3 = vperm.slane %v2723_v34, %v4040_v55  ;;  %v2118_v44 = vmul.f32 0.6931472, %v3569_v54  ;;  %v2129_v30 = vadd.f32 1.0, %v2128_v35 }
 0x216   :  { %v2514_v33 = vmul.f32 0.6931472, %v3571_v48  ;;  %v2131_v5 = vand.u32 2147483647, %v3567_v1  ;;  %3574 = vpow2.f32 %v1460_v36  ;;  %v1430_v22 = vmul.f32 1.442695, %v1202_v6 }
 0x217   :  { %v5565_v0 = vsel %vm2924_vm11, %v3099_v3, %v3098_v12  ;;  %v2124_v57 = vsel %vm5553_vm5, %v2121_v14, %v2118_v44  ;;  %vm2519_vm0 = vcmp.lt.f32.partialorder %v2518_v52, 0.0004427343  ;;  %v1090_v32 = vand.u32 2147483647, %v5534_v17 }
 0x218   :  { %v2708_v28 = vsub.f32 %v916_v63, %v2124_v57  ;;  %v2520_v37 = vsel %vm2519_vm0, %v2517_v18, %v2514_v33  ;;  %3576 = vpow2.f32 %v1430_v22  ;;  %v1075_v49 = vand.u32 2147483647, %v5560_v21 }
 0x219   :  { %v2752_v58 = vsub.f32 %v960_v45, %v2520_v37  ;;  %v2130_v13 = vmul.f32 %v3567_v1, %v2129_v30  ;;  %v1218_v50 = vsub.f32 0.0, %v1090_v32  ;;  %v1060_v20 = vand.u32 2147483647, %v5562_v19  ;;  %v5589_v30 = vpop.xlane.xlu1 %724 }
 0x21a   :  { %v3573_v10 = vpop.eup %3572  ;;  %v3070_v31 = vperm.slane %v2708_v28, %v4139_v27  ;;  %vm5575_vm8 = vcmp.lt.f32.partialorder %v2131_v5, 0.0004427343  ;;  %v1203_v12 = vsub.f32 0.0, %v1075_v49  ;;  %v1076_v59 = vand.u32 2147483647, %v5570_v29 }
 0x21b   :  { %v3155_v63 = vperm.slane %v2752_v58, %v4036_v53  ;;  %v2127_v8 = vmul.f32 0.6931472, %v3573_v10  ;;  %v1462_v35 = vmul.f32 1.442695, %v1218_v50  ;;  %v1188_v42 = vsub.f32 0.0, %v1060_v20 }
 0x21c   :  { %v3575_v45 = vpop.eup %3574  ;;  %v3071_v1 = vsel %vm2928_vm14, %v3070_v31, %v3069_v24  ;;  %v917_v34 = vmin.f32 %v5499_v38, 0.0  ;;  %v1432_v39 = vmul.f32 1.442695, %v1203_v12  ;;  %v1204_v52 = vsub.f32 0.0, %v1076_v59  ;;  %v5601_v50 = vpop.xlane.xlu2 %727 }
 0x21d   :  { %v5585_v54 = vsel %vm2912_vm6, %v3155_v63, %v5484_v62  ;;  %v2133_v14 = vsel %vm5575_vm8, %v2130_v13, %v2127_v8  ;;  %v2521_v18 = vadd.f32 1.0, %v3575_v45  ;;  %v2524_v6 = vmul.f32 -0.5, %v3575_v45  ;;  %v5592_v62 = vpop.xlane.xlu0 %679 }
 0x21e   :  { %v3577_v53 = vpop.eup %3576  ;;  %v2709_v48 = vsub.f32 %v917_v34, %v2133_v14  ;;  %3578 = vpow2.f32 %v1462_v35  ;;  %v1402_v3 = vmul.f32 1.442695, %v1188_v42  ;;  %v2527_v33 = vand.u32 2147483647, %v3575_v45 }
 0x21f   :  { %3580 = vlog2.f32 %v2521_v18  ;;  %v2386_v44 = vadd.f32 1.0, %v3577_v53  ;;  %v2389_v24 = vmul.f32 -0.5, %v3577_v53  ;;  %v2525_v5 = vadd.f32 1.0, %v2524_v6 }
 0x220   :  { %v3072_v38 = vperm.slane %v2709_v48, %v4106_v16  ;;  %3582 = vpow2.f32 %v1432_v39  ;;  %v2392_v22 = vand.u32 2147483647, %v3577_v53  ;;  %v1434_v57 = vmul.f32 1.442695, %v1204_v52 }
 0x221   :  { %3584 = vlog2.f32 %v2386_v44  ;;  %v2390_v28 = vadd.f32 1.0, %v2389_v24  ;;  %v1061_v37 = vand.u32 2147483647, %v5589_v30  ;;  %v961_v49 = vmin.f32 %v5510_v2, 0.0 }
 0x222   :  { %v5595_v32 = vsel %vm2932_vm15, %v3072_v38, %v3071_v1  ;;  %3586 = vpow2.f32 %v1402_v3  ;;  %v946_v58 = vmin.f32 %v5518_v43, 0.0  ;;  %v1046_v13 = vand.u32 2147483647, %v5592_v62 }
 0x223   :  { %3588 = vpow2.f32 %v1434_v57  ;;  %vm5603_vm6 = vcmp.lt.f32.partialorder %v2527_v33, 0.0004427343  ;;  %v962_v31 = vmin.f32 %v5534_v17, 0.0  ;;  %v947_v36 = vmin.f32 %v5560_v21, 0.0 }
 0x224   :  { %v3579_v20 = vpop.eup %3578  ;;  %v932_v12 = vmin.f32 %v5562_v19, 0.0  ;;  %v2526_v2 = vmul.f32 %v3575_v45, %v2525_v5  ;;  %vm5610_vm13 = vcmp.lt.f32.partialorder %v2392_v22, 0.0004427343  ;;  %v2391_v1 = vmul.f32 %v3577_v53, %v2390_v28 }
 0x225   :  { %v3581_v59 = vpop.eup %3580  ;;  %v2530_v63 = vadd.f32 1.0, %v3579_v20  ;;  %v2533_v8 = vmul.f32 -0.5, %v3579_v20  ;;  %v1189_v34 = vsub.f32 0.0, %v1061_v37  ;;  %v1062_v39 = vand.u32 2147483647, %v5601_v50 }
 0x226   :  { %v3583_v35 = vpop.eup %3582  ;;  %v2523_v42 = vmul.f32 0.6931472, %v3581_v59  ;;  %v2536_v17 = vand.u32 2147483647, %v3579_v20  ;;  %v1174_v18 = vsub.f32 0.0, %v1046_v13  ;;  %v5620_v59 = vpop.xlane.xlu1 %682 }
 0x227   :  { %v3585_v52 = vpop.eup %3584  ;;  %3590 = vlog2.f32 %v2530_v63  ;;  %v2395_v14 = vadd.f32 1.0, %v3583_v35  ;;  %v2534_v3 = vadd.f32 1.0, %v2533_v8  ;;  %v2398_v44 = vmul.f32 -0.5, %v3583_v35 }
 0x228   :  { %v3587_v6 = vpop.eup %3586  ;;  %v2529_v45 = vsel %vm5603_vm6, %v2526_v2, %v2523_v42  ;;  %v2388_v48 = vmul.f32 0.6931472, %v3585_v52  ;;  %v2401_v33 = vand.u32 2147483647, %v3583_v35  ;;  %v1404_v28 = vmul.f32 1.442695, %v1189_v34  ;;  %v5633_v52 = vpop.xlane.xlu0 %814 }
 0x229   :  { %v3589_v24 = vpop.eup %3588  ;;  %v2753_v38 = vsub.f32 %v961_v49, %v2529_v45  ;;  %3592 = vlog2.f32 %v2395_v14  ;;  %v2260_v53 = vadd.f32 1.0, %v3587_v6  ;;  %v2399_v22 = vadd.f32 1.0, %v2398_v44 }
 0x22a   :  { %v2394_v5 = vsel %vm5610_vm13, %v2391_v1, %v2388_v48  ;;  %v2263_v57 = vmul.f32 -0.5, %v3587_v6  ;;  %v1190_v10 = vsub.f32 0.0, %v1062_v39  ;;  %v2535_v2 = vmul.f32 %v3579_v20, %v2534_v3 }
 0x22b   :  { %v3157_v37 = vperm.slane %v2753_v38, %v4054_v7  ;;  %v2738_v13 = vsub.f32 %v946_v58, %v2394_v5  ;;  %3594 = vlog2.f32 %v2260_v53  ;;  %vm5622_vm5 = vcmp.lt.f32.partialorder %v2536_v17, 0.0004427343 }
 0x22c   :  { %v2404_v49 = vadd.f32 1.0, %v3589_v24  ;;  %v2407_v8 = vmul.f32 -0.5, %v3589_v24  ;;  %vm5629_vm0 = vcmp.lt.f32.partialorder %v2401_v33, 0.0004427343  ;;  %v2266_v58 = vand.u32 2147483647, %v3587_v6 }
 0x22d   :  { %v3591_v42 = vpop.eup %3590  ;;  %v3158_v43 = vsel %vm2916_vm7, %v3157_v37, %v5585_v54  ;;  %v3128_v1 = vperm.slane %v2738_v13, %v4028_v41  ;;  %v2400_v39 = vmul.f32 %v3583_v35, %v2399_v22  ;;  %v2264_v20 = vadd.f32 1.0, %v2263_v57 }
 0x22e   :  { %v2532_v34 = vmul.f32 0.6931472, %v3591_v42  ;;  %3596 = vlog2.f32 %v2404_v49  ;;  %v2408_v45 = vadd.f32 1.0, %v2407_v8  ;;  %v1374_v54 = vmul.f32 1.442695, %v1174_v18  ;;  %v5650_v49 = vpop.xlane.xlu2 %685 }
 0x22f   :  { %v3593_v17 = vpop.eup %3592  ;;  %v3129_v14 = vsel %vm2920_vm10, %v3128_v1, %v5539_v47  ;;  %3598 = vpow2.f32 %v1404_v28  ;;  %v2410_v44 = vand.u32 2147483647, %v3589_v24  ;;  %v1406_v38 = vmul.f32 1.442695, %v1190_v10 }
 0x230   :  { %v2538_v48 = vsel %vm5622_vm5, %v2535_v2, %v2532_v34  ;;  %v2397_v3 = vmul.f32 0.6931472, %v3593_v17  ;;  %3600 = vpow2.f32 %v1374_v54  ;;  %v1047_v35 = vand.u32 2147483647, %v5620_v59 }
 0x231   :  { %v3595_v33 = vpop.eup %3594  ;;  %v2754_v53 = vsub.f32 %v962_v31, %v2538_v48  ;;  %v1091_v5 = vand.u32 2147483647, %v5633_v52  ;;  %v2265_v57 = vmul.f32 %v3587_v6, %v2264_v20  ;;  %3602 = vpow2.f32 %v1406_v38 }
 0x232   :  { %v2403_v22 = vsel %vm5629_vm0, %v2400_v39, %v2397_v3  ;;  %v2262_v47 = vmul.f32 0.6931472, %v3595_v33  ;;  %vm2267_vm7 = vcmp.lt.f32.partialorder %v2266_v58, 0.0004427343  ;;  %v2409_v37 = vmul.f32 %v3589_v24, %v2408_v45  ;;  %v5658_v24 = vpop.xlane.xlu1 %817 }
 0x233   :  { %v3159_v18 = vperm.slane %v2754_v53, %v4028_v41  ;;  %v2739_v28 = vsub.f32 %v947_v36, %v2403_v22  ;;  %vm5646_vm8 = vcmp.lt.f32.partialorder %v2410_v44, 0.0004427343  ;;  %v1175_v2 = vsub.f32 0.0, %v1047_v35 }
 0x234   :  { %v3597_v13 = vpop.eup %3596  ;;  %v2268_v31 = vsel %vm2267_vm7, %v2265_v57, %v2262_v47  ;;  %v1219_v63 = vsub.f32 0.0, %v1091_v5  ;;  %v948_v42 = vmin.f32 %v5570_v29, 0.0  ;;  %v933_v1 = vmin.f32 %v5589_v30, 0.0 }
 0x235   :  { %v3599_v8 = vpop.eup %3598  ;;  %v5653_v6 = vsel %vm2920_vm10, %v3159_v18, %v3158_v43  ;;  %v3130_v41 = vperm.slane %v2739_v28, %v4040_v55  ;;  %v2724_v21 = vsub.f32 %v932_v12, %v2268_v31  ;;  %v2406_v36 = vmul.f32 0.6931472, %v3597_v13 }
 0x236   :  { %v2269_v7 = vadd.f32 1.0, %v3599_v8  ;;  %v918_v58 = vmin.f32 %v5592_v62, 0.0  ;;  %v3601_v34 = vpop.eup %3600  ;;  %v2272_v19 = vmul.f32 -0.5, %v3599_v8  ;;  %v1048_v45 = vand.u32 2147483647, %v5650_v49 }
 0x237   :  { %v3131_v39 = vsel %vm2924_vm11, %v3130_v41, %v3129_v14  ;;  %v3101_v43 = vperm.slane %v2724_v21, %v4139_v27  ;;  %v2412_v20 = vsel %vm5646_vm8, %v2409_v37, %v2406_v36  ;;  %v3603_v12 = vpop.eup %3602  ;;  %v1092_v29 = vand.u32 2147483647, %v5658_v24 }
 0x238   :  { %v2740_v17 = vsub.f32 %v948_v42, %v2412_v20  ;;  %3604 = vlog2.f32 %v2269_v7  ;;  %v2134_v54 = vadd.f32 1.0, %v3601_v34  ;;  %v1376_v48 = vmul.f32 1.442695, %v1175_v2 }
 0x239   :  { %v3102_v30 = vsel %vm2928_vm14, %v3101_v43, %v5565_v0  ;;  %v1464_v3 = vmul.f32 1.442695, %v1219_v63  ;;  %v2137_v44 = vmul.f32 -0.5, %v3601_v34  ;;  %v2278_v38 = vadd.f32 1.0, %v3603_v12  ;;  %v5676_v0 = vpop.xlane.xlu0 %772  ;;  %v5679_v63 = vpop.xlane.xlu2 %820 }
 0x23a   :  { %v3132_v14 = vperm.slane %v2740_v17, %v4139_v27  ;;  %v2281_v33 = vmul.f32 -0.5, %v3603_v12  ;;  %v2273_v53 = vadd.f32 1.0, %v2272_v19  ;;  %v2275_v35 = vand.u32 2147483647, %v3599_v8 }
 0x23b   :  { %3606 = vlog2.f32 %v2134_v54  ;;  %v934_v5 = vmin.f32 %v5601_v50, 0.0  ;;  %v2140_v47 = vand.u32 2147483647, %v3601_v34  ;;  %v1176_v57 = vsub.f32 0.0, %v1048_v45 }
 0x23c   :  { %v5674_v22 = vsel %vm2928_vm14, %v3132_v14, %v3131_v39  ;;  %3608 = vlog2.f32 %v2278_v38  ;;  %v2282_v18 = vadd.f32 1.0, %v2281_v33  ;;  %v919_v28 = vmin.f32 %v5620_v59, 0.0  ;;  %v5687_v39 = vpop.xlane.xlu1 %775 }
 0x23d   :  { %3610 = vpow2.f32 %v1376_v48  ;;  %v1220_v37 = vsub.f32 0.0, %v1092_v29  ;;  %v2138_v31 = vadd.f32 1.0, %v2137_v44  ;;  %v2284_v10 = vand.u32 2147483647, %v3603_v12 }
 0x23e   :  { %v3605_v13 = vpop.eup %3604  ;;  %3612 = vpow2.f32 %v1464_v3  ;;  %v1378_v2 = vmul.f32 1.442695, %v1176_v57  ;;  %v2274_v41 = vmul.f32 %v3599_v8, %v2273_v53  ;;  %v1077_v36 = vand.u32 2147483647, %v5676_v0 }
 0x23f   :  { %v2271_v50 = vmul.f32 0.6931472, %v3605_v13  ;;  %v1466_v21 = vmul.f32 1.442695, %v1220_v37  ;;  %vm2276_vm10 = vcmp.lt.f32.partialorder %v2275_v35, 0.0004427343  ;;  %v2283_v19 = vmul.f32 %v3603_v12, %v2282_v18 }
 0x240   :  { %vm5682_vm6 = vcmp.lt.f32.partialorder %v2140_v47, 0.0004427343  ;;  %v963_v7 = vmin.f32 %v5633_v52, 0.0  ;;  %3614 = vpow2.f32 %v1378_v2  ;;  %v1093_v17 = vand.u32 2147483647, %v5679_v63 }
 0x241   :  { %v3607_v43 = vpop.eup %3606  ;;  %v2277_v20 = vsel %vm2276_vm10, %v2274_v41, %v2271_v50  ;;  %3616 = vpow2.f32 %v1466_v21  ;;  %v2139_v54 = vmul.f32 %v3601_v34, %v2138_v31  ;;  %vm5690_vm13 = vcmp.lt.f32.partialorder %v2284_v10, 0.0004427343 }
 0x242   :  { %v3609_v8 = vpop.eup %3608  ;;  %v2725_v45 = vsub.f32 %v933_v1, %v2277_v20  ;;  %v2136_v29 = vmul.f32 0.6931472, %v3607_v43  ;;  %v920_v44 = vmin.f32 %v5650_v49, 0.0  ;;  %v1205_v38 = vsub.f32 0.0, %v1077_v36 }
 0x243   :  { %v3611_v3 = vpop.eup %3610  ;;  %v2280_v14 = vmul.f32 0.6931472, %v3609_v8  ;;  %v1078_v33 = vand.u32 2147483647, %v5687_v39  ;;  %v1221_v37 = vsub.f32 0.0, %v1093_v17  ;;  %v964_v8 = vmin.f32 %v5658_v24, 0.0 }
 0x244   :  { %v3613_v53 = vpop.eup %3612  ;;  %v3103_v12 = vperm.slane %v2725_v45, %v4106_v16  ;;  %v2142_v35 = vsel %vm5682_vm6, %v2139_v54, %v2136_v29  ;;  %v2143_v1 = vadd.f32 1.0, %v3611_v3  ;;  %v2146_v47 = vmul.f32 -0.5, %v3611_v3 }
 0x245   :  { %v2710_v34 = vsub.f32 %v918_v58, %v2142_v35  ;;  %v2286_v57 = vsel %vm5690_vm13, %v2283_v19, %v2280_v14  ;;  %v2539_v18 = vadd.f32 1.0, %v3613_v53  ;;  %v2149_v2 = vand.u32 2147483647, %v3611_v3 }
 0x246   :  { %v3615_v13 = vpop.eup %3614  ;;  %v3104_v31 = vsel %vm2932_vm15, %v3103_v12, %v3102_v30  ;;  %v2726_v10 = vsub.f32 %v934_v5, %v2286_v57  ;;  %3618 = vlog2.f32 %v2143_v1  ;;  %v2147_v21 = vadd.f32 1.0, %v2146_v47 }
 0x247   :  { %v3617_v50 = vpop.eup %3616  ;;  %v3074_v41 = vperm.slane %v2710_v34, %v4079_v51  ;;  %3620 = vlog2.f32 %v2539_v18  ;;  %v2542_v36 = vmul.f32 -0.5, %v3613_v53  ;;  %v2152_v58 = vadd.f32 1.0, %v3615_v13 }
 0x248   :  { %v3105_v62 = vperm.slane %v2726_v10, %v4079_v51  ;;  %v1436_v42 = vmul.f32 1.442695, %v1205_v38  ;;  %v1206_v43 = vsub.f32 0.0, %v1078_v33  ;;  %v2545_v17 = vand.u32 2147483647, %v3613_v53  ;;  %v5716_v38 = vpop.xlane.xlu0 %730 }
 0x249   :  { %v3075_v20 = vsel %vm2936_vm2, %v3074_v41, %v5595_v32  ;;  %v2543_v19 = vadd.f32 1.0, %v2542_v36  ;;  %v2155_v30 = vmul.f32 -0.5, %v3615_v13  ;;  %3622 = vlog2.f32 %v2152_v58  ;;  %v5727_v41 = vpop.xlane.xlu1 %733 }
 0x24a   :  { %v5709_v5 = vsel %vm2936_vm2, %v3105_v62, %v3104_v31  ;;  %v2548_v45 = vadd.f32 1.0, %v3617_v50  ;;  %v2148_v29 = vmul.f32 %v3611_v3, %v2147_v21  ;;  %vm5712_vm5 = vcmp.lt.f32.partialorder %v2149_v2, 0.0004427343  ;;  %v5722_v31 = vpop.xlane.xlu2 %778 }
 0x24b   :  { %v2156_v48 = vadd.f32 1.0, %v2155_v30  ;;  %v2551_v14 = vmul.f32 -0.5, %v3617_v50  ;;  %v2158_v33 = vand.u32 2147483647, %v3615_v13  ;;  %v1468_v12 = vmul.f32 1.442695, %v1221_v37 }
 0x24c   :  { %v3619_v32 = vpop.eup %3618  ;;  %3624 = vlog2.f32 %v2548_v45  ;;  %v1438_v35 = vmul.f32 1.442695, %v1206_v43  ;;  %v2544_v34 = vmul.f32 %v3613_v53, %v2543_v19  ;;  %vm5718_vm0 = vcmp.lt.f32.partialorder %v2545_v17, 0.0004427343 }
 0x24d   :  { %v3621_v1 = vpop.eup %3620  ;;  %v2145_v47 = vmul.f32 0.6931472, %v3619_v32  ;;  %3626 = vpow2.f32 %v1436_v42  ;;  %v2552_v57 = vadd.f32 1.0, %v2551_v14  ;;  %v2554_v18 = vand.u32 2147483647, %v3617_v50 }
 0x24e   :  { %v2541_v3 = vmul.f32 0.6931472, %v3621_v1  ;;  %3628 = vpow2.f32 %v1468_v12  ;;  %v2157_v2 = vmul.f32 %v3615_v13, %v2156_v48  ;;  %v1063_v37 = vand.u32 2147483647, %v5716_v38 }
 0x24f   :  { %v2151_v10 = vsel %vm5712_vm5, %v2148_v29, %v2145_v47  ;;  %3630 = vpow2.f32 %v1438_v35  ;;  %v3623_v53 = vpop.eup %3622  ;;  %vm5733_vm7 = vcmp.lt.f32.partialorder %v2158_v33, 0.0004427343  ;;  %v949_v58 = vmin.f32 %v5676_v0, 0.0 }
 0x250   :  { %v2711_v21 = vsub.f32 %v919_v28, %v2151_v10  ;;  %v2547_v36 = vsel %vm5718_vm0, %v2544_v34, %v2541_v3  ;;  %v2154_v42 = vmul.f32 0.6931472, %v3623_v53  ;;  %v965_v43 = vmin.f32 %v5679_v63, 0.0  ;;  %v5758_v24 = vpop.xlane.xlu0 %688 }
 0x251   :  { %v2755_v13 = vsub.f32 %v963_v7, %v2547_v36  ;;  %v1079_v19 = vand.u32 2147483647, %v5722_v31  ;;  %v2553_v28 = vmul.f32 %v3617_v50, %v2552_v57  ;;  %vm5743_vm8 = vcmp.lt.f32.partialorder %v2554_v18, 0.0004427343 }
 0x252   :  { %v3625_v17 = vpop.eup %3624  ;;  %v3076_v59 = vperm.slane %v2711_v21, %v4207_v9  ;;  %v1064_v45 = vand.u32 2147483647, %v5727_v41  ;;  %v2160_v52 = vsel %vm5733_vm7, %v2157_v2, %v2154_v42  ;;  %v1191_v48 = vsub.f32 0.0, %v1063_v37 }
 0x253   :  { %v3627_v29 = vpop.eup %3626  ;;  %v3161_v54 = vperm.slane %v2755_v13, %v4040_v55  ;;  %v2550_v7 = vmul.f32 0.6931472, %v3625_v17  ;;  %v2712_v50 = vsub.f32 %v920_v44, %v2160_v52  ;;  %v1207_v34 = vsub.f32 0.0, %v1079_v19  ;;  %v5766_v13 = vpop.xlane.xlu2 %736 }
 0x254   :  { %v3629_v14 = vpop.eup %3628  ;;  %v3077_v32 = vsel %vm2940_vm4, %v3076_v59, %v3075_v20  ;;  %v2413_v33 = vadd.f32 1.0, %v3627_v29  ;;  %v2416_v12 = vmul.f32 -0.5, %v3627_v29  ;;  %v1192_v20 = vsub.f32 0.0, %v1064_v45 }
 0x255   :  { %v3631_v35 = vpop.eup %3630  ;;  %v3162_v1 = vsel %vm2924_vm11, %v3161_v54, %v5653_v6  ;;  %v2556_v55 = vsel %vm5743_vm8, %v2553_v28, %v2550_v7  ;;  %v2557_v47 = vadd.f32 1.0, %v3629_v14  ;;  %v3078_v3 = vperm.slane %v2712_v50, %v4196_v26 }
 0x256   :  { %v2756_v57 = vsub.f32 %v964_v8, %v2556_v55  ;;  %3632 = vlog2.f32 %v2413_v33  ;;  %v2417_v49 = vadd.f32 1.0, %v2416_v12  ;;  %v2560_v44 = vmul.f32 -0.5, %v3629_v14 }
 0x257   :  { %3634 = vlog2.f32 %v2557_v47  ;;  %v1408_v18 = vmul.f32 1.442695, %v1191_v48  ;;  %vm6372_vm10 = vcmask 720512   ;;  %v2422_v2 = vadd.f32 1.0, %v3631_v35 }
 0x258   :  { %v5762_v10 = vsel %vm6372_vm10, %v3078_v3, %v3077_v32  ;;  %v3163_v6 = vperm.slane %v2756_v57, %v4139_v27  ;;  %v1049_v37 = vand.u32 2147483647, %v5758_v24  ;;  %v2419_v53 = vand.u32 2147483647, %v3627_v29  ;;  %v5783_v55 = vpop.xlane.xlu0 %823  ;;  %vm6383_vm7 = vmmov %vm6372_vm10 }
 0x259   :  { %v2561_v21 = vadd.f32 1.0, %v2560_v44  ;;  %v2563_v36 = vand.u32 2147483647, %v3629_v14  ;;  %v2425_v62 = vmul.f32 -0.5, %v3631_v35  ;;  %3636 = vlog2.f32 %v2422_v2 }
 0x25a   :  { %v3164_v8 = vsel %vm2928_vm14, %v3163_v6, %v3162_v1  ;;  %v1440_v42 = vmul.f32 1.442695, %v1207_v34  ;;  %v1410_v19 = vmul.f32 1.442695, %v1192_v20  ;;  %v2418_v17 = vmul.f32 %v3627_v29, %v2417_v49 }
 0x25b   :  { %v950_v59 = vmin.f32 %v5687_v39, 0.0  ;;  %v2428_v28 = vand.u32 2147483647, %v3631_v35  ;;  %3638 = vpow2.f32 %v1408_v18  ;;  %v2562_v30 = vmul.f32 %v3629_v14, %v2561_v21  ;;  %v5775_v39 = vpop.xlane.xlu1 %691 }
 0x25c   :  { %v3633_v27 = vpop.eup %3632  ;;  %3640 = vpow2.f32 %v1440_v42  ;;  %v1177_v45 = vsub.f32 0.0, %v1049_v37  ;;  %v1065_v54 = vand.u32 2147483647, %v5766_v13  ;;  %vm5771_vm11 = vcmp.lt.f32.partialorder %v2563_v36, 0.0004427343 }
 0x25d   :  { %v3635_v52 = vpop.eup %3634  ;;  %v2415_v7 = vmul.f32 0.6931472, %v3633_v27  ;;  %v2426_v32 = vadd.f32 1.0, %v2425_v62  ;;  %3642 = vpow2.f32 %v1410_v19  ;;  %vm2420_vm14 = vcmp.lt.f32.partialorder %v2419_v53, 0.0004427343 }
 0x25e   :  { %v2559_v29 = vmul.f32 0.6931472, %v3635_v52  ;;  %v1380_v50 = vmul.f32 1.442695, %v1177_v45  ;;  %vm5777_vm6 = vcmp.lt.f32.partialorder %v2428_v28, 0.0004427343 }
 0x25f   :  { %v2421_v33 = vsel %vm2420_vm14, %v2418_v17, %v2415_v7  ;;  %v935_v12 = vmin.f32 %v5716_v38, 0.0  ;;  %v936_v1 = vmin.f32 %v5727_v41, 0.0  ;;  %v3637_v47 = vpop.eup %3636  ;;  %v1193_v57 = vsub.f32 0.0, %v1065_v54 }
 0x260   :  { %v2741_v34 = vsub.f32 %v949_v58, %v2421_v33  ;;  %v2565_v3 = vsel %vm5771_vm11, %v2562_v30, %v2559_v29  ;;  %3644 = vpow2.f32 %v1380_v50  ;;  %v2424_v44 = vmul.f32 0.6931472, %v3637_v47  ;;  %v5805_v50 = vpop.xlane.xlu2 %694 }
 0x261   :  { %v3639_v20 = vpop.eup %3638  ;;  %v2757_v49 = vsub.f32 %v965_v43, %v2565_v3  ;;  %v2427_v18 = vmul.f32 %v3631_v35, %v2426_v32  ;;  %v1050_v6 = vand.u32 2147483647, %v5775_v39  ;;  %v1094_v0 = vand.u32 2147483647, %v5783_v55 }
 0x262   :  { %v3641_v2 = vpop.eup %3640  ;;  %v3134_v37 = vperm.slane %v2741_v34, %v4106_v16  ;;  %v2287_v53 = vadd.f32 1.0, %v3639_v20  ;;  %v2290_v21 = vmul.f32 -0.5, %v3639_v20  ;;  %v1412_v19 = vmul.f32 1.442695, %v1193_v57 }
 0x263   :  { %v3643_v58 = vpop.eup %3642  ;;  %v3165_v36 = vperm.slane %v2757_v49, %v4106_v16  ;;  %v2430_v62 = vsel %vm5777_vm6, %v2427_v18, %v2424_v44  ;;  %v2431_v42 = vadd.f32 1.0, %v3641_v2  ;;  %v2434_v63 = vmul.f32 -0.5, %v3641_v2 }
 0x264   :  { %v3135_v43 = vsel %vm2932_vm15, %v3134_v37, %v5674_v22  ;;  %v2742_v35 = vsub.f32 %v950_v59, %v2430_v62  ;;  %3646 = vlog2.f32 %v2287_v53  ;;  %v1178_v27 = vsub.f32 0.0, %v1050_v6 }
 0x265   :  { %v5800_v17 = vsel %vm2932_vm15, %v3165_v36, %v3164_v8  ;;  %3648 = vlog2.f32 %v2431_v42  ;;  %v2435_v28 = vadd.f32 1.0, %v2434_v63  ;;  %v2437_v45 = vand.u32 2147483647, %v3641_v2  ;;  %v5819_v42 = vpop.xlane.xlu0 %781 }
 0x266   :  { %v3645_v30 = vpop.eup %3644  ;;  %v3136_v16 = vperm.slane %v2742_v35, %v4079_v51  ;;  %v2296_v54 = vadd.f32 1.0, %v3643_v58  ;;  %v1222_v52 = vsub.f32 0.0, %v1094_v0  ;;  %v2291_v7 = vadd.f32 1.0, %v2290_v21  ;;  %v5812_v21 = vpop.xlane.xlu1 %826 }
 0x267   :  { %v951_v48 = vmin.f32 %v5722_v31, 0.0  ;;  %v2299_v32 = vmul.f32 -0.5, %v3643_v58  ;;  %v2161_v22 = vadd.f32 1.0, %v3645_v30  ;;  %v2293_v29 = vand.u32 2147483647, %v3639_v20 }
 0x268   :  { %v3137_v59 = vsel %vm2936_vm2, %v3136_v16, %v3135_v43  ;;  %3650 = vlog2.f32 %v2296_v54  ;;  %v2164_v8 = vmul.f32 -0.5, %v3645_v30  ;;  %v2436_v33 = vmul.f32 %v3641_v2, %v2435_v28 }
 0x269   :  { %vm5807_vm15 = vcmp.lt.f32.partialorder %v2437_v45, 0.0004427343  ;;  %v2302_v47 = vand.u32 2147483647, %v3643_v58  ;;  %3652 = vlog2.f32 %v2161_v22  ;;  %v2300_v3 = vadd.f32 1.0, %v2299_v32 }
 0x26a   :  { %v3647_v34 = vpop.eup %3646  ;;  %3654 = vpow2.f32 %v1412_v19  ;;  %v1382_v31 = vmul.f32 1.442695, %v1178_v27  ;;  %v1470_v57 = vmul.f32 1.442695, %v1222_v52  ;;  %v2292_v18 = vmul.f32 %v3639_v20, %v2291_v7 }
 0x26b   :  { %v3649_v49 = vpop.eup %3648  ;;  %v2289_v44 = vmul.f32 0.6931472, %v3647_v34  ;;  %v2167_v6 = vand.u32 2147483647, %v3645_v30  ;;  %v1051_v37 = vand.u32 2147483647, %v5805_v50  ;;  %v2301_v35 = vmul.f32 %v3643_v58, %v2300_v3 }
 0x26c   :  { %vm2294_vm13 = vcmp.lt.f32.partialorder %v2293_v29, 0.0004427343  ;;  %v2433_v53 = vmul.f32 0.6931472, %v3649_v49  ;;  %v2165_v2 = vadd.f32 1.0, %v2164_v8  ;;  %3656 = vpow2.f32 %v1382_v31 }
 0x26d   :  { %v2295_v0 = vsel %vm2294_vm13, %v2292_v18, %v2289_v44  ;;  %vm5814_vm5 = vcmp.lt.f32.partialorder %v2302_v47, 0.0004427343  ;;  %v921_v62 = vmin.f32 %v5758_v24, 0.0  ;;  %3658 = vpow2.f32 %v1470_v57  ;;  %v5844_v57 = vpop.xlane.xlu2 %829 }
 0x26e   :  { %v3651_v20 = vpop.eup %3650  ;;  %v2727_v63 = vsub.f32 %v935_v12, %v2295_v0  ;;  %v2439_v43 = vsel %vm5807_vm15, %v2436_v33, %v2433_v53  ;;  %v1179_v19 = vsub.f32 0.0, %v1051_v37  ;;  %vm5825_vm0 = vcmp.lt.f32.partialorder %v2167_v6, 0.0004427343 }
 0x26f   :  { %v3653_v28 = vpop.eup %3652  ;;  %v2743_v27 = vsub.f32 %v951_v48, %v2439_v43  ;;  %v2298_v16 = vmul.f32 0.6931472, %v3651_v20  ;;  %v1095_v24 = vand.u32 2147483647, %v5812_v21  ;;  %v2166_v38 = vmul.f32 %v3645_v30, %v2165_v2 }
 0x270   :  { %v3655_v54 = vpop.eup %3654  ;;  %v3107_v52 = vperm.slane %v2727_v63, %v4207_v9  ;;  %v2163_v7 = vmul.f32 0.6931472, %v3653_v28  ;;  %v1080_v12 = vand.u32 2147483647, %v5819_v42  ;;  %v1384_v30 = vmul.f32 1.442695, %v1179_v19 }
 0x271   :  { %v3138_v32 = vperm.slane %v2743_v27, %v4207_v9  ;;  %v2304_v58 = vsel %vm5814_vm5, %v2301_v35, %v2298_v16  ;;  %v2305_v48 = vadd.f32 1.0, %v3655_v54  ;;  %v2308_v22 = vmul.f32 -0.5, %v3655_v54  ;;  %v5856_v16 = vpop.xlane.xlu1 %784  ;;  %vm6390_vm5 = vmmov %vm6383_vm7 }
 0x272   :  { %v3657_v29 = vpop.eup %3656  ;;  %v3108_v8 = vsel %vm2940_vm4, %v3107_v52, %v5709_v5  ;;  %v2728_v33 = vsub.f32 %v936_v1, %v2304_v58  ;;  %v2169_v14 = vsel %vm5825_vm0, %v2166_v38, %v2163_v7  ;;  %v1223_v31 = vsub.f32 0.0, %v1095_v24 }
 0x273   :  { %v3659_v47 = vpop.eup %3658  ;;  %v5842_v34 = vsel %vm2940_vm4, %v3138_v32, %v3137_v59  ;;  %v2713_v3 = vsub.f32 %v921_v62, %v2169_v14  ;;  %3660 = vlog2.f32 %v2305_v48  ;;  %v2309_v44 = vadd.f32 1.0, %v2308_v22 }
 0x274   :  { %v3109_v49 = vperm.slane %v2728_v33, %v4196_v26  ;;  %v2170_v5 = vadd.f32 1.0, %v3657_v29  ;;  %v2173_v18 = vmul.f32 -0.5, %v3657_v29  ;;  %v2311_v1 = vand.u32 2147483647, %v3655_v54 }
 0x275   :  { %v3080_v41 = vperm.slane %v2713_v3, %v4186_v60  ;;  %v2566_v6 = vadd.f32 1.0, %v3659_v47  ;;  %v1208_v37 = vsub.f32 0.0, %v1080_v12  ;;  %v2569_v59 = vmul.f32 -0.5, %v3659_v47  ;;  %v5865_v33 = vpop.xlane.xlu2 %787 }
 0x276   :  { %v3110_v53 = vsel %vm6383_vm7, %v3109_v49, %v3108_v8  ;;  %3662 = vlog2.f32 %v2170_v5  ;;  %vm6384_vm8 = vcmask 786112   ;;  %v2310_v0 = vmul.f32 %v3655_v54, %v2309_v44  ;;  %v5859_v54 = vpop.xlane.xlu0 %739 }
 0x277   :  { %v3081_v2 = vsel %vm6384_vm8, %v3080_v41, %v5762_v10  ;;  %3664 = vlog2.f32 %v2566_v6  ;;  %v2174_v36 = vadd.f32 1.0, %v2173_v18  ;;  %v1472_v62 = vmul.f32 1.442695, %v1223_v31  ;;  %vm6387_vm6 = vmmov %vm6384_vm8 }
 0x278   :  { %vm5851_vm10 = vcmp.lt.f32.partialorder %v2311_v1, 0.0004427343  ;;  %3666 = vpow2.f32 %v1384_v30  ;;  %v1442_v43 = vmul.f32 1.442695, %v1208_v37  ;;  %v1096_v35 = vand.u32 2147483647, %v5844_v57 }
 0x279   :  { %v3661_v20 = vpop.eup %3660  ;;  %v2176_v28 = vand.u32 2147483647, %v3657_v29  ;;  %v2570_v27 = vadd.f32 1.0, %v2569_v59  ;;  %3668 = vpow2.f32 %v1472_v62  ;;  %v937_v10 = vmin.f32 %v5766_v13, 0.0 }
 0x27a   :  { %v2307_v19 = vmul.f32 0.6931472, %v3661_v20  ;;  %v2572_v45 = vand.u32 2147483647, %v3659_v47  ;;  %3670 = vpow2.f32 %v1442_v43  ;;  %v1224_v24 = vsub.f32 0.0, %v1096_v35 }
 0x27b   :  { %v922_v38 = vmin.f32 %v5775_v39, 0.0  ;;  %v2175_v12 = vmul.f32 %v3657_v29, %v2174_v36  ;;  %v1081_v8 = vand.u32 2147483647, %v5856_v16  ;;  %vm2177_vm11 = vcmp.lt.f32.partialorder %v2176_v28, 0.0004427343 }
 0x27c   :  { %v3663_v52 = vpop.eup %3662  ;;  %v2313_v7 = vsel %vm5851_vm10, %v2310_v0, %v2307_v19  ;;  %v1474_v22 = vmul.f32 1.442695, %v1224_v24  ;;  %v2571_v14 = vmul.f32 %v3659_v47, %v2570_v27  ;;  %v1066_v30 = vand.u32 2147483647, %v5859_v54 }
 0x27d   :  { %v3665_v32 = vpop.eup %3664  ;;  %v2729_v58 = vsub.f32 %v937_v10, %v2313_v7  ;;  %v2172_v48 = vmul.f32 0.6931472, %v3663_v52  ;;  %v966_v39 = vmin.f32 %v5783_v55, 0.0  ;;  %vm2573_vm14 = vcmp.lt.f32.partialorder %v2572_v45, 0.0004427343 }
 0x27e   :  { %v2568_v13 = vmul.f32 0.6931472, %v3665_v32  ;;  %v5868_v3 = vpop.eup %3666  ;;  %3672 = vpow2.f32 %v1474_v22  ;;  %v1082_v18 = vand.u32 2147483647, %v5865_v33  ;;  %v1209_v6 = vsub.f32 0.0, %v1081_v8  ;;  %v5890_v52 = vpop.xlane.xlu0 %697 }
 0x27f   :  { %v3111_v31 = vperm.slane %v2729_v58, %v4186_v60  ;;  %v2178_v49 = vsel %vm2177_vm11, %v2175_v12, %v2172_v48  ;;  %v3669_v29 = vpop.eup %3668  ;;  %v2179_v59 = vadd.f32 1.0, %v5868_v3  ;;  %v1194_v36 = vsub.f32 0.0, %v1066_v30 }
 0x280   :  { %v2714_v44 = vsub.f32 %v922_v38, %v2178_v49  ;;  %v2574_v5 = vsel %vm2573_vm14, %v2571_v14, %v2568_v13  ;;  %v3671_v41 = vpop.eup %3670  ;;  %v2575_v0 = vadd.f32 1.0, %v3669_v29  ;;  %v2578_v62 = vmul.f32 -0.5, %v3669_v29  ;;  %vm6403_vm14 = vmmov %vm6387_vm6 }
 0x281   :  { %v5874_v1 = vsel %vm6387_vm6, %v3111_v31, %v3110_v53  ;;  %v2758_v47 = vsub.f32 %v966_v39, %v2574_v5  ;;  %v2440_v20 = vadd.f32 1.0, %v3671_v41  ;;  %v2443_v43 = vmul.f32 -0.5, %v3671_v41 }
 0x282   :  { %v3082_v37 = vperm.slane %v2714_v44, %v4278_v61  ;;  %3674 = vlog2.f32 %v2575_v0  ;;  %v1210_v35 = vsub.f32 0.0, %v1082_v18  ;;  %v2182_v28 = vmul.f32 -0.5, %v5868_v3 }
 0x283   :  { %v3167_v55 = vperm.slane %v2758_v47, %v4079_v51  ;;  %3676 = vlog2.f32 %v2440_v20  ;;  %v1444_v27 = vmul.f32 1.442695, %v1209_v6  ;;  %v1414_v10 = vmul.f32 1.442695, %v1194_v36  ;;  %v5887_v51 = vpop.xlane.xlu1 %742  ;;  %v5902_v6 = vpop.xlane.xlu2 %745 }
 0x284   :  { %v5880_v63 = vsel %vm2952_vm9, %v3082_v37, %v3081_v2  ;;  %v5884_v19 = vpop.eup %3672  ;;  %3678 = vlog2.f32 %v2179_v59  ;;  %v2579_v45 = vadd.f32 1.0, %v2578_v62  ;;  %v2581_v24 = vand.u32 2147483647, %v3669_v29 }
 0x285   :  { %v3168_v53 = vsel %vm2936_vm2, %v3167_v55, %v5800_v17  ;;  %v2584_v2 = vadd.f32 1.0, %v5884_v19  ;;  %v967_v7 = vmin.f32 %v5812_v21, 0.0  ;;  %v2444_v38 = vadd.f32 1.0, %v2443_v43 }
 0x286   :  { %3680 = vpow2.f32 %v1444_v27  ;;  %v1446_v17 = vmul.f32 1.442695, %v1210_v35  ;;  %v2185_v12 = vand.u32 2147483647, %v5868_v3  ;;  %v2446_v32 = vand.u32 2147483647, %v3671_v41 }
 0x287   :  { %3682 = vlog2.f32 %v2584_v2  ;;  %v1067_v58 = vand.u32 2147483647, %v5887_v51  ;;  %v2183_v22 = vadd.f32 1.0, %v2182_v28  ;;  %v952_v8 = vmin.f32 %v5819_v42, 0.0 }
 0x288   :  { %v3675_v48 = vpop.eup %3674  ;;  %3684 = vpow2.f32 %v1414_v10  ;;  %v1052_v13 = vand.u32 2147483647, %v5890_v52  ;;  %v2580_v31 = vmul.f32 %v3669_v29, %v2579_v45  ;;  %vm2582_vm2 = vcmp.lt.f32.partialorder %v2581_v24, 0.0004427343 }
 0x289   :  { %v3677_v14 = vpop.eup %3676  ;;  %v2577_v30 = vmul.f32 0.6931472, %v3675_v48  ;;  %3686 = vpow2.f32 %v1446_v17  ;;  %v2445_v39 = vmul.f32 %v3671_v41, %v2444_v38  ;;  %v2587_v44 = vmul.f32 -0.5, %v5884_v19 }
 0x28a   :  { %v3679_v21 = vpop.eup %3678  ;;  %v2442_v49 = vmul.f32 0.6931472, %v3677_v14  ;;  %v1195_v5 = vsub.f32 0.0, %v1067_v58  ;;  %vm5898_vm15 = vcmp.lt.f32.partialorder %v2185_v12, 0.0004427343  ;;  %v1180_v42 = vsub.f32 0.0, %v1052_v13 }
 0x28b   :  { %v2583_v47 = vsel %vm2582_vm2, %v2580_v31, %v2577_v30  ;;  %vm2447_vm13 = vcmp.lt.f32.partialorder %v2446_v32, 0.0004427343  ;;  %v2184_v29 = vmul.f32 %v5868_v3, %v2183_v22  ;;  %v2181_v41 = vmul.f32 0.6931472, %v3679_v21 }
 0x28c   :  { %v3681_v37 = vpop.eup %3680  ;;  %v2759_v59 = vsub.f32 %v967_v7, %v2583_v47  ;;  %v2448_v0 = vsel %vm2447_vm13, %v2445_v39, %v2442_v49  ;;  %v1416_v36 = vmul.f32 1.442695, %v1195_v5  ;;  %v2590_v20 = vand.u32 2147483647, %v5884_v19 }
 0x28d   :  { %v3683_v55 = vpop.eup %3682  ;;  %v2744_v62 = vsub.f32 %v952_v8, %v2448_v0  ;;  %v2449_v43 = vadd.f32 1.0, %v3681_v37  ;;  %v2588_v27 = vadd.f32 1.0, %v2587_v44  ;;  %v1068_v10 = vand.u32 2147483647, %v5902_v6  ;;  %v5929_v8 = vpop.xlane.xlu1 %700 }
 0x28e   :  { %v5906_v35 = vpop.eup %3684  ;;  %v3169_v28 = vperm.slane %v2759_v59, %v4207_v9  ;;  %3688 = vpow2.f32 %v1416_v36  ;;  %v1386_v2 = vmul.f32 1.442695, %v1180_v42  ;;  %v923_v7 = vmin.f32 %v5805_v50, 0.0 }
 0x28f   :  { %v5910_v45 = vpop.eup %3686  ;;  %v3140_v3 = vperm.slane %v2744_v62, %v4196_v26  ;;  %3690 = vlog2.f32 %v2449_v43  ;;  %v2314_v24 = vadd.f32 1.0, %v5906_v35  ;;  %v968_v17 = vmin.f32 %v5844_v57, 0.0 }
 0x290   :  { %v5916_v38 = vsel %vm2940_vm4, %v3169_v28, %v3168_v53  ;;  %v953_v9 = vmin.f32 %v5856_v16, 0.0  ;;  %v2187_v12 = vsel %vm5898_vm15, %v2184_v29, %v2181_v41  ;;  %v2452_v58 = vmul.f32 -0.5, %v3681_v37  ;;  %v5945_v29 = vpop.xlane.xlu0 %832 }
 0x291   :  { %v5924_v32 = vsel %vm6390_vm5, %v3140_v3, %v5842_v34  ;;  %3692 = vlog2.f32 %v2314_v24  ;;  %v2586_v48 = vmul.f32 0.6931472, %v3683_v55  ;;  %v2589_v22 = vmul.f32 %v5884_v19, %v2588_v27 }
 0x292   :  { %v2317_v50 = vmul.f32 -0.5, %v5906_v35  ;;  %v2458_v53 = vadd.f32 1.0, %v5910_v45  ;;  %vm5931_vm4 = vcmp.lt.f32.partialorder %v2590_v20, 0.0004427343  ;;  %v938_v13 = vmin.f32 %v5859_v54, 0.0 }
 0x293   :  { %3694 = vpow2.f32 %v1386_v2  ;;  %v1196_v34 = vsub.f32 0.0, %v1068_v10  ;;  %v2715_v30 = vsub.f32 %v923_v7, %v2187_v12  ;;  %v2455_v31 = vand.u32 2147483647, %v3681_v37 }
 0x294   :  { %v5936_v14 = vpop.eup %3688  ;;  %v954_v19 = vmin.f32 %v5865_v33, 0.0  ;;  %3696 = vlog2.f32 %v2458_v53  ;;  %v2453_v49 = vadd.f32 1.0, %v2452_v58  ;;  %v2461_v39 = vmul.f32 -0.5, %v5910_v45 }
 0x295   :  { %v3691_v21 = vpop.eup %3690  ;;  %v939_v44 = vmin.f32 %v5887_v51, 0.0  ;;  %v2323_v5 = vadd.f32 1.0, %v5936_v14  ;;  %v2592_v54 = vsel %vm5931_vm4, %v2589_v22, %v2586_v48  ;;  %v2318_v18 = vadd.f32 1.0, %v2317_v50 }
 0x296   :  { %v924_v47 = vmin.f32 %v5890_v52, 0.0  ;;  %v1418_v42 = vmul.f32 1.442695, %v1196_v34  ;;  %v2451_v0 = vmul.f32 0.6931472, %v3691_v21  ;;  %v3084_v41 = vperm.slane %v2715_v30, %v4240_v4 }
 0x297   :  { %v3693_v59 = vpop.eup %3692  ;;  %v2320_v36 = vand.u32 2147483647, %v5906_v35  ;;  %3698 = vlog2.f32 %v2323_v5  ;;  %v1053_v55 = vand.u32 2147483647, %v5929_v8  ;;  %vm5950_vm0 = vcmp.lt.f32.partialorder %v2455_v31, 0.0004427343 }
 0x298   :  { %v2316_v20 = vmul.f32 0.6931472, %v3693_v59  ;;  %3700 = vpow2.f32 %v1418_v42  ;;  %v2454_v28 = vmul.f32 %v3681_v37, %v2453_v49  ;;  %v2462_v27 = vadd.f32 1.0, %v2461_v39 }
 0x299   :  { %v3695_v43 = vpop.eup %3694  ;;  %v1181_v10 = vsub.f32 0.0, %v1053_v55  ;;  %v1097_v3 = vand.u32 2147483647, %v5945_v29  ;;  %v5955_v2 = vsub.f32 %v968_v17, %v2592_v54  ;;  %v2319_v7 = vmul.f32 %v5906_v35, %v2318_v18  ;;  %v5968_v35 = vpop.xlane.xlu1 %835 }
 0x29a   :  { %v3697_v24 = vpop.eup %3696  ;;  %v2464_v12 = vand.u32 2147483647, %v5910_v45  ;;  %v2188_v58 = vadd.f32 1.0, %v3695_v43  ;;  %v2457_v48 = vsel %vm5950_vm0, %v2454_v28, %v2451_v0  ;;  %vm5961_vm7 = vcmp.lt.f32.partialorder %v2320_v36, 0.0004427343  ;;  %v5988_v28 = vpop.xlane.xlu0 %790 }
 0x29b   :  { %v2326_v37 = vmul.f32 -0.5, %v5936_v14  ;;  %v1388_v50 = vmul.f32 1.442695, %v1181_v10  ;;  %v2322_v53 = vsel %vm5961_vm7, %v2319_v7, %v2316_v20  ;;  %v2191_v17 = vmul.f32 -0.5, %v3695_v43 }
 0x29c   :  { %3702 = vlog2.f32 %v2188_v58  ;;  %v1225_v57 = vsub.f32 0.0, %v1097_v3  ;;  %v2460_v30 = vmul.f32 0.6931472, %v3697_v24  ;;  %v2463_v31 = vmul.f32 %v5910_v45, %v2462_v27  ;;  %v5980_v45 = vpop.xlane.xlu2 %748 }
 0x29d   :  { %v3699_v34 = vpop.eup %3698  ;;  %v2329_v21 = vand.u32 2147483647, %v5936_v14  ;;  %3704 = vpow2.f32 %v1388_v50  ;;  %vm5972_vm8 = vcmp.lt.f32.partialorder %v2464_v12, 0.0004427343  ;;  %v940_v5 = vmin.f32 %v5902_v6, 0.0 }
 0x29e   :  { %v3701_v49 = vpop.eup %3700  ;;  %v925_v54 = vmin.f32 %v5929_v8, 0.0  ;;  %v1476_v18 = vmul.f32 1.442695, %v1225_v57  ;;  %v2745_v42 = vsub.f32 %v953_v9, %v2457_v48  ;;  %v2730_v59 = vsub.f32 %v938_v13, %v2322_v53 }
 0x29f   :  { %v2327_v0 = vadd.f32 1.0, %v2326_v37  ;;  %v2332_v36 = vadd.f32 1.0, %v3701_v49  ;;  %v5984_v55 = vsel %vm2956_vm12, %v3084_v41, %v5880_v63  ;;  %v3171_v62 = vperm.slane %v5955_v2, %v4196_v26 }
 0x2a0   :  { %v2192_v20 = vadd.f32 1.0, %v2191_v17  ;;  %3706 = vpow2.f32 %v1476_v18  ;;  %v2466_v16 = vsel %vm5972_vm8, %v2463_v31, %v2460_v30  ;;  %v2325_v9 = vmul.f32 0.6931472, %v3699_v34 }
 0x2a1   :  { %vm5992_vm10 = vcmp.lt.f32.partialorder %v2329_v21, 0.0004427343  ;;  %v2194_v27 = vand.u32 2147483647, %v3695_v43  ;;  %3708 = vlog2.f32 %v2332_v36  ;;  %v2335_v63 = vmul.f32 -0.5, %v3701_v49 }
 0x2a2   :  { %v3703_v10 = vpop.eup %3702  ;;  %v1069_v41 = vand.u32 2147483647, %v5980_v45  ;;  %v1098_v3 = vand.u32 2147483647, %v5968_v35  ;;  %v3142_v7 = vperm.slane %v2745_v42, %v4186_v60  ;;  %v3113_v12 = vperm.slane %v2730_v59, %v4278_v61  ;;  %v6038_v51 = vpop.xlane.xlu0 %793 }
 0x2a3   :  { %v5998_v24 = vpop.eup %3704  ;;  %v2328_v58 = vmul.f32 %v5936_v14, %v2327_v0  ;;  %v2190_v48 = vmul.f32 0.6931472, %v3703_v10  ;;  %v2746_v22 = vsub.f32 %v954_v19, %v2466_v16  ;;  %v2193_v37 = vmul.f32 %v3695_v43, %v2192_v20  ;;  %v6016_v19 = vpop.xlane.xlu1 %838 }
 0x2a4   :  { %v2197_v50 = vadd.f32 1.0, %v5998_v24  ;;  %v1197_v53 = vsub.f32 0.0, %v1069_v41  ;;  %v2338_v57 = vand.u32 2147483647, %v3701_v49  ;;  %v1226_v34 = vsub.f32 0.0, %v1098_v3  ;;  %v6033_v10 = vpop.xlane.xlu2 %796 }
 0x2a5   :  { %v2331_v17 = vsel %vm5992_vm10, %v2328_v58, %v2325_v9  ;;  %v1083_v30 = vand.u32 2147483647, %v5988_v28  ;;  %vm6011_vm11 = vcmp.lt.f32.partialorder %v2194_v27, 0.0004427343  ;;  %v2336_v14 = vadd.f32 1.0, %v2335_v63 }
 0x2a6   :  { %v6009_v31 = vpop.eup %3706  ;;  %3710 = vlog2.f32 %v2197_v50  ;;  %v969_v33 = vmin.f32 %v5945_v29, 0.0  ;;  %v2196_v43 = vsel %vm6011_vm11, %v2193_v37, %v2190_v48  ;;  %v2200_v39 = vmul.f32 -0.5, %v5998_v24 }
 0x2a7   :  { %v2593_v18 = vadd.f32 1.0, %v6009_v31  ;;  %v1420_v42 = vmul.f32 1.442695, %v1197_v53  ;;  %v3709_v59 = vpop.eup %3708  ;;  %v3143_v0 = vsel %vm6403_vm14, %v3142_v7, %v5924_v32  ;;  %v3114_v36 = vsel %vm2952_vm9, %v3113_v12, %v5874_v1 }
 0x2a8   :  { %v2731_v20 = vsub.f32 %v939_v44, %v2331_v17  ;;  %v1478_v16 = vmul.f32 1.442695, %v1226_v34  ;;  %v3144_v9 = vperm.slane %v2746_v22, %v4278_v61  ;;  %vm6029_vm6 = vcmp.lt.f32.partialorder %v2338_v57, 0.0004427343 }
 0x2a9   :  { %3712 = vlog2.f32 %v2593_v18  ;;  %v1211_v27 = vsub.f32 0.0, %v1083_v30  ;;  %v2716_v32 = vsub.f32 %v924_v47, %v2196_v43  ;;  %v2337_v63 = vmul.f32 %v3701_v49, %v2336_v14 }
 0x2aa   :  { %v2203_v1 = vand.u32 2147483647, %v5998_v24  ;;  %3714 = vpow2.f32 %v1420_v42  ;;  %v2334_v44 = vmul.f32 0.6931472, %v3709_v59  ;;  %v2201_v41 = vadd.f32 1.0, %v2200_v39 }
 0x2ab   :  { %3716 = vpow2.f32 %v1478_v16  ;;  %v1448_v3 = vmul.f32 1.442695, %v1211_v27  ;;  %v3115_v12 = vperm.slane %v2731_v20, %v4240_v4  ;;  %v2596_v58 = vmul.f32 -0.5, %v6009_v31 }
 0x2ac   :  { %v3711_v7 = vpop.eup %3710  ;;  %v1085_v48 = vand.u32 2147483647, %v6033_v10  ;;  %v1099_v52 = vand.u32 2147483647, %v6016_v19  ;;  %v941_v49 = vmin.f32 %v5980_v45, 0.0  ;;  %v6047_v37 = vsel %vm2952_vm9, %v3144_v9, %v3143_v0  ;;  %v6061_v0 = vpop.xlane.xlu1 %844 }
 0x2ad   :  { %v2199_v47 = vmul.f32 0.6931472, %v3711_v7  ;;  %3718 = vpow2.f32 %v1448_v3  ;;  %v1084_v22 = vand.u32 2147483647, %v6038_v51  ;;  %v2599_v50 = vand.u32 2147483647, %v6009_v31 }
 0x2ae   :  { %v970_v53 = vmin.f32 %v5968_v35, 0.0  ;;  %v1213_v17 = vsub.f32 0.0, %v1085_v48  ;;  %v3086_v34 = vperm.slane %v2716_v32, %v4215_v56  ;;  %v2340_v30 = vsel %vm6029_vm6, %v2337_v63, %v2334_v44 }
 0x2af   :  { %v3713_v57 = vpop.eup %3712  ;;  %v2202_v21 = vmul.f32 %v5998_v24, %v2201_v41  ;;  %v955_v14 = vmin.f32 %v5988_v28, 0.0  ;;  %v3116_v39 = vsel %vm2956_vm12, %v3115_v12, %v3114_v36  ;;  %vm6057_vm2 = vcmp.lt.f32.partialorder %v2203_v1, 0.0004427343 }
 0x2b0   :  { %v3715_v43 = vpop.eup %3714  ;;  %v2597_v42 = vadd.f32 1.0, %v2596_v58  ;;  %v1227_v59 = vsub.f32 0.0, %v1099_v52  ;;  %v1212_v13 = vsub.f32 0.0, %v1084_v22  ;;  %v2732_v27 = vsub.f32 %v940_v5, %v2340_v30 }
 0x2b1   :  { %v6063_v20 = vpop.eup %3716  ;;  %v2205_v16 = vsel %vm6057_vm2, %v2202_v21, %v2199_v47  ;;  %v2341_v9 = vadd.f32 1.0, %v3715_v43  ;;  %v2344_v24 = vmul.f32 -0.5, %v3715_v43  ;;  %vm6069_vm15 = vcmp.lt.f32.partialorder %v2599_v50, 0.0004427343  ;;  %v6084_v47 = vpop.xlane.xlu0 %841 }
 0x2b2   :  { %v2602_v32 = vadd.f32 1.0, %v6063_v20  ;;  %v1452_v63 = vmul.f32 1.442695, %v1213_v17  ;;  %v3087_v44 = vsel %vm2960_vm3, %v3086_v34, %v5984_v55  ;;  %v957_v41 = vmin.f32 %v6033_v10, 0.0 }
 0x2b3   :  { %v6074_v1 = vpop.eup %3718  ;;  %3720 = vlog2.f32 %v2341_v9  ;;  %v1101_v3 = vand.u32 2147483647, %v6061_v0  ;;  %v2717_v6 = vsub.f32 %v925_v54, %v2205_v16  ;;  %v2595_v5 = vmul.f32 0.6931472, %v3713_v57 }
 0x2b4   :  { %v2598_v7 = vmul.f32 %v6009_v31, %v2597_v42  ;;  %v1480_v12 = vmul.f32 1.442695, %v1227_v59  ;;  %v2345_v58 = vadd.f32 1.0, %v2344_v24  ;;  %3722 = vlog2.f32 %v2602_v32 }
 0x2b5   :  { %v2467_v48 = vadd.f32 1.0, %v6074_v1  ;;  %v1450_v52 = vmul.f32 1.442695, %v1212_v13  ;;  %v3117_v55 = vperm.slane %v2732_v27, %v4215_v56  ;;  %3724 = vpow2.f32 %v1452_v63 }
 0x2b6   :  { %v971_v22 = vmin.f32 %v6016_v19, 0.0  ;;  %v956_v50 = vmin.f32 %v6038_v51, 0.0  ;;  %v2347_v8 = vand.u32 2147483647, %v3715_v43  ;;  %v2605_v54 = vmul.f32 -0.5, %v6063_v20 }
 0x2b7   :  { %3726 = vlog2.f32 %v2467_v48  ;;  %v1229_v31 = vsub.f32 0.0, %v1101_v3  ;;  %v3088_v17 = vperm.slane %v2717_v6, %v4326_v11  ;;  %v2601_v57 = vsel %vm6069_vm15, %v2598_v7, %v2595_v5 }
 0x2b8   :  { %3728 = vpow2.f32 %v1480_v12  ;;  %v1100_v34 = vand.u32 2147483647, %v6084_v47  ;;  %v2346_v21 = vmul.f32 %v3715_v43, %v2345_v58  ;;  %vm3185_vm13 = vcmask 1042434  }
 0x2b9   :  { %v3721_v30 = vpop.eup %3720  ;;  %3730 = vpow2.f32 %v1450_v52  ;;  %v1484_v18 = vmul.f32 1.442695, %v1229_v31  ;;  %v2470_v59 = vmul.f32 -0.5, %v6074_v1  ;;  %v3186_v9 = vsel %vm3185_vm13, %v4968_v40, %v4697_v46 }
 0x2ba   :  { %v2343_v42 = vmul.f32 0.6931472, %v3721_v30  ;;  %v1228_v16 = vsub.f32 0.0, %v1100_v34  ;;  %v3723_v24 = vpop.eup %3722  ;;  %vm6097_vm5 = vcmp.lt.f32.partialorder %v2347_v8, 0.0004427343  ;;  %v2606_v27 = vadd.f32 1.0, %v2605_v54 }
 0x2bb   :  { %3732 = vpow2.f32 %v1484_v18  ;;  %vm3187_vm4 = vcmask 1043459   ;;  %v3725_v36 = vpop.eup %3724  ;;  %v2608_v43 = vand.u32 2147483647, %v6063_v20  ;;  %v973_v32 = vmin.f32 %v6061_v0, 0.0 }
 0x2bc   :  { %v1482_v63 = vmul.f32 1.442695, %v1228_v16  ;;  %v6104_v3 = vsel %vm3187_vm4, %v5302_v25, %v3186_v9  ;;  %v3118_v46 = vsel %vm2960_vm3, %v3117_v55, %v3116_v39  ;;  %v2473_v40 = vand.u32 2147483647, %v6074_v1 }
 0x2bd   :  { %v3727_v6 = vpop.eup %3726  ;;  %v2485_v5 = vadd.f32 1.0, %v3725_v36  ;;  %v2488_v7 = vmul.f32 -0.5, %v3725_v36  ;;  %v6110_v58 = vsub.f32 %v969_v33, %v2601_v57  ;;  %v2349_v48 = vsel %vm6097_vm5, %v2346_v21, %v2343_v42 }
 0x2be   :  { %v3729_v12 = vpop.eup %3728  ;;  %v2471_v52 = vadd.f32 1.0, %v2470_v59  ;;  %3734 = vpow2.f32 %v1482_v63  ;;  %v3089_v25 = vsel %vm2964_vm1, %v3088_v17, %v3087_v44  ;;  %v2607_v54 = vmul.f32 %v6063_v20, %v2606_v27 }
 0x2bf   :  { %v3731_v8 = vpop.eup %3730  ;;  %3736 = vlog2.f32 %v2485_v5  ;;  %v2611_v39 = vadd.f32 1.0, %v3729_v12  ;;  %v2604_v55 = vmul.f32 0.6931472, %v3723_v24  ;;  %vm6116_vm0 = vcmp.lt.f32.partialorder %v2608_v43, 0.0004427343 }
 0x2c0   :  { %v2489_v29 = vadd.f32 1.0, %v2488_v7  ;;  %v2614_v33 = vmul.f32 -0.5, %v3729_v12  ;;  %v2733_v34 = vsub.f32 %v941_v49, %v2349_v48  ;;  %vm6122_vm7 = vcmp.lt.f32.partialorder %v2473_v40, 0.0004427343 }
 0x2c1   :  { %v3733_v57 = vpop.eup %3732  ;;  %v2491_v44 = vand.u32 2147483647, %v3725_v36  ;;  %3738 = vlog2.f32 %v2611_v39  ;;  %v2469_v20 = vmul.f32 0.6931472, %v3727_v6  ;;  %v2472_v17 = vmul.f32 %v6074_v1, %v2471_v52 }
 0x2c2   :  { %v2476_v21 = vadd.f32 1.0, %v3731_v8  ;;  %v6128_v18 = vshrl.u32 %v2769_v15, 7  ;;  %v2615_v42 = vadd.f32 1.0, %v2614_v33  ;;  %v2479_v59 = vmul.f32 -0.5, %v3731_v8 }
 0x2c3   :  { %v2629_v16 = vadd.f32 1.0, %v3733_v57  ;;  %vm3189_vm8 = vcmask 1044484   ;;  %v2610_v45 = vsel %vm6116_vm0, %v2607_v54, %v2604_v55  ;;  %v2490_v49 = vmul.f32 %v3725_v36, %v2489_v29 }
 0x2c4   :  { %v3735_v9 = vpop.eup %3734  ;;  %3740 = vlog2.f32 %v2476_v21  ;;  %v2632_v24 = vmul.f32 -0.5, %v3733_v57  ;;  %v3119_v27 = vperm.slane %v2733_v34, %v4326_v11  ;;  %vm6133_vm10 = vcmp.lt.f32.partialorder %v2491_v44, 0.0004427343 }
 0x2c5   :  { %v3737_v13 = vpop.eup %3736  ;;  %v2617_v15 = vand.u32 2147483647, %v3729_v12  ;;  %3742 = vlog2.f32 %v2629_v16  ;;  %v2475_v43 = vsel %vm6122_vm7, %v2472_v17, %v2469_v20  ;;  %v2482_v6 = vand.u32 2147483647, %v3731_v8 }
 0x2c6   :  { %v2487_v63 = vmul.f32 0.6931472, %v3737_v13  ;;  %v2620_v40 = vadd.f32 1.0, %v3735_v9  ;;  %v2762_v36 = vsub.f32 %v970_v53, %v2610_v45  ;;  %v2616_v7 = vmul.f32 %v3729_v12, %v2615_v42 }
 0x2c7   :  { %v3739_v5 = vpop.eup %3738  ;;  %v2480_v48 = vadd.f32 1.0, %v2479_v59  ;;  %v2623_v52 = vmul.f32 -0.5, %v3735_v9  ;;  %v2633_v55 = vadd.f32 1.0, %v2632_v24  ;;  %v2747_v31 = vsub.f32 %v955_v14, %v2475_v43 }
 0x2c8   :  { %v2493_v54 = vsel %vm6133_vm10, %v2490_v49, %v2487_v63  ;;  %v2613_v39 = vmul.f32 0.6931472, %v3739_v5  ;;  %3744 = vlog2.f32 %v2620_v40  ;;  %vm6145_vm11 = vcmp.lt.f32.partialorder %v2617_v15, 0.0004427343 }
 0x2c9   :  { %v2635_v33 = vand.u32 2147483647, %v3733_v57  ;;  %v3120_v35 = vsel %vm2964_vm1, %v3119_v27, %v3118_v46  ;;  %vm6152_vm14 = vcmp.lt.f32.partialorder %v2482_v6, 0.0004427343  ;;  %v3190_v30 = vsel %vm3189_vm8, %v3089_v25, %v6104_v3 }
 0x2ca   :  { %v3741_v53 = vpop.eup %3740  ;;  %v2619_v12 = vsel %vm6145_vm11, %v2616_v7, %v2613_v39  ;;  %vm3191_vm6 = vcmask 1045509   ;;  %v2749_v14 = vsub.f32 %v957_v41, %v2493_v54  ;;  %v2481_v20 = vmul.f32 %v3731_v8, %v2480_v48 }
 0x2cb   :  { %v3743_v28 = vpop.eup %3742  ;;  %v2478_v44 = vmul.f32 0.6931472, %v3741_v53  ;;  %v2624_v17 = vadd.f32 1.0, %v2623_v52  ;;  %v2634_v21 = vmul.f32 %v3733_v57, %v2633_v55  ;;  %v2626_v42 = vand.u32 2147483647, %v3735_v9 }
 0x2cc   :  { %v2631_v46 = vmul.f32 0.6931472, %v3743_v28  ;;  %v3192_v59 = vsel %vm3191_vm6, %v3120_v35, %v3190_v30  ;;  %v3146_v16 = vperm.slane %v2747_v31, %v4240_v4  ;;  %v2763_v45 = vsub.f32 %v971_v22, %v2619_v12 }
 0x2cd   :  { %v2484_v3 = vsel %vm6152_vm14, %v2481_v20, %v2478_v44  ;;  %vm2636_vm2 = vcmp.lt.f32.partialorder %v2635_v33, 0.0004427343  ;;  %v3173_v10 = vperm.slane %v6110_v58, %v4186_v60  ;;  %v2771_v57 = vmul.u32 128, %v6128_v18 }
 0x2ce   :  { %v3745_v25 = vpop.eup %3744  ;;  %v2748_v41 = vsub.f32 %v956_v50, %v2484_v3  ;;  %v2637_v8 = vsel %vm2636_vm2, %v2634_v21, %v2631_v46  ;;  %v3150_v49 = vperm.slane %v2749_v14, %v4326_v11  ;;  %v2625_v24 = vmul.f32 %v3735_v9, %v2624_v17 }
 0x2cf   :  { %v2765_v19 = vsub.f32 %v973_v32, %v2637_v8  ;;  %v2622_v22 = vmul.f32 0.6931472, %v3745_v25  ;;  %v3175_v13 = vperm.slane %v2762_v36, %v4278_v61  ;;  %v972_v1 = vmin.f32 %v6084_v47, 0.0 }
 0x2d0   :  { %v3148_v27 = vperm.slane %v2748_v41, %v4215_v56  ;;  %vm2627_vm15 = vcmp.lt.f32.partialorder %v2626_v42, 0.0004427343  ;;  %v3147_v60 = vsel %vm2956_vm12, %v3146_v16, %v6047_v37  ;;  %v3177_v51 = vperm.slane %v2763_v45, %v4240_v4 }
 0x2d1   :  { %v2628_v50 = vsel %vm2627_vm15, %v2625_v24, %v2622_v22  ;;  %vm3193_vm13 = vcmask 1046534   ;;  %vm6422_vm5 = vcmask 720512   ;;  %v2775_v61 = vadd.s32 %v4006_v23, %v2771_v57 }
 0x2d2   :  { %v3172_v0 = vsel %vm6422_vm5, %v3171_v62, %v5916_v38  ;;  %v2764_v32 = vsub.f32 %v972_v1, %v2628_v50  ;;  %v3149_v58 = vsel %vm2960_vm3, %v3148_v27, %v3147_v60  ;;  %vm6423_vm4 = vcmask 786112  }
 0x2d3   :  { %v3174_v47 = vsel %vm6423_vm4, %v3173_v10, %v3172_v0  ;;  %v3181_v18 = vperm.slane %v2765_v19, %v4326_v11  ;;  %v3151_v37 = vsel %vm2964_vm1, %v3150_v49, %v3149_v58  ;;  %vm3195_vm0 = vcmask 1047559  }
 0x2d4   :  { %v3176_v4 = vsel %vm2952_vm9, %v3175_v13, %v3174_v47  ;;  %v3179_v9 = vperm.slane %v2764_v32, %v4215_v56  ;;  %v3194_v15 = vsel %vm3193_vm13, %v3151_v37, %v3192_v59  ;;  %vm2776_vm7 = vcmp.lt.s32.totalorder %v2775_v61, 8 }
 0x2d5   :  { %v3178_v26 = vsel %vm2956_vm12, %v3177_v51, %v3176_v4 }
 0x2d6   :  { %v3180_v38 = vsel %vm2960_vm3, %v3179_v9, %v3178_v26 }
 0x2d7   :  { %v3182_v23 = vsel %vm2964_vm1, %v3181_v18, %v3180_v38 }
 0x2d8   :  { %v3196_v2 = vsel %vm3195_vm0, %v3182_v23, %v3194_v15 }
 0x2d9   :  { %v3198_v62 = vsel %vm2776_vm7, %v3196_v2, 0.0 }
 0x2da   :  { %3207 = vadd.xlane.f32.xlu2 %v3198_v62 }
 0x34d   :  { %v3208_v43 = vpop.xlane.xlu2 %3207 }
 0x34e   :  { %v3209_v11 = vrot.slane %v3208_v43, 4 }
 0x350   :  { %v3210_v63 = vadd.f32 %v3209_v11, %v3208_v43 }
 0x352   :  { %v3211_v6 = vrot.slane %v3210_v63, 2 }
 0x354   :  { %v3212_v40 = vadd.f32 %v3211_v6, %v3210_v63 }
 0x356   :  { %v3213_v5 = vrot.slane %v3212_v40, 1 }
 0x358   :  { %v3214_v36 = vadd.f32 %v3213_v5, %v3212_v40 }
 0x35a   :  { %3229 = vpush %v3214_v36 }
 0x38b   :  { %s3230_s0 = spop %3229 }
 0x38c   :  { %v3216_v56 = vstv %s3230_s0 }
 0x38d   :  { %3217 = vst [vmem:[%s6199_s2] sm:$0xff] %v3216_v56 }
 0x38e   :  { %3222 = vsyncpa [#allocation4], 1 }

</bundles_post_ra>
